<compile_context>
chip_gen: v5e
topology: v5e:2x2
jax: 0.10.0
libtpu: 0.0.40
codegen_flags: <defaults>
</compile_context>

<pallas_src>
import functools

import numpy as np

import jax
import jax.numpy as jnp
from jax.experimental import pallas as pl
from jax.experimental.pallas import tpu as pltpu

# Synthetic "penn" constants (scaled down from WINDOW_SIZE=1024, PITCH_BINS=1440).
PENN_SAMPLE_RATE = 8000
WINDOW_SIZE = 64
PITCH_BINS = 128


def _cdiv(a, b):
    return -(-a // b)


# ----------------------------- Pallas kernel --------------------------------
def _fused_fcnf0_kernel(*refs, layer_meta, softmax):
    """Per-tile fused pipeline: frame normalization + banded-group conv matmuls.

    refs = (frames_ref, w_0, b_0, w_1, b_1, ..., out_ref), one (w, b) pair per
    banded group, in (layer, group) order.
      frames_ref : (TM, WINDOW_SIZE) f32
      w_g        : (band_cols, group*Cout) bf16 banded conv matrix
      b_g        : (1, group*Cout)         f32
      out_ref    : (TM, PITCH_BINS)
    layer_meta : tuple of (relu: bool, col_starts: tuple[int, ...]) per layer.
    """
    x_ref = refs[0]
    o_ref = refs[-1]
    params = refs[1:-1]
    assert len(params) == 2 * sum(len(cs) for _, cs in layer_meta)

    # Per-frame zero-mean / unit-std normalization (f32, lane reduction on the XLU).
    x = x_ref[...].astype(jnp.float32)
    mean = jnp.mean(x, axis=-1, keepdims=True)
    xc = x - mean
    var = jnp.mean(xc * xc, axis=-1, keepdims=True)
    h = (xc * jax.lax.rsqrt(var + 1e-5)).astype(jnp.bfloat16)

    n_layers = len(layer_meta)
    p = 0
    for li, (relu, col_starts) in enumerate(layer_meta):
        last = li + 1 == n_layers
        outs = []
        for col0 in col_starts:
            w_ref, b_ref = params[p], params[p + 1]
            p += 2
            band = w_ref.shape[0]
            # Static, 128-aligned column band of the previous activation.
            acc = jnp.dot(h[:, col0:col0 + band], w_ref[...],
                          preferred_element_type=jnp.float32)
            acc = acc + b_ref[...]
            if relu:
                acc = jnp.maximum(acc, 0.0)
            # Cast to bf16 right after bias+ReLU (keeps inter-layer staging small).
            outs.append(acc if last else acc.astype(jnp.bfloat16))
        a = outs[0] if len(outs) == 1 else jnp.concatenate(outs, axis=-1)
        if last:
            if softmax:
                # Fused softmax epilogue: EUP exp + XLU row-sum, no extra HBM pass.
                m = jnp.max(a, axis=-1, keepdims=True)
                e = jnp.exp(a - m)
                a = e / jnp.sum(e, axis=-1, keepdims=True)
            o_ref[...] = a.astype(o_ref.dtype)
        else:
            h = a


def fused_fcnf0(frames, params, layer_meta, tile_m, out_dtype, *, softmax=False):
    """frames: (Mpad, WINDOW_SIZE) f32, Mpad % tile_m == 0 -> (Mpad, PITCH_BINS)."""
    m_pad, w = frames.shape
    in_specs = [pl.BlockSpec((tile_m, w), lambda i: (i, 0))]
    args = [frames]
    for wd, bd in params:
        # Grid-invariant blocks: weights/biases stay resident in VMEM across tiles.
        # TODO(synk): at the real FCNF0++ size, single-buffer these
        # (pipeline_mode=pl.Buffered(1)) or stream K-tiles instead of keeping all
        # weights resident; ~0.9 MB total here so default double-buffering is fine.
        in_specs.append(pl.BlockSpec(wd.shape, lambda i: (0, 0)))
        in_specs.append(pl.BlockSpec(bd.shape, lambda i: (0, 0)))
        args.append(wd)
        args.append(bd)

    return pl.pallas_call(
        functools.partial(_fused_fcnf0_kernel, layer_meta=layer_meta, softmax=softmax),
        out_shape=jax.ShapeDtypeStruct((m_pad, PITCH_BINS), out_dtype),
        grid=(m_pad // tile_m,),
        in_specs=in_specs,
        out_specs=pl.BlockSpec((tile_m, PITCH_BINS), lambda i: (i, 0)),
        compiler_params=pltpu.CompilerParams(
            dimension_semantics=("parallel",),   # even grid -> both v7x TCs busy
            vmem_limit_bytes=48 * 1024 * 1024,
        ),
    )(*args)


# ------------------------------- glue (JAX) ---------------------------------
def frame_signal(x, frame_length, frame_period):
    """diffsptk Frame(center=True, mode='reflect'): (B, T) -> (B, N, frame_length)."""
    pad = (frame_length // 2, (frame_length - 1) // 2)
    xp = jnp.pad(x, ((0, 0), pad), mode="reflect")
    _, t_pad = xp.shape
    n = (t_pad - frame_length) // frame_period + 1
    idx = jnp.arange(n)[:, None] * frame_period + jnp.arange(frame_length)[None, :]
    return xp[:, idx]


def _choose_tiling(m, max_tile=2048, gran=128):
    """Pick (tile_m, m_pad) for the frame axis.

    * tile_m is a multiple of 128 (bf16 sublane packing / MXU M granularity); for
      anything but tiny inputs it lands on a multiple of 256.
    * The grid length is always even so dimension_semantics=("parallel",) keeps both
      v7x TensorCores busy (harmless on single-TC v5e/v6e).
    * Tiles grow up to `max_tile` rows to amortize the ~0.35us/step grid overhead.
    """
    grid = 2 * max(1, _cdiv(m, 2 * max_tile))
    tile = max(gran, _cdiv(_cdiv(m, grid), gran) * gran)
    return tile, tile * grid


def _init_conv(key, cin, cout, k):
    kw, kb = jax.random.split(key)
    scale = 1.0 / jnp.sqrt(float(cin * k))
    w = jax.random.normal(kw, (cout, cin, k), jnp.float32) * scale
    b = jax.random.normal(kb, (cout,), jnp.float32) * scale
    return w, b


def _banded_conv_groups(w, b, stride, l_in_layout, l_in_valid,
                        l_out_valid, l_out_layout, group_size):
    """Fold a valid Conv1d into lane-aligned *banded group* matrices.

    Activations are position-major / channel-minor (column p*Cin + ci).  Each group
    computes `group_size` consecutive output positions (N = group_size*Cout lanes)
    from a 128-aligned column band of the input, so no matmul carries the large
    off-band zero blocks of a full Toeplitz matrix.  Output positions >= l_out_valid
    (layout padding) get zero weights and zero bias, so ReLU keeps them exactly 0.

    Returns [(col_start, W_band (band_cols, group*Cout), bias (1, group*Cout)), ...].
    """
    c_out, c_in, k = w.shape
    assert l_out_layout % group_size == 0
    groups = []
    for j in range(l_out_layout // group_size):
        q0 = j * group_size
        q_hi = min(q0 + group_size, l_out_valid)           # exclusive, valid outputs
        p_lo = q0 * stride
        p_hi = (q_hi - 1) * stride + k                     # exclusive input position
        col0 = (p_lo * c_in) // 128 * 128
        col1 = min(l_in_layout * c_in, _cdiv(p_hi * c_in, 128) * 128)
        wband = np.zeros((col1 - col0, group_size * c_out), np.float32)
        bband = np.zeros((1, group_size * c_out), np.float32)
        for q in range(q0, q_hi):
            oc0 = (q - q0) * c_out
            bband[0, oc0:oc0 + c_out] = b
            for t in range(k):
                r0 = (q * stride + t) * c_in - col0
                wband[r0:r0 + c_in, oc0:oc0 + c_out] = w[:, :, t].T
        groups.append((col0, wband, bband))
    return groups


class PitchExtractionByFCNF0:
    """Synthetic-weight JAX/Pallas port of the PyTorch module's forward pass."""

    # (cin, cout, kernel, stride, relu) — fully convolutional: 64 samples -> 1 step.
    _SPEC = (
        (1, 32, 9, 2, True),
        (32, 32, 9, 2, True),
        (32, 64, 5, 1, True),
        (64, 64, 3, 1, True),
        (64, PITCH_BINS, 4, 1, False),
    )
    # Output positions per MXU matmul: group*Cout = 128 lanes for layers 2-5.
    # Layer 1 (Cin=1, 64-sample input) stays one dense matmul (tiny contraction).
    _GROUP = (28, 4, 2, 2, 1)
    # Padded output-position count kept in the activation layout: every inter-layer
    # width is a multiple of 128 lanes (896 / 384 / 384 / 256 / 128).
    _LAYOUT = (28, 12, 6, 4, 1)

    def __init__(self, frame_period, sample_rate, *, voicing_threshold=0.5, key=None):
        if sample_rate != PENN_SAMPLE_RATE:
            # TODO(synk): general sinc resampling (torchaudio Resample) not implemented.
            raise NotImplementedError("sample_rate must equal PENN_SAMPLE_RATE in this port")
        self.voicing_threshold = voicing_threshold
        self.hop = frame_period * PENN_SAMPLE_RATE // sample_rate

        keys = jax.random.split(key, len(self._SPEC))
        self.conv_params = []  # raw conv weights (also used by the pure-JAX reference)
        for k_, (ci, co, kk, st, rl) in zip(keys, self._SPEC):
            w, b = _init_conv(k_, ci, co, kk)
            self.conv_params.append((w, b, st, rl))

        # Fold each conv into banded-group matrices once; bf16 weights, f32 biases.
        self.layer_meta = []   # (relu, col_starts) per layer — static kernel metadata
        self.params = []       # flat [(w_bf16, b_f32), ...] in (layer, group) order
        l_layout, l_valid = WINDOW_SIZE, WINDOW_SIZE
        for (w, b, st, rl), g, lo_layout in zip(self.conv_params, self._GROUP, self._LAYOUT):
            w_np = np.asarray(w)
            c_out, _, kk = w_np.shape
            l_out_valid = (l_valid - kk) // st + 1
            assert l_out_valid <= lo_layout and lo_layout % g == 0
            assert (lo_layout * c_out) % 128 == 0
            groups = _banded_conv_groups(w_np, np.asarray(b), st,
                                         l_layout, l_valid, l_out_valid, lo_layout, g)
            self.layer_meta.append((rl, tuple(c0 for c0, _, _ in groups)))
            for _, wband, bband in groups:
                self.params.append((jnp.asarray(wband, jnp.bfloat16),
                                    jnp.asarray(bband, jnp.float32)))
            l_layout, l_valid = lo_layout, l_out_valid
        self.layer_meta = tuple(self.layer_meta)
        assert l_layout * self._SPEC[-1][1] == PITCH_BINS

    def _run(self, x, softmax):
        # 1) resample: identity (orig_freq == new_freq).
        # 2) frame.
        frames = frame_signal(x, WINDOW_SIZE, self.hop)              # (B, N, W)
        b, n, w = frames.shape
        m = b * n
        f2 = frames.reshape(m, w).astype(jnp.float32)

        # One pad of the row axis up front; 128-multiple tiles, even grid length.
        tile_m, m_pad = _choose_tiling(m)
        if m_pad != m:
            f2 = jnp.pad(f2, ((0, m_pad - m), (0, 0)))

        # 3) fused penn.infer-style per-frame CNN (f32 accumulation, cast to x.dtype).
        out = fused_fcnf0(f2, self.params, self.layer_meta, tile_m, x.dtype,
                          softmax=softmax)                           # (m_pad, PITCH_BINS)
        return out[:m].reshape(b, n, PITCH_BINS)

    def forward(self, x):
        return self._run(x, softmax=False)

    def calc_prob(self, x):
        # Softmax fused into the kernel epilogue (no extra HBM round trip for logits).
        return self._run(x, softmax=True)


# -------------------------- pure-JAX reference -------------------------------
def _reference_forward(module, x):
    """f32 reference using the raw conv weights (no Pallas, no banded folding)."""
    frames = frame_signal(x, WINDOW_SIZE, module.hop)
    b, n, w = frames.shape
    h = frames.reshape(b * n, w).astype(jnp.float32)
    mean = jnp.mean(h, axis=-1, keepdims=True)
    hc = h - mean
    var = jnp.mean(hc * hc, axis=-1, keepdims=True)
    h = hc * jax.lax.rsqrt(var + 1e-5)
    h = h.reshape(b * n, 1, w)
    for cw, cb, st, rl in module.conv_params:
        h = jax.lax.conv_general_dilated(
            h, cw, window_strides=(st,), padding="VALID",
            dimension_numbers=("NCH", "OIH", "NCH"))
        h = h + cb[None, :, None]
        if rl:
            h = jnp.maximum(h, 0.0)
    return h.reshape(b, n, PITCH_BINS).astype(x.dtype)


if __name__ == "__main__":
    key = jax.random.PRNGKey(0)
    kx, kp = jax.random.split(key)

    B, T = 2, 128
    frame_period = 16
    x = jax.random.normal(kx, (B, T), jnp.float32)

    module = PitchExtractionByFCNF0(frame_period, PENN_SAMPLE_RATE, key=kp)

    logits = jax.block_until_ready(jax.jit(module.forward)(x))

    expected_n = (T - 1) // frame_period + 1
    assert logits.shape == (B, expected_n, PITCH_BINS), logits.shape
    assert logits.dtype == x.dtype
    assert bool(jnp.all(jnp.isfinite(logits)))

    # Numerical check against a pure-JAX f32 reference (bf16 operands => loose tolerance).
    ref = jax.block_until_ready(_reference_forward(module, x))
    num = jnp.linalg.norm(logits.astype(jnp.float32) - ref.astype(jnp.float32))
    den = jnp.linalg.norm(ref.astype(jnp.float32)) + 1e-12
    assert float(num / den) < 0.1, float(num / den)

    # Fused-softmax path.
    prob = jax.block_until_ready(jax.jit(module.calc_prob)(x))
    assert prob.shape == logits.shape
    assert bool(jnp.all(jnp.isfinite(prob)))
    assert bool(jnp.allclose(prob.sum(-1), 1.0, atol=1e-4))

    print("KERNEL_OK")
</pallas_src>

<mosaic_0001>
module attributes {stable_mosaic.version = 11 : i64} {
  func.func @_fused_fcnf0_kernel(%arg0: i32, %arg1: memref<128x64xf32, #tpu.memory_space<vmem>>, %arg2: memref<64x896xbf16, #tpu.memory_space<vmem>>, %arg3: memref<1x896xf32, #tpu.memory_space<vmem>>, %arg4: memref<512x128xbf16, #tpu.memory_space<vmem>>, %arg5: memref<1x128xf32, #tpu.memory_space<vmem>>, %arg6: memref<512x128xbf16, #tpu.memory_space<vmem>>, %arg7: memref<1x128xf32, #tpu.memory_space<vmem>>, %arg8: memref<384x128xbf16, #tpu.memory_space<vmem>>, %arg9: memref<1x128xf32, #tpu.memory_space<vmem>>, %arg10: memref<256x128xbf16, #tpu.memory_space<vmem>>, %arg11: memref<1x128xf32, #tpu.memory_space<vmem>>, %arg12: memref<256x128xbf16, #tpu.memory_space<vmem>>, %arg13: memref<1x128xf32, #tpu.memory_space<vmem>>, %arg14: memref<256x128xbf16, #tpu.memory_space<vmem>>, %arg15: memref<1x128xf32, #tpu.memory_space<vmem>>, %arg16: memref<256x128xbf16, #tpu.memory_space<vmem>>, %arg17: memref<1x128xf32, #tpu.memory_space<vmem>>, %arg18: memref<256x128xbf16, #tpu.memory_space<vmem>>, %arg19: memref<1x128xf32, #tpu.memory_space<vmem>>, %arg20: memref<256x128xbf16, #tpu.memory_space<vmem>>, %arg21: memref<1x128xf32, #tpu.memory_space<vmem>>, %arg22: memref<128x128xf32, #tpu.memory_space<vmem>>) attributes {dimension_semantics = [#tpu.dimension_semantics<parallel>], iteration_bounds = array<i64: 2>, scalar_prefetch = 0 : i64, scratch_operands = 0 : i64, tpu.core_type = #tpu.core_type<tc>, window_params = [{transform_indices = @transform_0, window_bounds = array<i64: 128, 64>}, {pipeline_mode = #tpu.pipeline_mode<synchronous>, transform_indices = @transform_1, window_bounds = array<i64: 64, 896>}, {pipeline_mode = #tpu.pipeline_mode<synchronous>, transform_indices = @transform_2, window_bounds = array<i64: 1, 896>}, {pipeline_mode = #tpu.pipeline_mode<synchronous>, transform_indices = @transform_3, window_bounds = array<i64: 512, 128>}, {pipeline_mode = #tpu.pipeline_mode<synchronous>, transform_indices = @transform_4, window_bounds = array<i64: 1, 128>}, {pipeline_mode = #tpu.pipeline_mode<synchronous>, transform_indices = @transform_5, window_bounds = array<i64: 512, 128>}, {pipeline_mode = #tpu.pipeline_mode<synchronous>, transform_indices = @transform_6, window_bounds = array<i64: 1, 128>}, {pipeline_mode = #tpu.pipeline_mode<synchronous>, transform_indices = @transform_7, window_bounds = array<i64: 384, 128>}, {pipeline_mode = #tpu.pipeline_mode<synchronous>, transform_indices = @transform_8, window_bounds = array<i64: 1, 128>}, {pipeline_mode = #tpu.pipeline_mode<synchronous>, transform_indices = @transform_9, window_bounds = array<i64: 256, 128>}, {pipeline_mode = #tpu.pipeline_mode<synchronous>, transform_indices = @transform_10, window_bounds = array<i64: 1, 128>}, {pipeline_mode = #tpu.pipeline_mode<synchronous>, transform_indices = @transform_11, window_bounds = array<i64: 256, 128>}, {pipeline_mode = #tpu.pipeline_mode<synchronous>, transform_indices = @transform_12, window_bounds = array<i64: 1, 128>}, {pipeline_mode = #tpu.pipeline_mode<synchronous>, transform_indices = @transform_13, window_bounds = array<i64: 256, 128>}, {pipeline_mode = #tpu.pipeline_mode<synchronous>, transform_indices = @transform_14, window_bounds = array<i64: 1, 128>}, {pipeline_mode = #tpu.pipeline_mode<synchronous>, transform_indices = @transform_15, window_bounds = array<i64: 256, 128>}, {pipeline_mode = #tpu.pipeline_mode<synchronous>, transform_indices = @transform_16, window_bounds = array<i64: 1, 128>}, {pipeline_mode = #tpu.pipeline_mode<synchronous>, transform_indices = @transform_17, window_bounds = array<i64: 256, 128>}, {pipeline_mode = #tpu.pipeline_mode<synchronous>, transform_indices = @transform_18, window_bounds = array<i64: 1, 128>}, {pipeline_mode = #tpu.pipeline_mode<synchronous>, transform_indices = @transform_19, window_bounds = array<i64: 256, 128>}, {pipeline_mode = #tpu.pipeline_mode<synchronous>, transform_indices = @transform_20, window_bounds = array<i64: 1, 128>}, {transform_indices = @transform_21, window_bounds = array<i64: 128, 128>}]} {
    %c0 = arith.constant 0 : index
    %c0_0 = arith.constant 0 : index
    %0 = vector.load %arg1[%c0, %c0_0] : memref<128x64xf32, #tpu.memory_space<vmem>>, vector<128x64xf32>
    %cst = arith.constant dense<0.000000e+00> : vector<128xf32>
    %1 = vector.multi_reduction <add>, %0, %cst [1] : vector<128x64xf32> to vector<128xf32>
    %2 = vector.shape_cast %1 : vector<128xf32> to vector<128x1xf32>
    %cst_1 = arith.constant 6.400000e+01 : f32
    %3 = vector.broadcast %cst_1 : f32 to vector<128x1xf32>
    %4 = arith.divf %2, %3 : vector<128x1xf32>
    %5 = vector.broadcast %4 : vector<128x1xf32> to vector<128x64xf32>
    %6 = arith.subf %0, %5 : vector<128x64xf32>
    %7 = arith.mulf %6, %6 : vector<128x64xf32>
    %cst_2 = arith.constant dense<0.000000e+00> : vector<128xf32>
    %8 = vector.multi_reduction <add>, %7, %cst_2 [1] : vector<128x64xf32> to vector<128xf32>
    %9 = vector.shape_cast %8 : vector<128xf32> to vector<128x1xf32>
    %cst_3 = arith.constant 6.400000e+01 : f32
    %10 = vector.broadcast %cst_3 : f32 to vector<128x1xf32>
    %11 = arith.divf %9, %10 : vector<128x1xf32>
    %cst_4 = arith.constant 9.99999974E-6 : f32
    %12 = vector.broadcast %cst_4 : f32 to vector<128x1xf32>
    %13 = arith.addf %11, %12 : vector<128x1xf32>
    %14 = math.rsqrt %13 : vector<128x1xf32>
    %15 = vector.broadcast %14 : vector<128x1xf32> to vector<128x64xf32>
    %16 = arith.mulf %6, %15 : vector<128x64xf32>
    %17 = arith.truncf %16 : vector<128x64xf32> to vector<128x64xbf16>
    %c0_5 = arith.constant 0 : index
    %c0_6 = arith.constant 0 : index
    %18 = vector.load %arg2[%c0_5, %c0_6] : memref<64x896xbf16, #tpu.memory_space<vmem>>, vector<64x896xbf16>
    %cst_7 = arith.constant dense<0.000000e+00> : vector<128x896xf32>
    %19 = tpu.matmul %17, %18, %cst_7 {dimension_numbers = #tpu.dot_dimension_numbers<[1], [0], [0], [1], [0, 0, 1, 1], [], []>} : vector<128x64xbf16>, vector<64x896xbf16>, vector<128x896xf32> -> vector<128x896xf32>
    %c0_8 = arith.constant 0 : index
    %c0_9 = arith.constant 0 : index
    %20 = vector.load %arg3[%c0_8, %c0_9] : memref<1x896xf32, #tpu.memory_space<vmem>>, vector<1x896xf32>
    %21 = vector.broadcast %20 : vector<1x896xf32> to vector<128x896xf32>
    %22 = arith.addf %19, %21 : vector<128x896xf32>
    %cst_10 = arith.constant 0.000000e+00 : f32
    %23 = vector.broadcast %cst_10 : f32 to vector<128x896xf32>
    %24 = arith.maximumf %22, %23 : vector<128x896xf32>
    %25 = arith.truncf %24 : vector<128x896xf32> to vector<128x896xbf16>
    %26 = vector.extract_strided_slice %25 {offsets = [0, 0], sizes = [128, 512], strides = [1, 1]} : vector<128x896xbf16> to vector<128x512xbf16>
    %c0_11 = arith.constant 0 : index
    %c0_12 = arith.constant 0 : index
    %27 = vector.load %arg4[%c0_11, %c0_12] : memref<512x128xbf16, #tpu.memory_space<vmem>>, vector<512x128xbf16>
    %cst_13 = arith.constant dense<0.000000e+00> : vector<128x128xf32>
    %28 = tpu.matmul %26, %27, %cst_13 {dimension_numbers = #tpu.dot_dimension_numbers<[1], [0], [0], [1], [0, 0, 1, 1], [], []>} : vector<128x512xbf16>, vector<512x128xbf16>, vector<128x128xf32> -> vector<128x128xf32>
    %c0_14 = arith.constant 0 : index
    %c0_15 = arith.constant 0 : index
    %29 = vector.load %arg5[%c0_14, %c0_15] : memref<1x128xf32, #tpu.memory_space<vmem>>, vector<1x128xf32>
    %30 = vector.broadcast %29 : vector<1x128xf32> to vector<128x128xf32>
    %31 = arith.addf %28, %30 : vector<128x128xf32>
    %cst_16 = arith.constant 0.000000e+00 : f32
    %32 = vector.broadcast %cst_16 : f32 to vector<128x128xf32>
    %33 = arith.maximumf %31, %32 : vector<128x128xf32>
    %34 = arith.truncf %33 : vector<128x128xf32> to vector<128x128xbf16>
    %35 = vector.extract_strided_slice %25 {offsets = [0, 256], sizes = [128, 512], strides = [1, 1]} : vector<128x896xbf16> to vector<128x512xbf16>
    %c0_17 = arith.constant 0 : index
    %c0_18 = arith.constant 0 : index
    %36 = vector.load %arg6[%c0_17, %c0_18] : memref<512x128xbf16, #tpu.memory_space<vmem>>, vector<512x128xbf16>
    %cst_19 = arith.constant dense<0.000000e+00> : vector<128x128xf32>
    %37 = tpu.matmul %35, %36, %cst_19 {dimension_numbers = #tpu.dot_dimension_numbers<[1], [0], [0], [1], [0, 0, 1, 1], [], []>} : vector<128x512xbf16>, vector<512x128xbf16>, vector<128x128xf32> -> vector<128x128xf32>
    %c0_20 = arith.constant 0 : index
    %c0_21 = arith.constant 0 : index
    %38 = vector.load %arg7[%c0_20, %c0_21] : memref<1x128xf32, #tpu.memory_space<vmem>>, vector<1x128xf32>
    %39 = vector.broadcast %38 : vector<1x128xf32> to vector<128x128xf32>
    %40 = arith.addf %37, %39 : vector<128x128xf32>
    %cst_22 = arith.constant 0.000000e+00 : f32
    %41 = vector.broadcast %cst_22 : f32 to vector<128x128xf32>
    %42 = arith.maximumf %40, %41 : vector<128x128xf32>
    %43 = arith.truncf %42 : vector<128x128xf32> to vector<128x128xbf16>
    %44 = vector.extract_strided_slice %25 {offsets = [0, 512], sizes = [128, 384], strides = [1, 1]} : vector<128x896xbf16> to vector<128x384xbf16>
    %c0_23 = arith.constant 0 : index
    %c0_24 = arith.constant 0 : index
    %45 = vector.load %arg8[%c0_23, %c0_24] : memref<384x128xbf16, #tpu.memory_space<vmem>>, vector<384x128xbf16>
    %cst_25 = arith.constant dense<0.000000e+00> : vector<128x128xf32>
    %46 = tpu.matmul %44, %45, %cst_25 {dimension_numbers = #tpu.dot_dimension_numbers<[1], [0], [0], [1], [0, 0, 1, 1], [], []>} : vector<128x384xbf16>, vector<384x128xbf16>, vector<128x128xf32> -> vector<128x128xf32>
    %c0_26 = arith.constant 0 : index
    %c0_27 = arith.constant 0 : index
    %47 = vector.load %arg9[%c0_26, %c0_27] : memref<1x128xf32, #tpu.memory_space<vmem>>, vector<1x128xf32>
    %48 = vector.broadcast %47 : vector<1x128xf32> to vector<128x128xf32>
    %49 = arith.addf %46, %48 : vector<128x128xf32>
    %cst_28 = arith.constant 0.000000e+00 : f32
    %50 = vector.broadcast %cst_28 : f32 to vector<128x128xf32>
    %51 = arith.maximumf %49, %50 : vector<128x128xf32>
    %52 = arith.truncf %51 : vector<128x128xf32> to vector<128x128xbf16>
    %53 = tpu.concatenate %34, %43, %52 in 1 : vector<128x128xbf16>, vector<128x128xbf16>, vector<128x128xbf16> -> vector<128x384xbf16>
    %54 = vector.extract_strided_slice %53 {offsets = [0, 0], sizes = [128, 256], strides = [1, 1]} : vector<128x384xbf16> to vector<128x256xbf16>
    %c0_29 = arith.constant 0 : index
    %c0_30 = arith.constant 0 : index
    %55 = vector.load %arg10[%c0_29, %c0_30] : memref<256x128xbf16, #tpu.memory_space<vmem>>, vector<256x128xbf16>
    %cst_31 = arith.constant dense<0.000000e+00> : vector<128x128xf32>
    %56 = tpu.matmul %54, %55, %cst_31 {dimension_numbers = #tpu.dot_dimension_numbers<[1], [0], [0], [1], [0, 0, 1, 1], [], []>} : vector<128x256xbf16>, vector<256x128xbf16>, vector<128x128xf32> -> vector<128x128xf32>
    %c0_32 = arith.constant 0 : index
    %c0_33 = arith.constant 0 : index
    %57 = vector.load %arg11[%c0_32, %c0_33] : memref<1x128xf32, #tpu.memory_space<vmem>>, vector<1x128xf32>
    %58 = vector.broadcast %57 : vector<1x128xf32> to vector<128x128xf32>
    %59 = arith.addf %56, %58 : vector<128x128xf32>
    %cst_34 = arith.constant 0.000000e+00 : f32
    %60 = vector.broadcast %cst_34 : f32 to vector<128x128xf32>
    %61 = arith.maximumf %59, %60 : vector<128x128xf32>
    %62 = arith.truncf %61 : vector<128x128xf32> to vector<128x128xbf16>
    %63 = vector.extract_strided_slice %53 {offsets = [0, 0], sizes = [128, 256], strides = [1, 1]} : vector<128x384xbf16> to vector<128x256xbf16>
    %c0_35 = arith.constant 0 : index
    %c0_36 = arith.constant 0 : index
    %64 = vector.load %arg12[%c0_35, %c0_36] : memref<256x128xbf16, #tpu.memory_space<vmem>>, vector<256x128xbf16>
    %cst_37 = arith.constant dense<0.000000e+00> : vector<128x128xf32>
    %65 = tpu.matmul %63, %64, %cst_37 {dimension_numbers = #tpu.dot_dimension_numbers<[1], [0], [0], [1], [0, 0, 1, 1], [], []>} : vector<128x256xbf16>, vector<256x128xbf16>, vector<128x128xf32> -> vector<128x128xf32>
    %c0_38 = arith.constant 0 : index
    %c0_39 = arith.constant 0 : index
    %66 = vector.load %arg13[%c0_38, %c0_39] : memref<1x128xf32, #tpu.memory_space<vmem>>, vector<1x128xf32>
    %67 = vector.broadcast %66 : vector<1x128xf32> to vector<128x128xf32>
    %68 = arith.addf %65, %67 : vector<128x128xf32>
    %cst_40 = arith.constant 0.000000e+00 : f32
    %69 = vector.broadcast %cst_40 : f32 to vector<128x128xf32>
    %70 = arith.maximumf %68, %69 : vector<128x128xf32>
    %71 = arith.truncf %70 : vector<128x128xf32> to vector<128x128xbf16>
    %72 = vector.extract_strided_slice %53 {offsets = [0, 128], sizes = [128, 256], strides = [1, 1]} : vector<128x384xbf16> to vector<128x256xbf16>
    %c0_41 = arith.constant 0 : index
    %c0_42 = arith.constant 0 : index
    %73 = vector.load %arg14[%c0_41, %c0_42] : memref<256x128xbf16, #tpu.memory_space<vmem>>, vector<256x128xbf16>
    %cst_43 = arith.constant dense<0.000000e+00> : vector<128x128xf32>
    %74 = tpu.matmul %72, %73, %cst_43 {dimension_numbers = #tpu.dot_dimension_numbers<[1], [0], [0], [1], [0, 0, 1, 1], [], []>} : vector<128x256xbf16>, vector<256x128xbf16>, vector<128x128xf32> -> vector<128x128xf32>
    %c0_44 = arith.constant 0 : index
    %c0_45 = arith.constant 0 : index
    %75 = vector.load %arg15[%c0_44, %c0_45] : memref<1x128xf32, #tpu.memory_space<vmem>>, vector<1x128xf32>
    %76 = vector.broadcast %75 : vector<1x128xf32> to vector<128x128xf32>
    %77 = arith.addf %74, %76 : vector<128x128xf32>
    %cst_46 = arith.constant 0.000000e+00 : f32
    %78 = vector.broadcast %cst_46 : f32 to vector<128x128xf32>
    %79 = arith.maximumf %77, %78 : vector<128x128xf32>
    %80 = arith.truncf %79 : vector<128x128xf32> to vector<128x128xbf16>
    %81 = tpu.concatenate %62, %71, %80 in 1 : vector<128x128xbf16>, vector<128x128xbf16>, vector<128x128xbf16> -> vector<128x384xbf16>
    %82 = vector.extract_strided_slice %81 {offsets = [0, 0], sizes = [128, 256], strides = [1, 1]} : vector<128x384xbf16> to vector<128x256xbf16>
    %c0_47 = arith.constant 0 : index
    %c0_48 = arith.constant 0 : index
    %83 = vector.load %arg16[%c0_47, %c0_48] : memref<256x128xbf16, #tpu.memory_space<vmem>>, vector<256x128xbf16>
    %cst_49 = arith.constant dense<0.000000e+00> : vector<128x128xf32>
    %84 = tpu.matmul %82, %83, %cst_49 {dimension_numbers = #tpu.dot_dimension_numbers<[1], [0], [0], [1], [0, 0, 1, 1], [], []>} : vector<128x256xbf16>, vector<256x128xbf16>, vector<128x128xf32> -> vector<128x128xf32>
    %c0_50 = arith.constant 0 : index
    %c0_51 = arith.constant 0 : index
    %85 = vector.load %arg17[%c0_50, %c0_51] : memref<1x128xf32, #tpu.memory_space<vmem>>, vector<1x128xf32>
    %86 = vector.broadcast %85 : vector<1x128xf32> to vector<128x128xf32>
    %87 = arith.addf %84, %86 : vector<128x128xf32>
    %cst_52 = arith.constant 0.000000e+00 : f32
    %88 = vector.broadcast %cst_52 : f32 to vector<128x128xf32>
    %89 = arith.maximumf %87, %88 : vector<128x128xf32>
    %90 = arith.truncf %89 : vector<128x128xf32> to vector<128x128xbf16>
    %91 = vector.extract_strided_slice %81 {offsets = [0, 128], sizes = [128, 256], strides = [1, 1]} : vector<128x384xbf16> to vector<128x256xbf16>
    %c0_53 = arith.constant 0 : index
    %c0_54 = arith.constant 0 : index
    %92 = vector.load %arg18[%c0_53, %c0_54] : memref<256x128xbf16, #tpu.memory_space<vmem>>, vector<256x128xbf16>
    %cst_55 = arith.constant dense<0.000000e+00> : vector<128x128xf32>
    %93 = tpu.matmul %91, %92, %cst_55 {dimension_numbers = #tpu.dot_dimension_numbers<[1], [0], [0], [1], [0, 0, 1, 1], [], []>} : vector<128x256xbf16>, vector<256x128xbf16>, vector<128x128xf32> -> vector<128x128xf32>
    %c0_56 = arith.constant 0 : index
    %c0_57 = arith.constant 0 : index
    %94 = vector.load %arg19[%c0_56, %c0_57] : memref<1x128xf32, #tpu.memory_space<vmem>>, vector<1x128xf32>
    %95 = vector.broadcast %94 : vector<1x128xf32> to vector<128x128xf32>
    %96 = arith.addf %93, %95 : vector<128x128xf32>
    %cst_58 = arith.constant 0.000000e+00 : f32
    %97 = vector.broadcast %cst_58 : f32 to vector<128x128xf32>
    %98 = arith.maximumf %96, %97 : vector<128x128xf32>
    %99 = arith.truncf %98 : vector<128x128xf32> to vector<128x128xbf16>
    %100 = tpu.concatenate %90, %99 in 1 : vector<128x128xbf16>, vector<128x128xbf16> -> vector<128x256xbf16>
    %c0_59 = arith.constant 0 : index
    %c0_60 = arith.constant 0 : index
    %101 = vector.load %arg20[%c0_59, %c0_60] : memref<256x128xbf16, #tpu.memory_space<vmem>>, vector<256x128xbf16>
    %cst_61 = arith.constant dense<0.000000e+00> : vector<128x128xf32>
    %102 = tpu.matmul %100, %101, %cst_61 {dimension_numbers = #tpu.dot_dimension_numbers<[1], [0], [0], [1], [0, 0, 1, 1], [], []>} : vector<128x256xbf16>, vector<256x128xbf16>, vector<128x128xf32> -> vector<128x128xf32>
    %c0_62 = arith.constant 0 : index
    %c0_63 = arith.constant 0 : index
    %103 = vector.load %arg21[%c0_62, %c0_63] : memref<1x128xf32, #tpu.memory_space<vmem>>, vector<1x128xf32>
    %104 = vector.broadcast %103 : vector<1x128xf32> to vector<128x128xf32>
    %105 = arith.addf %102, %104 : vector<128x128xf32>
    %c0_64 = arith.constant 0 : index
    %c0_65 = arith.constant 0 : index
    %106 = vector.load %arg22[%c0_64, %c0_65] : memref<128x128xf32, #tpu.memory_space<vmem>>, vector<128x128xf32>
    tpu.vector_store %arg22[%c0_64, %c0_65], %105 {strides = array<i32>} : memref<128x128xf32, #tpu.memory_space<vmem>>, vector<128x128xf32>,
    return
  }
  func.func @transform_0(%arg0: i32) -> (i32, i32) {
    %c0_i32 = arith.constant 0 : i32
    %c0_i32_0 = arith.constant 0 : i32
    return %arg0, %c0_i32 : i32, i32
  }
  func.func @transform_1(%arg0: i32) -> (i32, i32) {
    %c0_i32 = arith.constant 0 : i32
    %c0_i32_0 = arith.constant 0 : i32
    %c0_i32_1 = arith.constant 0 : i32
    return %c0_i32, %c0_i32_0 : i32, i32
  }
  func.func @transform_2(%arg0: i32) -> (i32, i32) {
    %c0_i32 = arith.constant 0 : i32
    %c0_i32_0 = arith.constant 0 : i32
    %c0_i32_1 = arith.constant 0 : i32
    return %c0_i32, %c0_i32_0 : i32, i32
  }
  func.func @transform_3(%arg0: i32) -> (i32, i32) {
    %c0_i32 = arith.constant 0 : i32
    %c0_i32_0 = arith.constant 0 : i32
    %c0_i32_1 = arith.constant 0 : i32
    return %c0_i32, %c0_i32_0 : i32, i32
  }
  func.func @transform_4(%arg0: i32) -> (i32, i32) {
    %c0_i32 = arith.constant 0 : i32
    %c0_i32_0 = arith.constant 0 : i32
    %c0_i32_1 = arith.constant 0 : i32
    return %c0_i32, %c0_i32_0 : i32, i32
  }
  func.func @transform_5(%arg0: i32) -> (i32, i32) {
    %c0_i32 = arith.constant 0 : i32
    %c0_i32_0 = arith.constant 0 : i32
    %c0_i32_1 = arith.constant 0 : i32
    return %c0_i32, %c0_i32_0 : i32, i32
  }
  func.func @transform_6(%arg0: i32) -> (i32, i32) {
    %c0_i32 = arith.constant 0 : i32
    %c0_i32_0 = arith.constant 0 : i32
    %c0_i32_1 = arith.constant 0 : i32
    return %c0_i32, %c0_i32_0 : i32, i32
  }
  func.func @transform_7(%arg0: i32) -> (i32, i32) {
    %c0_i32 = arith.constant 0 : i32
    %c0_i32_0 = arith.constant 0 : i32
    %c0_i32_1 = arith.constant 0 : i32
    return %c0_i32, %c0_i32_0 : i32, i32
  }
  func.func @transform_8(%arg0: i32) -> (i32, i32) {
    %c0_i32 = arith.constant 0 : i32
    %c0_i32_0 = arith.constant 0 : i32
    %c0_i32_1 = arith.constant 0 : i32
    return %c0_i32, %c0_i32_0 : i32, i32
  }
  func.func @transform_9(%arg0: i32) -> (i32, i32) {
    %c0_i32 = arith.constant 0 : i32
    %c0_i32_0 = arith.constant 0 : i32
    %c0_i32_1 = arith.constant 0 : i32
    return %c0_i32, %c0_i32_0 : i32, i32
  }
  func.func @transform_10(%arg0: i32) -> (i32, i32) {
    %c0_i32 = arith.constant 0 : i32
    %c0_i32_0 = arith.constant 0 : i32
    %c0_i32_1 = arith.constant 0 : i32
    return %c0_i32, %c0_i32_0 : i32, i32
  }
  func.func @transform_11(%arg0: i32) -> (i32, i32) {
    %c0_i32 = arith.constant 0 : i32
    %c0_i32_0 = arith.constant 0 : i32
    %c0_i32_1 = arith.constant 0 : i32
    return %c0_i32, %c0_i32_0 : i32, i32
  }
  func.func @transform_12(%arg0: i32) -> (i32, i32) {
    %c0_i32 = arith.constant 0 : i32
    %c0_i32_0 = arith.constant 0 : i32
    %c0_i32_1 = arith.constant 0 : i32
    return %c0_i32, %c0_i32_0 : i32, i32
  }
  func.func @transform_13(%arg0: i32) -> (i32, i32) {
    %c0_i32 = arith.constant 0 : i32
    %c0_i32_0 = arith.constant 0 : i32
    %c0_i32_1 = arith.constant 0 : i32
    return %c0_i32, %c0_i32_0 : i32, i32
  }
  func.func @transform_14(%arg0: i32) -> (i32, i32) {
    %c0_i32 = arith.constant 0 : i32
    %c0_i32_0 = arith.constant 0 : i32
    %c0_i32_1 = arith.constant 0 : i32
    return %c0_i32, %c0_i32_0 : i32, i32
  }
  func.func @transform_15(%arg0: i32) -> (i32, i32) {
    %c0_i32 = arith.constant 0 : i32
    %c0_i32_0 = arith.constant 0 : i32
    %c0_i32_1 = arith.constant 0 : i32
    return %c0_i32, %c0_i32_0 : i32, i32
  }
  func.func @transform_16(%arg0: i32) -> (i32, i32) {
    %c0_i32 = arith.constant 0 : i32
    %c0_i32_0 = arith.constant 0 : i32
    %c0_i32_1 = arith.constant 0 : i32
    return %c0_i32, %c0_i32_0 : i32, i32
  }
  func.func @transform_17(%arg0: i32) -> (i32, i32) {
    %c0_i32 = arith.constant 0 : i32
    %c0_i32_0 = arith.constant 0 : i32
    %c0_i32_1 = arith.constant 0 : i32
    return %c0_i32, %c0_i32_0 : i32, i32
  }
  func.func @transform_18(%arg0: i32) -> (i32, i32) {
    %c0_i32 = arith.constant 0 : i32
    %c0_i32_0 = arith.constant 0 : i32
    %c0_i32_1 = arith.constant 0 : i32
    return %c0_i32, %c0_i32_0 : i32, i32
  }
  func.func @transform_19(%arg0: i32) -> (i32, i32) {
    %c0_i32 = arith.constant 0 : i32
    %c0_i32_0 = arith.constant 0 : i32
    %c0_i32_1 = arith.constant 0 : i32
    return %c0_i32, %c0_i32_0 : i32, i32
  }
  func.func @transform_20(%arg0: i32) -> (i32, i32) {
    %c0_i32 = arith.constant 0 : i32
    %c0_i32_0 = arith.constant 0 : i32
    %c0_i32_1 = arith.constant 0 : i32
    return %c0_i32, %c0_i32_0 : i32, i32
  }
  func.func @transform_21(%arg0: i32) -> (i32, i32) {
    %c0_i32 = arith.constant 0 : i32
    %c0_i32_0 = arith.constant 0 : i32
    return %arg0, %c0_i32 : i32, i32
  }
}

</mosaic_0001>

<bundles_post_ra>
// kernel: forward.1
= control target key start
LH: loop header
LB: loop body
LE: loop exit
PB: predicated region body
PF: predicated region fallthrough
CT: control target
= control target key end

     0   :  { %s8995_s0 = inlined_call_operand.vmem [shape: f32[256,64], index: 0, kind: input, shape index: {}]   ;;  %s8996_s1 = inlined_call_operand.vmem [shape: bf16[64,896], index: 1, kind: input, shape index: {}]   ;;  %s8997_s2 = inlined_call_operand.vmem [shape: f32[1,896], index: 2, kind: input, shape index: {}]   ;;  %s8998_s3 = inlined_call_operand.vmem [shape: bf16[512,128], index: 3, kind: input, shape index: {}, may-alias: {3,5}]   ;;  %s8999_s4 = inlined_call_operand.vmem [shape: f32[1,128], index: 4, kind: input, shape index: {}, may-alias: {4,6}]   ;;  %s9000_s5 = inlined_call_operand.vmem [shape: bf16[512,128], index: 5, kind: input, shape index: {}, may-alias: {3,5}]   ;;  %s9001_s6 = inlined_call_operand.vmem [shape: f32[1,128], index: 6, kind: input, shape index: {}, may-alias: {4,6}]   ;;  %s9002_s7 = inlined_call_operand.vmem [shape: bf16[384,128], index: 7, kind: input, shape index: {}]   ;;  %s9003_s8 = inlined_call_operand.vmem [shape: f32[1,128], index: 8, kind: input, shape index: {}]   ;;  %s9004_s9 = inlined_call_operand.vmem [shape: bf16[256,128], index: 9, kind: input, shape index: {}, may-alias: {9,13}]   ;;  %s9005_s10 = inlined_call_operand.vmem [shape: f32[1,128], index: 10, kind: input, shape index: {}, may-alias: {10,12,14}]   ;;  %s9006_s11 = inlined_call_operand.vmem [shape: bf16[256,128], index: 11, kind: input, shape index: {}]   ;;  %s9007_s12 = inlined_call_operand.vmem [shape: f32[1,128], index: 12, kind: input, shape index: {}, may-alias: {10,12,14}]   ;;  %s9008_s13 = inlined_call_operand.vmem [shape: bf16[256,128], index: 13, kind: input, shape index: {}, may-alias: {9,13}]   ;;  %s9009_s14 = inlined_call_operand.vmem [shape: f32[1,128], index: 14, kind: input, shape index: {}, may-alias: {10,12,14}]   ;;  %s9010_s15 = inlined_call_operand.vmem [shape: bf16[256,128], index: 15, kind: input, shape index: {}, may-alias: {15,17}]   ;;  %s9011_s16 = inlined_call_operand.vmem [shape: f32[1,128], index: 16, kind: input, shape index: {}, may-alias: {16,18}]   ;;  %s9012_s17 = inlined_call_operand.vmem [shape: bf16[256,128], index: 17, kind: input, shape index: {}, may-alias: {15,17}]   ;;  %s9013_s18 = inlined_call_operand.vmem [shape: f32[1,128], index: 18, kind: input, shape index: {}, may-alias: {16,18}]   ;;  %s9014_s19 = inlined_call_operand.vmem [shape: bf16[256,128], index: 19, kind: input, shape index: {}]   ;;  %s9015_s20 = inlined_call_operand.vmem [shape: f32[1,128], index: 20, kind: input, shape index: {}]   ;;  %s9016_s21 = inlined_call_operand.vmem [shape: f32[256,128], index: 21, kind: output, shape index: {}]  }
   0x1   :  { %9023 = sst [smem:[#allocation2_spill]] %s8995_s0 }
   0x2   :  { %9024 = sst [smem:[#allocation3_spill]] %s8996_s1 }
   0x3   :  { %9025 = sst [smem:[#allocation4_spill]] %s8997_s2  ;;  %s6722_s2 = smov 0  }
   0x4   :  { %9026 = sst [smem:[#allocation5_spill]] %s8998_s3 }
   0x5   :  { %9027 = sst [smem:[#allocation6_spill]] %s8999_s4 }
   0x6   :  { %9028 = sst [smem:[#allocation7_spill]] %s9000_s5 }
   0x7 LB: > { %s5415_s25 = sadd.s32 4294967295, %s6609_s2   ;;  %p5419_p0 = scmp.ge.s32.totalorder %s6609_s2, 1  ;;  %s6609_s2 = sphi %s6722_s2, %s31_s2  }
   0x8   : > { %p588_p1 = scmp.lt.s32.totalorder %s6609_s2, 3 }
   0xa   : > { %p589_p2 = pnand %p5419_p0, %p588_p1 }
   0xb   : > { %s5420_s26 = sshll.u32 (!%p589_p2), %s5415_s25, 4  ;;  %s9029_s29 = sld [smem:[#allocation2_spill]] (!%p589_p2) }
   0xc   : > { %592 = sbr.rel (%p589_p2) target bundleno = 1721 (0x6b9), region = 104  ;;  %p649_p3 = scmp.lt.s32.totalorder (!%p589_p2), %s5420_s26, 31 }
   0xd   : > { %s9030_s5 = sld [smem:[#allocation3_spill]] (!%p589_p2) }
   0xe   : > { %s9035_s22 = sld [smem:[#allocation4_spill]] (!%p589_p2) }
   0xf   : > { %s9046_s4 = sld [smem:[#allocation6_spill]] (!%p589_p2) }
  0x11   : > { %s9049_s26 = smov (!%p649_p3, %s5420_s26), 31  ;;  %vm677_vm0 = vcmask 523264   ;;  %v6611_v14 = vmov 64.0  }
  0x12   : > { %s9021_s27 = sshll.u32 %s9049_s26, 3  ;;  %6568 = vrcp.f32 %v6611_v14 }
  0x13   : > { %s6738_s0 = scalar_lea.vmem %s9029_s29, %s9021_s27  ;;  %v5482_v14 = vld [vmem:[%s9030_s5 + $0x70] sm:$0xf]  ;;  %s9042_s29 = sld [smem:[#allocation5_spill]] }
  0x14   : > { %v671_v0 = vld [vmem:[%s6738_s0 + $0x50] sm:$0xff]  ;;  %v669_v1 = vld [vmem:[%s6738_s0 + $0x40] sm:$0xff]  ;;  %v672_v6 = vld [vmem:[%s6738_s0 + $0x58] sm:$0xff]  ;;  %s9047_s27 = sshll.u32 %s9049_s26, 3 }
  0x15   : > { %v708_v2 = vsel %vm677_vm0, %v671_v0, 0.0  ;;  %v702_v3 = vsel %vm677_vm0, %v669_v1, 0.0  ;;  %v673_v4 = vld [vmem:[%s6738_s0 + $0x60] sm:$0xff]  ;;  %v670_v7 = vld [vmem:[%s6738_s0 + $0x48] sm:$0xff]  ;;  %v711_v9 = vsel %vm677_vm0, %v672_v6, 0.0  ;;  %v675_v12 = vld [vmem:[%s6738_s0 + $0x70] sm:$0xff] }
  0x16   : > { %709 = vadd.xlane.f32.xlu1 %v708_v2  ;;  %703 = vadd.xlane.f32.xlu0 %v702_v3  ;;  %v714_v5 = vsel %vm677_vm0, %v673_v4, 0.0  ;;  %v674_v8 = vld [vmem:[%s6738_s0 + $0x68] sm:$0xff]  ;;  %v705_v10 = vsel %vm677_vm0, %v670_v7, 0.0  ;;  %v720_v13 = vsel %vm677_vm0, %v675_v12, 0.0  ;;  %v6767_v34 = vld [vmem:[%s6738_s0 + $0x78] sm:$0xff]  ;;  %v6791_v48 = vld [vmem:[%s6738_s0] sm:$0xff] }
  0x17   : > { %715 = vadd.xlane.f32.xlu2 %v714_v5  ;;  %v717_v11 = vsel %vm677_vm0, %v674_v8, 0.0  ;;  %v723_v40 = vsel %vm677_vm0, %v6767_v34, 0.0  ;;  %v678_v51 = vsel %vm677_vm0, %v6791_v48, 0.0  ;;  %v6803_v56 = vld [vmem:[%s6738_s0 + $0x18] sm:$0xff]  ;;  %v6806_v57 = vld [vmem:[%s6738_s0 + $0x8] sm:$0xff]  ;;  %v6818_v63 = vld [vmem:[%s6738_s0 + $0x20] sm:$0xff] }
  0x18   : > { %v6569_v15 = vpop.eup %6568  ;;  %v687_v59 = vsel %vm677_vm0, %v6803_v56, 0.0  ;;  %v681_v61 = vsel %vm677_vm0, %v6806_v57, 0.0 }
  0x19   : > { %v727_v16 = vmul.f32 64.0, %v6569_v15  ;;  %vm731_vm1 = vweird.f32 %v6569_v15 }
  0x1b   : > { %v728_v17 = vsub.f32 1.0, %v727_v16  ;;  %v6344_v16 = vld [vmem:[%s9030_s5 + $0x74] sm:$0xf] }
  0x1d   : > { %v729_v18 = vmul.f32 %v6569_v15, %v728_v17 }
  0x1e   : > { %712 = vadd.xlane.f32.xlu1 %v711_v9  ;;  %706 = vadd.xlane.f32.xlu0 %v705_v10  ;;  %v6354_v9 = vld [vmem:[%s9030_s5 + $0xc0] sm:$0xf0]  ;;  %v6351_v10 = vld [vmem:[%s9030_s5 + $0xac] sm:$0xf] }
  0x1f   : > { %718 = vadd.xlane.f32.xlu2 %v717_v11  ;;  %v730_v19 = vadd.f32 %v6569_v15, %v729_v18  ;;  %v5484_v18 = vld [vmem:[%s9030_s5 + $0x8c] sm:$0xf0] }
  0x21   : > { %v6754_v20 = vsel %vm731_vm1, %v6569_v15, %v730_v19  ;;  %v6347_v15 = vld [vmem:[%s9030_s5 + $0x88] sm:$0xf0]  ;;  %v5487_v19 = vor.u32 %v6344_v16, %v5484_v18 }
  0x22   : > { %v5483_v17 = vor.u32 %v6347_v15, %v5482_v14 }
  0x27   : > { %721 = vadd.xlane.f32.xlu2 %v720_v13 }
  0x89   : > { %v710_v21 = vpop.xlane.xlu1 %709  ;;  %v704_v22 = vpop.xlane.xlu0 %703 }
  0x8a   : > { %v741_v23 = vmul.f32 %v6754_v20, %v704_v22  ;;  %v716_v24 = vpop.xlane.xlu2 %715  ;;  %v743_v33 = vmul.f32 %v6754_v20, %v710_v21  ;;  %v5454_v21 = vld [vmem:[%s9030_s5 + $0x38] sm:$0xf]  ;;  %v6340_v22 = vld [vmem:[%s9030_s5 + $0x50] sm:$0xf0] }
  0x8b   : > { %v745_v32 = vmul.f32 %v6754_v20, %v716_v24  ;;  %v5455_v24 = vor.u32 %v6340_v22, %v5454_v21 }
  0x8c   : > { %v6757_v25 = vsub.f32 %v669_v1, %v741_v23  ;;  %v6781_v42 = vsub.f32 %v671_v0, %v743_v33  ;;  %v6821_v0 = vld [vmem:[%s6738_s0 + $0x10] sm:$0xff]  ;;  %v690_v1 = vsel %vm677_vm0, %v6818_v63, 0.0  ;;  %v6337_v23 = vld [vmem:[%s9030_s5 + $0x3c] sm:$0xf]  ;;  %v5428_v33 = vld [vmem:[%s9030_s5 + $0x1c] sm:$0xf0] }
  0x8d   : > { %v6773_v38 = vsub.f32 %v673_v4, %v745_v32  ;;  %v684_v3 = vsel %vm677_vm0, %v6821_v0, 0.0  ;;  %v6829_v4 = vld [vmem:[%s6738_s0 + $0x28] sm:$0xff] }
  0x8e   : > { %v773_v26 = vmul.f32 %v6757_v25, %v6757_v25  ;;  %v775_v47 = vmul.f32 %v6781_v42, %v6781_v42  ;;  %v693_v5 = vsel %vm677_vm0, %v6829_v4, 0.0 }
  0x8f   : > { %v777_v46 = vmul.f32 %v6773_v38, %v6773_v38 }
  0x90   : > { %v805_v27 = vsel %vm677_vm0, %v773_v26, 0.0  ;;  %v811_v52 = vsel %vm677_vm0, %v775_v47, 0.0  ;;  %v5456_v26 = vld [vmem:[%s9030_s5 + $0x54] sm:$0xf0] }
  0x91   : > { %v713_v28 = vpop.xlane.xlu1 %712  ;;  %806 = vadd.xlane.f32.xlu0 %v805_v27  ;;  %v707_v29 = vpop.xlane.xlu0 %706  ;;  %v817_v50 = vsel %vm677_vm0, %v777_v46, 0.0  ;;  %v5459_v27 = vor.u32 %v6337_v23, %v5456_v26 }
  0x92   : > { %v744_v30 = vmul.f32 %v6754_v20, %v713_v28  ;;  %v742_v31 = vmul.f32 %v6754_v20, %v707_v29  ;;  %v719_v37 = vpop.xlane.xlu2 %718  ;;  %v5426_v28 = vld [vmem:[%s9030_s5] sm:$0xf]  ;;  %v6333_v29 = vld [vmem:[%s9030_s5 + $0x18] sm:$0xf0] }
  0x93   : > { %v746_v45 = vmul.f32 %v6754_v20, %v719_v37  ;;  %v5427_v32 = vor.u32 %v6333_v29, %v5426_v28 }
  0x94   : > { %v6769_v35 = vsub.f32 %v672_v6, %v744_v30  ;;  %v6771_v36 = vsub.f32 %v670_v7, %v742_v31  ;;  %v6834_v6 = vld [vmem:[%s6738_s0 + $0x30] sm:$0xff]  ;;  %v6330_v30 = vld [vmem:[%s9030_s5 + $0x4] sm:$0xf] }
  0x95   : > { %v6793_v49 = vsub.f32 %v674_v8, %v746_v45  ;;  %v696_v7 = vsel %vm677_vm0, %v6834_v6, 0.0  ;;  %v5510_v8 = vld [vmem:[%s9030_s5 + $0xa8] sm:$0xf] }
  0x96   : > { %v776_v39 = vmul.f32 %v6769_v35, %v6769_v35  ;;  %v774_v41 = vmul.f32 %v6771_v36, %v6771_v36  ;;  %v5511_v11 = vor.u32 %v6354_v9, %v5510_v8 }
  0x97   : > { %v778_v55 = vmul.f32 %v6793_v49, %v6793_v49 }
  0x98   : > { %v814_v43 = vsel %vm677_vm0, %v776_v39, 0.0  ;;  %v808_v44 = vsel %vm677_vm0, %v774_v41, 0.0  ;;  %6542 = vmatpush.bf16.msra.mxu2 %v5511_v11  ;;  %1265 = vmatpush.bf16.msra.mxu0 %v5511_v11  ;;  %v5431_v39 = vor.u32 %v6330_v30, %v5428_v33  ;;  %v6938_v33 = vld [vmem:[%s6738_s0 + $0x38] sm:$0xff]  ;;  %s9045_s0 = sld [smem:[#allocation7_spill]] }
  0x99   : > { %815 = vadd.xlane.f32.xlu2 %v814_v43  ;;  %724 = vadd.xlane.f32.xlu0 %v723_v40  ;;  %v820_v60 = vsel %vm677_vm0, %v778_v55, 0.0 }
  0x9a   : > { %809 = vadd.xlane.f32.xlu1 %v808_v44  ;;  %v722_v53 = vpop.xlane.xlu2 %721 }
  0x9b   : > { %v747_v54 = vmul.f32 %v6754_v20, %v722_v53 }
  0x9c   : > { %6543 = vmatpush.bf16.msra.mxu2 %v5483_v17  ;;  %1266 = vmatpush.bf16.msra.mxu0 %v5483_v17 }
  0x9d   : > { %v6808_v58 = vsub.f32 %v675_v12, %v747_v54  ;;  %v5512_v12 = vld [vmem:[%s9030_s5 + $0xc4] sm:$0xf0] }
  0x9e   : > { %v5515_v13 = vor.u32 %v6351_v10, %v5512_v12 }
  0x9f   : > { %v779_v62 = vmul.f32 %v6808_v58, %v6808_v58 }
  0xa0   : > { %6546 = vmatpush.bf16.msra.mxu3 %v5515_v13  ;;  %1314 = vmatpush.bf16.msra.mxu1 %v5515_v13 }
  0xa1   : > { %818 = vadd.xlane.f32.xlu2 %v817_v50  ;;  %679 = vadd.xlane.f32.xlu0 %v678_v51  ;;  %v823_v2 = vsel %vm677_vm0, %v779_v62, 0.0 }
  0xa2   : > { %812 = vadd.xlane.f32.xlu1 %v811_v52  ;;  %6544 = vmatpush.bf16.msra.mxu2 %v5455_v24 }
  0xa3   : > { %1267 = vmatpush.bf16.msra.mxu0 %v5455_v24 }
  0xa4   : > { %6547 = vmatpush.bf16.msra.mxu3 %v5487_v19  ;;  %1315 = vmatpush.bf16.msra.mxu1 %v5487_v19 }
  0xa6   : > { %6545 = vmatpush.bf16.msra.mxu2 %v5427_v32 }
  0xa7   : > { %1268 = vmatpush.bf16.msra.mxu0 %v5427_v32 }
  0xa8   : > { %6548 = vmatpush.bf16.msra.mxu3 %v5459_v27  ;;  %1316 = vmatpush.bf16.msra.mxu1 %v5459_v27 }
  0xa9   : > { %688 = vadd.xlane.f32.xlu2 %v687_v59  ;;  %821 = vadd.xlane.f32.xlu0 %v820_v60 }
  0xaa   : > { %682 = vadd.xlane.f32.xlu1 %v681_v61 }
  0xac   : > { %6549 = vmatpush.bf16.msra.mxu3 %v5431_v39  ;;  %1317 = vmatpush.bf16.msra.mxu1 %v5431_v39 }
  0xb1   : > { %691 = vadd.xlane.f32.xlu2 %v690_v1  ;;  %824 = vadd.xlane.f32.xlu0 %v823_v2 }
  0xb2   : > { %685 = vadd.xlane.f32.xlu1 %v684_v3 }
  0xb9   : > { %694 = vadd.xlane.f32.xlu0 %v693_v5 }
  0xc1   : > { %697 = vadd.xlane.f32.xlu0 %v696_v7 }
 0x104   : > { %v807_v31 = vpop.xlane.xlu0 %806 }
 0x105   : > { %v837_v37 = vmul.f32 %v807_v31, %v6754_v20 }
 0x107   : > { %v853_v40 = vadd.f32 1e-05, %v837_v37 }
 0x109   : > { %6570 = vrsqrt.f32 %v853_v40  ;;  %vm947_vm5 = vweird.f32 %v853_v40 }
 0x10c   : > { %v816_v41 = vpop.xlane.xlu2 %815  ;;  %v725_v43 = vpop.xlane.xlu0 %724 }
 0x10d   : > { %v840_v44 = vmul.f32 %v816_v41, %v6754_v20  ;;  %v810_v45 = vpop.xlane.xlu1 %809  ;;  %v748_v46 = vmul.f32 %v6754_v20, %v725_v43 }
 0x10e   : > { %v838_v47 = vmul.f32 %v810_v45, %v6754_v20  ;;  %v699_v45 = vsel %vm677_vm0, %v6938_v33, 0.0 }
 0x10f   : > { %v6571_v50 = vpop.eup %6570  ;;  %v6890_v51 = vadd.f32 1e-05, %v840_v44  ;;  %v6893_v52 = vsub.f32 %v6767_v34, %v748_v46 }
 0x110   : > { %v942_v53 = vmul.f32 %v6571_v50, %v853_v40  ;;  %v854_v54 = vadd.f32 1e-05, %v838_v47  ;;  %vm948_vm2 = vweird.f32 %v6571_v50 }
 0x111   : > { %v780_v55 = vmul.f32 %v6893_v52, %v6893_v52  ;;  %vm6919_vm6 = vmor %vm947_vm5, %vm948_vm2  ;;  %vm977_vm10 = vweird.f32 %v6890_v51 }
 0x112   : > { %v943_v59 = vmul.f32 %v6571_v50, %v942_v53  ;;  %6572 = vrsqrt.f32 %v854_v54  ;;  %vm957_vm3 = vweird.f32 %v854_v54 }
 0x113   : > { %6574 = vrsqrt.f32 %v6890_v51  ;;  %v826_v60 = vsel %vm677_vm0, %v780_v55, 0.0 }
 0x114   : > { %v944_v61 = vmul.f32 0.5, %v943_v59  ;;  %v819_v62 = vpop.xlane.xlu2 %818  ;;  %827 = vadd.xlane.f32.xlu1 %v826_v60  ;;  %v680_v1 = vpop.xlane.xlu0 %679 }
 0x115   : > { %v813_v2 = vpop.xlane.xlu1 %812  ;;  %v733_v3 = vmul.f32 %v6754_v20, %v680_v1  ;;  %v841_v15 = vmul.f32 %v819_v62, %v6754_v20 }
 0x116   : > { %v839_v34 = vmul.f32 %v813_v2, %v6754_v20  ;;  %v945_v8 = vsub.f32 1.5, %v944_v61 }
 0x117   : > { %v6902_v5 = vsub.f32 %v6791_v48, %v733_v3  ;;  %v6932_v31 = vadd.f32 1e-05, %v841_v15 }
 0x118   : > { %v6573_v7 = vpop.eup %6572  ;;  %v6904_v9 = vadd.f32 1e-05, %v839_v34  ;;  %v946_v14 = vmul.f32 %v6571_v50, %v945_v8 }
 0x119   : > { %v6906_v10 = vpop.eup %6574  ;;  %v952_v11 = vmul.f32 %v6573_v7, %v854_v54  ;;  %v765_v13 = vmul.f32 %v6902_v5, %v6902_v5  ;;  %vm958_vm4 = vweird.f32 %v6573_v7  ;;  %vm987_vm1 = vweird.f32 %v6932_v31 }
 0x11a   : > { %6576 = vrsqrt.f32 %v6904_v9  ;;  %v972_v48 = vmul.f32 %v6906_v10, %v6890_v51  ;;  %vm959_vm7 = vmor %vm957_vm3, %vm958_vm4  ;;  %v950_v37 = vsel %vm6919_vm6, %v6571_v50, %v946_v14  ;;  %vm967_vm8 = vweird.f32 %v6904_v9 }
 0x11b   : > { %v953_v12 = vmul.f32 %v6573_v7, %v952_v11  ;;  %v781_v22 = vsel %vm677_vm0, %v765_v13, 0.0  ;;  %v1029_v46 = vmul.f32 %v950_v37, %v6757_v25  ;;  %vm978_vm11 = vweird.f32 %v6906_v10 }
 0x11c   : > { %v689_v16 = vpop.xlane.xlu2 %688  ;;  %v822_v17 = vpop.xlane.xlu0 %821  ;;  %782 = vadd.xlane.f32.xlu1 %v781_v22  ;;  %vm979_vm13 = vmor %vm977_vm10, %vm978_vm11 }
 0x11d   : > { %v954_v18 = vmul.f32 0.5, %v953_v12  ;;  %v736_v19 = vmul.f32 %v6754_v20, %v689_v16  ;;  %v683_v21 = vpop.xlane.xlu1 %682  ;;  %v842_v23 = vmul.f32 %v822_v17, %v6754_v20 }
 0x11e   : > { %v734_v24 = vmul.f32 %v6754_v20, %v683_v21 }
 0x11f   : > { %v955_v27 = vsub.f32 1.5, %v954_v18  ;;  %v6924_v28 = vsub.f32 %v6803_v56, %v736_v19  ;;  %v6926_v29 = vadd.f32 1e-05, %v842_v23  ;;  %v973_v56 = vmul.f32 %v6906_v10, %v972_v48 }
 0x120   : > { %v6928_v30 = vpop.eup %6576  ;;  %v6935_v32 = vsub.f32 %v6806_v57, %v734_v24 }
 0x121   : > { %v956_v39 = vmul.f32 %v6573_v7, %v955_v27  ;;  %v962_v40 = vmul.f32 %v6928_v30, %v6904_v9  ;;  %6578 = vrsqrt.f32 %v6926_v29  ;;  %v768_v44 = vmul.f32 %v6924_v28, %v6924_v28 }
 0x122   : > { %v766_v41 = vmul.f32 %v6935_v32, %v6935_v32  ;;  %6580 = vrsqrt.f32 %v6932_v31  ;;  %v974_v55 = vmul.f32 0.5, %v973_v56  ;;  %vm968_vm9 = vweird.f32 %v6928_v30 }
 0x123   : > { %v960_v43 = vsel %vm959_vm7, %v6573_v7, %v956_v39  ;;  %v963_v57 = vmul.f32 %v6928_v30, %v962_v40  ;;  %v790_v62 = vsel %vm677_vm0, %v768_v44, 0.0  ;;  %vm969_vm12 = vmor %vm967_vm8, %vm968_vm9  ;;  %vm997_vm14 = vweird.f32 %v6926_v29 }
 0x124   : > { %v1030_v47 = vmul.f32 %v960_v43, %v6771_v36  ;;  %v692_v50 = vpop.xlane.xlu2 %691  ;;  %v784_v53 = vsel %vm677_vm0, %v766_v41, 0.0  ;;  %v6957_v54 = vpop.xlane.xlu0 %824  ;;  %791 = vadd.xlane.f32.xlu0 %v790_v62  ;;  %700 = vadd.xlane.f32.xlu1 %v699_v45  ;;  %v975_v7 = vsub.f32 1.5, %v974_v55  ;;  %v6348_v62 = vld [vmem:[%s9030_s5 + $0x90] sm:$0xf0] }
 0x125   : > { %v964_v59 = vmul.f32 0.5, %v963_v57  ;;  %v737_v60 = vmul.f32 %v6754_v20, %v692_v50  ;;  %785 = vadd.xlane.f32.xlu2 %v784_v53  ;;  %v686_v61 = vpop.xlane.xlu1 %685 }
 0x126   : > { %v6961_v1 = vpack.c.bf16 %v1030_v47, %v1029_v46  ;;  %v735_v25 = vmul.f32 %v6754_v20, %v686_v61  ;;  %v976_v48 = vmul.f32 %v6906_v10, %v975_v7  ;;  %v5518_v47 = vld [vmem:[%s9030_s5 + $0xb0] sm:$0xf]  ;;  %v5490_v61 = vld [vmem:[%s9030_s5 + $0x78] sm:$0xf] }
 0x127   : > { %v965_v36 = vsub.f32 1.5, %v964_v59  ;;  %v6965_v2 = vsub.f32 %v6818_v63, %v737_v60  ;;  %v6579_v3 = vpop.eup %6578  ;;  %v5492_v7 = vld [vmem:[%s9030_s5 + $0x94] sm:$0xf0] }
 0x128   : > { %v6968_v34 = vsub.f32 %v6821_v0, %v735_v25  ;;  %5540 = vmatmul.msk.bf16.vlgmr.msra.gmra.mxu2 %vm677_vm0, %v6961_v1  ;;  %5548 = vmatmul.msk.bf16.vlgmr.msra.gmra.mxu3 %vm677_vm0, %v6961_v1  ;;  %v6581_v63 = vpop.eup %6580  ;;  %v992_v12 = vmul.f32 %v6579_v3, %v6926_v29  ;;  %v980_v19 = vsel %vm979_vm13, %v6906_v10, %v976_v48  ;;  %vm998_vm15 = vweird.f32 %v6579_v3  ;;  %v6345_v25 = vld [vmem:[%s9030_s5 + $0x7c] sm:$0xf] }
 0x129   : > { %v769_v8 = vmul.f32 %v6965_v2, %v6965_v2  ;;  %v966_v11 = vmul.f32 %v6928_v30, %v965_v36  ;;  %v982_v15 = vmul.f32 %v6581_v63, %v6932_v31  ;;  %v1032_v27 = vmul.f32 %v980_v19, %v6769_v35  ;;  %vm999_vm3 = vmor %vm997_vm14, %vm998_vm15 }
 0x12a   : > { %v767_v0 = vmul.f32 %v6968_v34, %v6968_v34  ;;  %v993_v17 = vmul.f32 %v6579_v3, %v992_v12  ;;  %vm988_vm2 = vweird.f32 %v6581_v63  ;;  %v843_v31 = vmul.f32 %v6957_v54, %v6754_v20  ;;  %v5520_v54 = vld [vmem:[%s9030_s5 + $0xcc] sm:$0xf0]  ;;  %v6341_v12 = vld [vmem:[%s9030_s5 + $0x58] sm:$0xf0] }
 0x12b   : > { %v793_v13 = vsel %vm677_vm0, %v769_v8, 0.0  ;;  %v970_v16 = vsel %vm969_vm12, %v6928_v30, %v966_v11  ;;  %v983_v21 = vmul.f32 %v6581_v63, %v982_v15  ;;  %vm989_vm4 = vmor %vm987_vm1, %vm988_vm2  ;;  %v5495_v8 = vor.u32 %v6345_v25, %v5492_v7  ;;  %v5462_v11 = vld [vmem:[%s9030_s5 + $0x40] sm:$0xf] }
 0x12c   : > { %v787_v9 = vsel %vm677_vm0, %v767_v0, 0.0  ;;  %v695_v14 = vpop.xlane.xlu0 %694  ;;  %794 = vadd.xlane.f32.xlu1 %v793_v13  ;;  %v1031_v23 = vmul.f32 %v970_v16, %v6781_v42  ;;  %v994_v24 = vmul.f32 0.5, %v993_v17  ;;  %v859_v46 = vadd.f32 1e-05, %v843_v31  ;;  %v6334_v16 = vld [vmem:[%s9030_s5 + $0x20] sm:$0xf0] }
 0x12d   : > { %788 = vadd.xlane.f32.xlu2 %v787_v9  ;;  %v738_v51 = vmul.f32 %v6754_v20, %v695_v14  ;;  %v984_v56 = vmul.f32 0.5, %v983_v21  ;;  %v5463_v13 = vor.u32 %v6341_v12, %v5462_v11  ;;  %v6338_v9 = vld [vmem:[%s9030_s5 + $0x44] sm:$0xf]  ;;  %v5464_v14 = vld [vmem:[%s9030_s5 + $0x5c] sm:$0xf0] }
 0x12e   : > { %v995_v39 = vsub.f32 1.5, %v994_v24  ;;  %6582 = vrsqrt.f32 %v859_v46  ;;  %v5467_v48 = vor.u32 %v6338_v9, %v5464_v14  ;;  %v6331_v17 = vld [vmem:[%s9030_s5 + $0xc] sm:$0xf]  ;;  %vm1007_vm5 = vweird.f32 %v859_v46 }
 0x12f   : > { %v6991_v18 = vsub.f32 %v6829_v4, %v738_v51  ;;  %v7000_v4 = vpack.c.bf16 %v1032_v27, %v1031_v23  ;;  %v985_v42 = vsub.f32 1.5, %v984_v56  ;;  %v5434_v51 = vld [vmem:[%s9030_s5 + $0x8] sm:$0xf] }
 0x130   : > { %v996_v40 = vmul.f32 %v6579_v3, %v995_v39  ;;  %v5435_v21 = vor.u32 %v6334_v16, %v5434_v51 }
 0x131   : > { %v770_v22 = vmul.f32 %v6991_v18, %v6991_v18  ;;  %v986_v41 = vmul.f32 %v6581_v63, %v985_v42 }
 0x132   : > { %v1000_v43 = vsel %vm999_vm3, %v6579_v3, %v996_v40  ;;  %v5491_v3 = vor.u32 %v6348_v62, %v5490_v61 }
 0x133   : > { %v796_v26 = vsel %vm677_vm0, %v770_v22, 0.0  ;;  %v990_v57 = vsel %vm989_vm4, %v6581_v63, %v986_v41  ;;  %v1034_v44 = vmul.f32 %v1000_v43, %v6793_v49  ;;  %v6352_v49 = vld [vmem:[%s9030_s5 + $0xb4] sm:$0xf]  ;;  %v5436_v22 = vld [vmem:[%s9030_s5 + $0x24] sm:$0xf0] }
 0x134   : > { %v698_v37 = vpop.xlane.xlu0 %697  ;;  %v1033_v29 = vmul.f32 %v990_v57, %v6773_v38  ;;  %v6355_v38 = vld [vmem:[%s9030_s5 + $0xc8] sm:$0xf0]  ;;  %v7033_v50 = vpop.eup %6582  ;;  %v5523_v55 = vor.u32 %v6352_v49, %v5520_v54 }
 0x135   : > { %797 = vadd.xlane.f32.xlu2 %v796_v26  ;;  %v739_v30 = vmul.f32 %v6754_v20, %v698_v37  ;;  %v5519_v53 = vor.u32 %v6355_v38, %v5518_v47  ;;  %v1002_v59 = vmul.f32 %v7033_v50, %v859_v46  ;;  %v5439_v26 = vor.u32 %v6331_v17, %v5436_v22 }
 0x136   : > { %v7016_v45 = vpack.c.bf16 %v1034_v44, %v1033_v29  ;;  %1412 = vmatpush.bf16.msrb.mxu3 %v5523_v55  ;;  %vm1008_vm6 = vweird.f32 %v7033_v50 }
 0x137   : > { %v7003_v10 = vsub.f32 %v6834_v6, %v739_v30  ;;  %1363 = vmatpush.bf16.msrb.mxu2 %v5519_v53  ;;  %v1003_v0 = vmul.f32 %v7033_v50, %v1002_v59  ;;  %vm7080_vm7 = vmor %vm1007_vm5, %vm1008_vm6 }
 0x138   : > { %5541 = vmatmul.msk.bf16.gmra.mxu2 %vm677_vm0, %v7000_v4  ;;  %5549 = vmatmul.msk.bf16.gmra.mxu3 %vm677_vm0, %v7000_v4 }
 0x139   : > { %v771_v35 = vmul.f32 %v7003_v10, %v7003_v10  ;;  %v1004_v15 = vmul.f32 0.5, %v1003_v0  ;;  %v7111_v0 = vld [vmem:[%s9035_s22] sm:$0xff] }
 0x13a   : > { %1413 = vmatpush.bf16.msrb.mxu3 %v5495_v8  ;;  %v7117_v14 = vperm.slane %v7111_v0, 0 }
 0x13b   : > { %v799_v6 = vsel %vm677_vm0, %v771_v35, 0.0  ;;  %1364 = vmatpush.bf16.msrb.mxu2 %v5491_v3  ;;  %v1005_v27 = vsub.f32 1.5, %v1004_v15 }
 0x13c   : > { %800 = vadd.xlane.f32.xlu0 %v799_v6 }
 0x13d   : > { %v1006_v39 = vmul.f32 %v7033_v50, %v1005_v27  ;;  %v7133_v27 = vperm.slane %v7111_v0, 1 }
 0x13e   : > { %1414 = vmatpush.bf16.msrb.mxu3 %v5467_v48 }
 0x13f   : > { %1365 = vmatpush.bf16.msrb.mxu2 %v5463_v13  ;;  %v1010_v31 = vsel %vm7080_vm7, %v7033_v50, %v1006_v39 }
 0x140   : > { %v1035_v59 = vmul.f32 %v1010_v31, %v6808_v58 }
 0x142   : > { %1415 = vmatpush.bf16.msrb.mxu3 %v5439_v26 }
 0x143   : > { %1366 = vmatpush.bf16.msrb.mxu2 %v5435_v21 }
 0x148   : > { %5542 = vmatmul.msk.bf16.gmra.mxu2 %vm677_vm0, %v7016_v45  ;;  %5550 = vmatmul.msk.bf16.gmra.mxu3 %vm677_vm0, %v7016_v45 }
 0x187   : > { %v828_v60 = vpop.xlane.xlu1 %827 }
 0x188   : > { %v844_v36 = vmul.f32 %v828_v60, %v6754_v20 }
 0x18a   : > { %v860_v63 = vadd.f32 1e-05, %v844_v36 }
 0x18c   : > { %6584 = vrsqrt.f32 %v860_v63  ;;  %vm1017_vm9 = vweird.f32 %v860_v63 }
 0x18f   : > { %v783_v19 = vpop.xlane.xlu1 %782 }
 0x190   : > { %v829_v24 = vmul.f32 %v783_v19, %v6754_v20 }
 0x192   : > { %v6585_v23 = vpop.eup %6584  ;;  %v845_v56 = vadd.f32 1e-05, %v829_v24 }
 0x193   : > { %v1012_v37 = vmul.f32 %v6585_v23, %v860_v63  ;;  %vm1018_vm8 = vweird.f32 %v6585_v23 }
 0x194   : > { %6586 = vrsqrt.f32 %v845_v56  ;;  %vm1019_vm10 = vmor %vm1017_vm9, %vm1018_vm8  ;;  %vm867_vm14 = vweird.f32 %v845_v56 }
 0x195   : > { %v1013_v30 = vmul.f32 %v6585_v23, %v1012_v37 }
 0x197   : > { %v1014_v42 = vmul.f32 0.5, %v1013_v30  ;;  %v701_v43 = vpop.xlane.xlu1 %700  ;;  %v792_v57 = vpop.xlane.xlu0 %791 }
 0x198   : > { %v786_v40 = vpop.xlane.xlu2 %785  ;;  %v740_v44 = vmul.f32 %v6754_v20, %v701_v43  ;;  %v832_v29 = vmul.f32 %v792_v57, %v6754_v20 }
 0x199   : > { %v1015_v6 = vsub.f32 1.5, %v1014_v42  ;;  %v830_v41 = vmul.f32 %v786_v40, %v6754_v20 }
 0x19a   : > { %v6587_v38 = vpop.eup %6586  ;;  %v7091_v49 = vsub.f32 %v6938_v33, %v740_v44  ;;  %v7093_v53 = vadd.f32 1e-05, %v832_v29 }
 0x19b   : > { %v1016_v46 = vmul.f32 %v6585_v23, %v1015_v6  ;;  %v846_v47 = vadd.f32 1e-05, %v830_v41  ;;  %v862_v55 = vmul.f32 %v6587_v38, %v845_v56  ;;  %vm868_vm11 = vweird.f32 %v6587_v38 }
 0x19c   : > { %v772_v50 = vmul.f32 %v7091_v49, %v7091_v49  ;;  %vm7122_vm15 = vmor %vm867_vm14, %vm868_vm11  ;;  %vm897_vm4 = vweird.f32 %v7093_v53 }
 0x19d   : > { %v1020_v54 = vsel %vm1019_vm10, %v6585_v23, %v1016_v46  ;;  %6588 = vrsqrt.f32 %v846_v47  ;;  %v863_v61 = vmul.f32 %v6587_v38, %v862_v55  ;;  %vm877_vm12 = vweird.f32 %v846_v47 }
 0x19e   : > { %v1036_v60 = vmul.f32 %v1020_v54, %v6893_v52  ;;  %6590 = vrsqrt.f32 %v7093_v53  ;;  %v802_v3 = vsel %vm677_vm0, %v772_v50, 0.0  ;;  %v6364_v50 = vld [vmem:[%s9042_s29 + $0x30] sm:$0xff] }
 0x19f   : > { %v864_v33 = vmul.f32 0.5, %v863_v61  ;;  %803 = vadd.xlane.f32.xlu1 %v802_v3  ;;  %v795_v8 = vpop.xlane.xlu1 %794  ;;  %v6357_v3 = vld [vmem:[%s9030_s5 + $0xd8] sm:$0xf0] }
 0x1a0   : > { %v7100_v62 = vpack.c.bf16 %v1036_v60, %v1035_v59  ;;  %v789_v25 = vpop.xlane.xlu2 %788  ;;  %v833_v13 = vmul.f32 %v795_v8, %v6754_v20 }
 0x1a1   : > { %v831_v36 = vmul.f32 %v789_v25, %v6754_v20  ;;  %v865_v52 = vsub.f32 1.5, %v864_v33 }
 0x1a2   : > { %5543 = vmatmul.msk.bf16.gmra.mxu2 %vm677_vm0, %v7100_v62  ;;  %5551 = vmatmul.msk.bf16.gmra.mxu3 %vm677_vm0, %v7100_v62  ;;  %v7126_v21 = vadd.f32 1e-05, %v833_v13 }
 0x1a3   : > { %v6589_v58 = vpop.eup %6588  ;;  %v847_v7 = vadd.f32 1e-05, %v831_v36  ;;  %v866_v9 = vmul.f32 %v6587_v38, %v865_v52  ;;  %v5534_v36 = vld [vmem:[%s9030_s5 + $0xc0] sm:$0xf] }
 0x1a4   : > { %v872_v63 = vmul.f32 %v6589_v58, %v846_v47  ;;  %v7113_v11 = vpop.eup %6590  ;;  %vm878_vm13 = vweird.f32 %v6589_v58  ;;  %vm907_vm10 = vweird.f32 %v7126_v21 }
 0x1a5   : > { %6592 = vrsqrt.f32 %v847_v7  ;;  %v892_v15 = vmul.f32 %v7113_v11, %v7093_v53  ;;  %v870_v23 = vsel %vm7122_vm15, %v6587_v38, %v866_v9  ;;  %vm879_vm1 = vmor %vm877_vm12, %vm878_vm13  ;;  %vm887_vm2 = vweird.f32 %v847_v7 }
 0x1a6   : > { %v873_v12 = vmul.f32 %v6589_v58, %v872_v63  ;;  %v1021_v6 = vmul.f32 %v870_v23, %v6902_v5  ;;  %vm898_vm5 = vweird.f32 %v7113_v11 }
 0x1a7   : > { %v893_v30 = vmul.f32 %v7113_v11, %v892_v15  ;;  %vm7173_vm7 = vmor %vm897_vm4, %vm898_vm5 }
 0x1a8   : > { %v874_v48 = vmul.f32 0.5, %v873_v12  ;;  %v798_v51 = vpop.xlane.xlu2 %797 }
 0x1a9   : > { %v834_v16 = vmul.f32 %v798_v51, %v6754_v20  ;;  %v894_v44 = vmul.f32 0.5, %v893_v30 }
 0x1aa   : > { %v875_v19 = vsub.f32 1.5, %v874_v48 }
 0x1ab   : > { %v6593_v22 = vpop.eup %6592  ;;  %v7130_v24 = vadd.f32 1e-05, %v834_v16  ;;  %v1290_v26 = vpop.f32.mrf.mxu2  ;;  %v895_v59 = vsub.f32 1.5, %v894_v44 }
 0x1ac   : > { %v1339_v37 = vpop.f32.mrf.mxu3  ;;  %v876_v56 = vmul.f32 %v6589_v58, %v875_v19  ;;  %v882_v39 = vmul.f32 %v6593_v22, %v847_v7  ;;  %v1291_v42 = vadd.f32 %v1290_v26, %v7117_v14  ;;  %vm888_vm3 = vweird.f32 %v6593_v22 }
 0x1ad   : > { %6594 = vrsqrt.f32 %v7130_v24  ;;  %v1340_v57 = vadd.f32 %v1339_v37, %v7133_v27  ;;  %vm7164_vm6 = vmor %vm887_vm2, %vm888_vm3  ;;  %v896_v25 = vmul.f32 %v7113_v11, %v895_v59  ;;  %v5535_v7 = vor.u32 %v6357_v3, %v5534_v36  ;;  %v5528_v36 = vld [vmem:[%s9030_s5 + $0xd4] sm:$0xf0] }
 0x1ae   : > { %v880_v35 = vsel %vm879_vm1, %v6589_v58, %v876_v56  ;;  %v883_v40 = vmul.f32 %v6593_v22, %v882_v39  ;;  %6596 = vrsqrt.f32 %v7126_v21  ;;  %v1660_v43 = vmax.f32 %v1291_v42, 0.0 }
 0x1af   : > { %v1022_v41 = vmul.f32 %v880_v35, %v6935_v32  ;;  %v1661_v46 = vmax.f32 %v1340_v57, 0.0  ;;  %v900_v12 = vsel %vm7173_vm7, %v7113_v11, %v896_v25  ;;  %1559 = vmatpush.bf16.msra.mxu2 %v5535_v7  ;;  %vm917_vm8 = vweird.f32 %v7130_v24  ;;  %v6346_v7 = vld [vmem:[%s9030_s5 + $0x84] sm:$0xf] }
 0x1b0   : > { %v884_v29 = vmul.f32 0.5, %v883_v40  ;;  %v1024_v19 = vmul.f32 %v900_v12, %v6924_v28  ;;  %v5500_v12 = vld [vmem:[%s9030_s5 + $0x9c] sm:$0xf0] }
 0x1b1   : > { %v7142_v31 = vpack.c.bf16 %v1022_v41, %v1021_v6  ;;  %v7146_v54 = vpack.c.bf16 %v1661_v46, %v1660_v43 }
 0x1b2   : > { %v885_v47 = vsub.f32 1.5, %v884_v29 }
 0x1b3   : > { %v7144_v38 = vpop.eup %6594  ;;  %5536 = vmatmul.msk.bf16.vlgmr.msra.gmra.mxu0 %vm677_vm0, %v7142_v31  ;;  %v7150_v55 = vpop.f32.mrf.mxu2  ;;  %5544 = vmatmul.msk.bf16.vlgmr.msra.gmra.mxu1 %vm677_vm0, %v7142_v31 }
 0x1b4   : > { %v7154_v5 = vpop.f32.mrf.mxu3  ;;  %v6597_v32 = vpop.eup %6596  ;;  %5552 = vmatmul.msk.bf16.vlgmr.msrb.gmra.mxu2 %vm677_vm0, %v7142_v31  ;;  %5560 = vmatmul.msk.bf16.vlgmr.msrb.gmra.mxu3 %vm677_vm0, %v7142_v31  ;;  %v886_v60 = vmul.f32 %v6593_v22, %v885_v47  ;;  %v912_v61 = vmul.f32 %v7144_v38, %v7130_v24  ;;  %vm918_vm9 = vweird.f32 %v7144_v38  ;;  %v6365_v47 = vld [vmem:[%s9042_s29 + $0x38] sm:$0xff] }
 0x1b5   : > { %v902_v33 = vmul.f32 %v6597_v32, %v7126_v21  ;;  %vm908_vm11 = vweird.f32 %v6597_v32  ;;  %vm919_vm12 = vmor %vm917_vm8, %vm918_vm9  ;;  %2200 = vmatpush.bf16.msra.mxu3 %v6365_v47 }
 0x1b6   : > { %v890_v58 = vsel %vm7164_vm6, %v6593_v22, %v886_v60  ;;  %v913_v52 = vmul.f32 %v7144_v38, %v912_v61  ;;  %vm909_vm13 = vmor %vm907_vm10, %vm908_vm11  ;;  %v5526_v60 = vld [vmem:[%s9030_s5 + $0xb8] sm:$0xf]  ;;  %v6356_v61 = vld [vmem:[%s9030_s5 + $0xd0] sm:$0xf0] }
 0x1b7   : > { %v903_v13 = vmul.f32 %v6597_v32, %v902_v33  ;;  %v1023_v15 = vmul.f32 %v890_v58, %v6968_v34  ;;  %v5527_v25 = vor.u32 %v6356_v61, %v5526_v60  ;;  %v6353_v33 = vld [vmem:[%s9030_s5 + $0xbc] sm:$0xf]  ;;  %v5498_v58 = vld [vmem:[%s9030_s5 + $0x80] sm:$0xf] }
 0x1b8   : > { %v914_v51 = vmul.f32 0.5, %v913_v52  ;;  %v5531_v3 = vor.u32 %v6353_v33, %v5528_v36  ;;  %v6349_v52 = vld [vmem:[%s9030_s5 + $0x98] sm:$0xf0]  ;;  %v5478_v33 = vld [vmem:[%s9030_s5 + $0x50] sm:$0xf] }
 0x1b9   : > { %v904_v22 = vmul.f32 0.5, %v903_v13  ;;  %v7192_v26 = vpack.c.bf16 %v1024_v19, %v1023_v15  ;;  %1461 = vmatpush.bf16.msrb.mxu0 %v5527_v25  ;;  %2201 = vmatpush.bf16.msra.mxu3 %v6364_v50  ;;  %v6363_v15 = vld [vmem:[%s9042_s29 + $0x28] sm:$0xff] }
 0x1ba   : > { %v915_v37 = vsub.f32 1.5, %v914_v51  ;;  %1510 = vmatpush.bf16.msrb.mxu1 %v5531_v3  ;;  %v5470_v51 = vld [vmem:[%s9030_s5 + $0x48] sm:$0xf]  ;;  %v6343_v36 = vld [vmem:[%s9030_s5 + $0x68] sm:$0xf0]  ;;  %v6362_v3 = vld [vmem:[%s9042_s29 + $0x20] sm:$0xff] }
 0x1bb   : > { %v1295_v8 = vpop.f32.mrf.mxu2  ;;  %v905_v56 = vsub.f32 1.5, %v904_v22 }
 0x1bc   : > { %v1344_v63 = vpop.f32.mrf.mxu3  ;;  %v1296_v9 = vadd.f32 %v1295_v8, %v7117_v14  ;;  %v916_v28 = vmul.f32 %v7144_v38, %v915_v37  ;;  %v5472_v37 = vld [vmem:[%s9030_s5 + $0x64] sm:$0xf0] }
 0x1bd   : > { %v1345_v48 = vadd.f32 %v1344_v63, %v7133_v27  ;;  %v906_v30 = vmul.f32 %v6597_v32, %v905_v56  ;;  %v5499_v63 = vor.u32 %v6349_v52, %v5498_v58  ;;  %2202 = vmatpush.bf16.msra.mxu3 %v6363_v15 }
 0x1be   : > { %v1674_v16 = vmax.f32 %v1296_v9, 0.0  ;;  %v920_v39 = vsel %vm919_vm12, %v7144_v38, %v916_v28  ;;  %v5506_v38 = vld [vmem:[%s9030_s5 + $0x88] sm:$0xf]  ;;  %v5503_v9 = vor.u32 %v6346_v7, %v5500_v12  ;;  %v5442_v28 = vld [vmem:[%s9030_s5 + $0x10] sm:$0xf]  ;;  %v5479_v7 = vor.u32 %v6343_v36, %v5478_v33 }
 0x1bf   : > { %v1675_v17 = vmax.f32 %v1345_v48, 0.0  ;;  %v910_v35 = vsel %vm909_vm13, %v6597_v32, %v906_v30  ;;  %v1026_v41 = vmul.f32 %v920_v39, %v6991_v18  ;;  %v801_v18 = vpop.xlane.xlu0 %800  ;;  %v6350_v32 = vld [vmem:[%s9030_s5 + $0xa0] sm:$0xf0]  ;;  %1462 = vmatpush.bf16.msrb.mxu0 %v5499_v63  ;;  %v6335_v30 = vld [vmem:[%s9030_s5 + $0x28] sm:$0xf0] }
 0x1c0   : > { %v1025_v21 = vmul.f32 %v910_v35, %v6965_v2  ;;  %v835_v46 = vmul.f32 %v801_v18, %v6754_v20  ;;  %v5507_v59 = vor.u32 %v6350_v32, %v5506_v38  ;;  %1511 = vmatpush.bf16.msrb.mxu1 %v5503_v9  ;;  %v6332_v39 = vld [vmem:[%s9030_s5 + $0x14] sm:$0xf]  ;;  %v5444_v35 = vld [vmem:[%s9030_s5 + $0x2c] sm:$0xf0] }
 0x1c1   : > { %v7190_v23 = vpack.c.bf16 %v1675_v17, %v1674_v16  ;;  %v6342_v16 = vld [vmem:[%s9030_s5 + $0x60] sm:$0xf0]  ;;  %2203 = vmatpush.bf16.msra.mxu3 %v6362_v3 }
 0x1c2   : > { %v7217_v29 = vpack.c.bf16 %v1026_v41, %v1025_v21  ;;  %v851_v2 = vadd.f32 1e-05, %v835_v46  ;;  %1560 = vmatpush.bf16.msra.mxu2 %v5507_v59  ;;  %v5471_v22 = vor.u32 %v6342_v16, %v5470_v51  ;;  %v7341_v16 = vperm.slane %v7111_v0, 2 }
 0x1c3   : > { %5537 = vmatmul.msk.bf16.gmra.mxu0 %vm677_vm0, %v7192_v26  ;;  %v7196_v11 = vpop.f32.mrf.mxu2  ;;  %5545 = vmatmul.msk.bf16.gmra.mxu1 %vm677_vm0, %v7192_v26 }
 0x1c4   : > { %v7200_v34 = vpop.f32.mrf.mxu3  ;;  %5553 = vmatmul.msk.bf16.gmra.mxu2 %vm677_vm0, %v7192_v26  ;;  %5561 = vmatmul.msk.bf16.gmra.mxu3 %vm677_vm0, %v7192_v26  ;;  %6598 = vrsqrt.f32 %v851_v2  ;;  %vm927_vm14 = vweird.f32 %v851_v2 }
 0x1c5   : > { %1463 = vmatpush.bf16.msrb.mxu0 %v5471_v22 }
 0x1c6   : > { %1561 = vmatpush.bf16.msra.mxu2 %v5479_v7 }
 0x1ca   : > { %v7252_v53 = vpop.eup %6598 }
 0x1cb   : > { %v1300_v42 = vpop.f32.mrf.mxu2  ;;  %v922_v8 = vmul.f32 %v7252_v53, %v851_v2  ;;  %vm928_vm15 = vweird.f32 %v7252_v53 }
 0x1cc   : > { %v1349_v24 = vpop.f32.mrf.mxu3  ;;  %v1301_v40 = vadd.f32 %v1300_v42, %v7117_v14  ;;  %vm7302_vm1 = vmor %vm927_vm14, %vm928_vm15 }
 0x1cd   : > { %v1350_v6 = vadd.f32 %v1349_v24, %v7133_v27  ;;  %v923_v17 = vmul.f32 %v7252_v53, %v922_v8  ;;  %v5443_v24 = vor.u32 %v6335_v30, %v5442_v28 }
 0x1ce   : > { %v1688_v43 = vmax.f32 %v1301_v40, 0.0 }
 0x1cf   : > { %v1689_v57 = vmax.f32 %v1350_v6, 0.0  ;;  %v924_v42 = vmul.f32 0.5, %v923_v17  ;;  %v5447_v6 = vor.u32 %v6332_v39, %v5444_v35  ;;  %1464 = vmatpush.bf16.msrb.mxu0 %v5443_v24  ;;  %v7344_v17 = vperm.slane %v7111_v0, 3 }
 0x1d1   : > { %v7215_v44 = vpack.c.bf16 %v1689_v57, %v1688_v43  ;;  %v925_v57 = vsub.f32 1.5, %v924_v42 }
 0x1d3   : > { %5538 = vmatmul.msk.bf16.gmra.mxu0 %vm677_vm0, %v7217_v29  ;;  %5546 = vmatmul.msk.bf16.gmra.mxu1 %vm677_vm0, %v7217_v29  ;;  %v7296_v40 = vpop.f32.mrf.mxu2  ;;  %v926_v46 = vmul.f32 %v7252_v53, %v925_v57 }
 0x1d4   : > { %5554 = vmatmul.msk.bf16.gmra.mxu2 %vm677_vm0, %v7217_v29  ;;  %5562 = vmatmul.msk.bf16.gmra.mxu3 %vm677_vm0, %v7217_v29  ;;  %v7298_v41 = vpop.f32.mrf.mxu3 }
 0x1d5   : > { %v930_v2 = vsel %vm7302_vm1, %v7252_v53, %v926_v46 }
 0x1d6   : > { %v1027_v63 = vmul.f32 %v930_v2, %v7003_v10 }
 0x212   : > { %v804_v13 = vpop.xlane.xlu1 %803 }
 0x213   : > { %v836_v48 = vmul.f32 %v804_v13, %v6754_v20  ;;  %v6339_v20 = vld [vmem:[%s9030_s5 + $0x4c] sm:$0xf] }
 0x214   : > { %v5475_v56 = vor.u32 %v6339_v20, %v5472_v37 }
 0x215   : > { %v852_v19 = vadd.f32 1e-05, %v836_v48 }
 0x216   : > { %1512 = vmatpush.bf16.msrb.mxu1 %v5475_v56  ;;  %v6361_v56 = vld [vmem:[%s9042_s29 + $0x18] sm:$0xff] }
 0x217   : > { %6600 = vrsqrt.f32 %v852_v19  ;;  %vm937_vm3 = vweird.f32 %v852_v19  ;;  %2204 = vmatpush.bf16.msra.mxu3 %v6361_v56 }
 0x21a   : > { %1513 = vmatpush.bf16.msrb.mxu1 %v5447_v6 }
 0x21d   : > { %v6601_v43 = vpop.eup %6600 }
 0x21e   : > { %v932_v21 = vmul.f32 %v6601_v43, %v852_v19  ;;  %vm938_vm2 = vweird.f32 %v6601_v43 }
 0x21f   : > { %vm939_vm4 = vmor %vm937_vm3, %vm938_vm2 }
 0x220   : > { %v933_v18 = vmul.f32 %v6601_v43, %v932_v21 }
 0x222   : > { %v934_v38 = vmul.f32 0.5, %v933_v18 }
 0x224   : > { %v935_v61 = vsub.f32 1.5, %v934_v38 }
 0x225   : > { %v1305_v32 = vpop.f32.mrf.mxu2  ;;  %v1354_v60 = vpop.f32.mrf.mxu3 }
 0x226   : > { %v1306_v59 = vadd.f32 %v1305_v32, %v7117_v14  ;;  %v1355_v50 = vadd.f32 %v1354_v60, %v7133_v27  ;;  %v936_v58 = vmul.f32 %v6601_v43, %v935_v61 }
 0x228   : > { %v1702_v25 = vmax.f32 %v1306_v59, 0.0  ;;  %v1703_v52 = vmax.f32 %v1355_v50, 0.0  ;;  %v940_v53 = vsel %vm939_vm4, %v6601_v43, %v936_v58 }
 0x229   : > { %v1028_v12 = vmul.f32 %v940_v53, %v7091_v49  ;;  %v5450_v53 = vld [vmem:[%s9030_s5 + $0x18] sm:$0xf] }
 0x22a   : > { %v7320_v8 = vpack.c.bf16 %v1703_v52, %v1702_v25 }
 0x22b   : > { %v7326_v9 = vpack.c.bf16 %v1028_v12, %v1027_v63  ;;  %v6336_v63 = vld [vmem:[%s9030_s5 + $0x30] sm:$0xf0]  ;;  %s8959_s5 = scalar_lea.vmem %s9016_s21, %s9047_s27 }
 0x22c   : > { %v6360_v12 = vld [vmem:[%s9042_s29 + $0x10] sm:$0xff] }
 0x22d   : > { %v7324_v13 = vpop.f32.mrf.mxu2  ;;  %v7328_v48 = vpop.f32.mrf.mxu3  ;;  %5539 = vmatmul.msk.bf16.gmra.mxu0 %vm677_vm0, %v7326_v9  ;;  %5547 = vmatmul.msk.bf16.gmra.mxu1 %vm677_vm0, %v7326_v9 }
 0x22e   : > { %5555 = vmatmul.msk.bf16.gmra.mxu2 %vm677_vm0, %v7326_v9  ;;  %5563 = vmatmul.msk.bf16.gmra.mxu3 %vm677_vm0, %v7326_v9 }
 0x22f   : > { %2205 = vmatpush.bf16.msra.mxu3 %v6360_v12 }
 0x230   : > { %v1270_v15 = vpop.f32.mrf.mxu0  ;;  %v1319_v51 = vpop.f32.mrf.mxu1 }
 0x231   : > { %v1271_v10 = vadd.f32 %v1270_v15, %v7117_v14  ;;  %v1320_v49 = vadd.f32 %v1319_v51, %v7133_v27  ;;  %v5451_v15 = vor.u32 %v6336_v63, %v5450_v53 }
 0x233   : > { %v1604_v19 = vmax.f32 %v1271_v10, 0.0  ;;  %v1605_v22 = vmax.f32 %v1320_v49, 0.0  ;;  %1562 = vmatpush.bf16.msra.mxu2 %v5451_v15 }
 0x235   : > { %v7353_v6 = vpack.c.bf16 %v1605_v22, %v1604_v19 }
 0x237   : > { %v1368_v20 = vpop.f32.mrf.mxu2  ;;  %v1417_v37 = vpop.f32.mrf.mxu3  ;;  %v1881_v47 = vunpack.c.h.b16 %v7353_v6 }
 0x238   : > { %v1272_v28 = vpop.f32.mrf.mxu0  ;;  %v1321_v30 = vpop.f32.mrf.mxu1  ;;  %v1369_v24 = vadd.f32 %v1368_v20, %v7341_v16  ;;  %v1418_v35 = vadd.f32 %v1417_v37, %v7344_v17 }
 0x239   : > { %v1273_v39 = vadd.f32 %v1272_v28, %v7117_v14  ;;  %v1322_v42 = vadd.f32 %v1321_v30, %v7133_v27 }
 0x23a   : > { %v1606_v18 = vmax.f32 %v1369_v24, 0.0  ;;  %v1607_v46 = vmax.f32 %v1418_v35, 0.0 }
 0x23b   : > { %v1611_v43 = vmax.f32 %v1273_v39, 0.0  ;;  %v1612_v57 = vmax.f32 %v1322_v42, 0.0 }
 0x23c   : > { %v7371_v33 = vpack.c.bf16 %v1607_v46, %v1606_v18 }
 0x23d   : > { %v7355_v21 = vpack.c.bf16 %v1612_v57, %v1611_v43  ;;  %5568 = vmatmul.msk.bf16.vlgmr.msrb.gmra.mxu0 %vm677_vm0, %v7142_v31  ;;  %5576 = vmatmul.msk.bf16.vlgmr.msrb.gmra.mxu1 %vm677_vm0, %v7142_v31 }
 0x23e   : > { %5556 = vmatmul.msk.bf16.gmra.mxu2 %vm677_vm0, %v6961_v1  ;;  %5564 = vmatmul.msk.bf16.gmra.mxu3 %vm677_vm0, %v6961_v1  ;;  %v1883_v51 = vunpack.c.h.b16 %v7371_v33 }
 0x23f   : > { %v1885_v38 = vunpack.c.h.b16 %v7355_v21  ;;  %v1370_v32 = vpop.f32.mrf.mxu2  ;;  %v1419_v59 = vpop.f32.mrf.mxu3 }
 0x240   : > { %v1371_v60 = vadd.f32 %v1370_v32, %v7341_v16  ;;  %v1420_v61 = vadd.f32 %v1419_v59, %v7344_v17  ;;  %v1275_v50 = vpop.f32.mrf.mxu0  ;;  %v1324_v2 = vpop.f32.mrf.mxu1 }
 0x241   : > { %v7365_v25 = vpack.c.b16 %v1885_v38, %v1881_v47  ;;  %v1276_v52 = vadd.f32 %v1275_v50, %v7117_v14  ;;  %v1325_v7 = vadd.f32 %v1324_v2, %v7133_v27 }
 0x242   : > { %v1613_v36 = vmax.f32 %v1371_v60, 0.0  ;;  %v1614_v3 = vmax.f32 %v1420_v61, 0.0 }
 0x243   : > { %v1618_v20 = vmax.f32 %v1276_v52, 0.0  ;;  %v1619_v37 = vmax.f32 %v1325_v7, 0.0 }
 0x244   : > { %v7373_v58 = vpack.c.bf16 %v1614_v3, %v1613_v36  ;;  %v6359_v3 = vld [vmem:[%s9042_s29 + $0x8] sm:$0xff] }
 0x245   : > { %v7394_v57 = vpack.c.bf16 %v1619_v37, %v1618_v20  ;;  %2206 = vmatpush.bf16.msra.mxu3 %v6359_v3 }
 0x246   : > { %v1887_v10 = vunpack.c.h.b16 %v7373_v58 }
 0x247   : > { %v1373_v49 = vpop.f32.mrf.mxu2  ;;  %v1422_v19 = vpop.f32.mrf.mxu3  ;;  %v1889_v60 = vunpack.c.h.b16 %v7394_v57 }
 0x248   : > { %v7388_v22 = vpack.c.b16 %v1887_v10, %v1883_v51  ;;  %v1277_v56 = vpop.f32.mrf.mxu0  ;;  %v1326_v28 = vpop.f32.mrf.mxu1  ;;  %v1374_v42 = vadd.f32 %v1373_v49, %v7341_v16  ;;  %v1423_v24 = vadd.f32 %v1422_v19, %v7344_v17  ;;  %v6358_v51 = vld [vmem:[%s9042_s29] sm:$0xff] }
 0x249   : > { %v1278_v30 = vadd.f32 %v1277_v56, %v7117_v14  ;;  %v1327_v39 = vadd.f32 %v1326_v28, %v7133_v27  ;;  %2207 = vmatpush.bf16.msra.mxu3 %v6358_v51  ;;  %v6381_v51 = vld [vmem:[%s9042_s29 + $0xb8] sm:$0xff] }
 0x24a   : > { %v1620_v46 = vmax.f32 %v1374_v42, 0.0  ;;  %v1621_v47 = vmax.f32 %v1423_v24, 0.0  ;;  %2298 = vmatpush.bf16.msra.mxu1 %v6381_v51  ;;  %v6375_v51 = vld [vmem:[%s9042_s29 + $0x88] sm:$0xff] }
 0x24b   : > { %v1625_v35 = vmax.f32 %v1278_v30, 0.0  ;;  %v1626_v43 = vmax.f32 %v1327_v39, 0.0 }
 0x24c   : > { %v7413_v52 = vpack.c.bf16 %v1621_v47, %v1620_v46 }
 0x24d   : > { %v7396_v18 = vpack.c.bf16 %v1626_v43, %v1625_v35  ;;  %5569 = vmatmul.msk.bf16.gmra.mxu0 %vm677_vm0, %v7192_v26  ;;  %5577 = vmatmul.msk.bf16.gmra.mxu1 %vm677_vm0, %v7192_v26 }
 0x24e   : > { %5557 = vmatmul.msk.bf16.gmra.mxu2 %vm677_vm0, %v7000_v4  ;;  %5565 = vmatmul.msk.bf16.gmra.mxu3 %vm677_vm0, %v7000_v4  ;;  %v1891_v49 = vunpack.c.h.b16 %v7413_v52 }
 0x24f   : > { %v1375_v38 = vpop.f32.mrf.mxu2  ;;  %v1424_v32 = vpop.f32.mrf.mxu3  ;;  %v1893_v59 = vunpack.c.h.b16 %v7396_v18 }
 0x250   : > { %v1376_v61 = vadd.f32 %v1375_v38, %v7341_v16  ;;  %v1425_v50 = vadd.f32 %v1424_v32, %v7344_v17  ;;  %v1280_v2 = vpop.f32.mrf.mxu0  ;;  %v1329_v36 = vpop.f32.mrf.mxu1 }
 0x251   : > { %v7415_v63 = vpack.c.b16 %v1893_v59, %v1889_v60  ;;  %v1281_v12 = vadd.f32 %v1280_v2, %v7117_v14  ;;  %v1330_v15 = vadd.f32 %v1329_v36, %v7133_v27 }
 0x252   : > { %v1627_v7 = vmax.f32 %v1376_v61, 0.0  ;;  %v1628_v53 = vmax.f32 %v1425_v50, 0.0 }
 0x253   : > { %v1632_v20 = vmax.f32 %v1281_v12, 0.0  ;;  %v1633_v37 = vmax.f32 %v1330_v15, 0.0  ;;  %v6389_v12 = vld [vmem:[%s9042_s29 + $0xf8] sm:$0xff] }
 0x254   : > { %v7422_v10 = vpack.c.bf16 %v1628_v53, %v1627_v7  ;;  %v6373_v15 = vld [vmem:[%s9042_s29 + $0x78] sm:$0xff]  ;;  %2347 = vmatpush.bf16.msrb.mxu2 %v6389_v12  ;;  %v6368_v12 = vld [vmem:[%s9042_s29 + $0x50] sm:$0xff] }
 0x255   : > { %v7432_v47 = vpack.c.bf16 %v1633_v37, %v1632_v20  ;;  %2249 = vmatpush.bf16.msra.mxu0 %v6373_v15  ;;  %v6376_v15 = vld [vmem:[%s9042_s29 + $0x90] sm:$0xff] }
 0x256   : > { %v1895_v19 = vunpack.c.h.b16 %v7422_v10 }
 0x257   : > { %v1378_v56 = vpop.f32.mrf.mxu2  ;;  %v1427_v28 = vpop.f32.mrf.mxu3  ;;  %v1897_v50 = vunpack.c.h.b16 %v7432_v47 }
 0x258   : > { %v1282_v30 = vpop.f32.mrf.mxu0  ;;  %v1331_v39 = vpop.f32.mrf.mxu1  ;;  %v7426_v42 = vpack.c.b16 %v1895_v19, %v1891_v49  ;;  %v1379_v43 = vadd.f32 %v1378_v56, %v7341_v16  ;;  %v1428_v46 = vadd.f32 %v1427_v28, %v7344_v17 }
 0x259   : > { %v1283_v24 = vadd.f32 %v1282_v30, %v7117_v14  ;;  %v1332_v35 = vadd.f32 %v1331_v39, %v7133_v27 }
 0x25a   : > { %v1634_v60 = vmax.f32 %v1379_v43, 0.0  ;;  %v1635_v61 = vmax.f32 %v1428_v46, 0.0  ;;  %v6380_v43 = vld [vmem:[%s9042_s29 + $0xb0] sm:$0xff]  ;;  %v6397_v46 = vld [vmem:[%s9045_s0 + $0x38] sm:$0xff] }
 0x25b   : > { %v1639_v38 = vmax.f32 %v1283_v24, 0.0  ;;  %v1640_v32 = vmax.f32 %v1332_v35, 0.0  ;;  %v6388_v24 = vld [vmem:[%s9042_s29 + $0xf0] sm:$0xff]  ;;  %2299 = vmatpush.bf16.msra.mxu1 %v6380_v43  ;;  %2768 = vmatpush.bf16.msrb.mxu3 %v6397_v46  ;;  %v6394_v46 = vld [vmem:[%s9045_s0 + $0x20] sm:$0xff] }
 0x25c   : > { %v7459_v19 = vpack.c.bf16 %v1635_v61, %v1634_v60  ;;  %v6372_v35 = vld [vmem:[%s9042_s29 + $0x70] sm:$0xff]  ;;  %2348 = vmatpush.bf16.msrb.mxu2 %v6388_v24  ;;  %v6387_v61 = vld [vmem:[%s9042_s29 + $0xe8] sm:$0xff]  ;;  %v1896_v24 = vunpack.c.l.b16 %v7432_v47 }
 0x25d   : > { %v7434_v59 = vpack.c.bf16 %v1640_v32, %v1639_v38  ;;  %5570 = vmatmul.msk.bf16.gmra.mxu0 %vm677_vm0, %v7217_v29  ;;  %5578 = vmatmul.msk.bf16.gmra.mxu1 %vm677_vm0, %v7217_v29  ;;  %v1884_v38 = vunpack.c.l.b16 %v7355_v21  ;;  %v1880_v32 = vunpack.c.l.b16 %v7353_v6  ;;  %v6371_v21 = vld [vmem:[%s9042_s29 + $0x68] sm:$0xff] }
 0x25e   : > { %5558 = vmatmul.msk.bf16.gmra.mxu2 %vm677_vm0, %v7016_v45  ;;  %5566 = vmatmul.msk.bf16.gmra.mxu3 %vm677_vm0, %v7016_v45  ;;  %v1899_v28 = vunpack.c.h.b16 %v7459_v19  ;;  %v6379_v6 = vld [vmem:[%s9042_s29 + $0xa8] sm:$0xff] }
 0x25f   : > { %v1380_v2 = vpop.f32.mrf.mxu2  ;;  %v1429_v36 = vpop.f32.mrf.mxu3  ;;  %v1901_v3 = vunpack.c.h.b16 %v7434_v59  ;;  %2250 = vmatpush.bf16.msra.mxu0 %v6372_v35  ;;  %v1944_v60 = vpack.c.b16 %v1884_v38, %v1880_v32  ;;  %2300 = vmatpush.bf16.msra.mxu1 %v6379_v6  ;;  %v6384_v6 = vld [vmem:[%s9042_s29 + $0xd0] sm:$0xff] }
 0x260   : > { %v1381_v7 = vadd.f32 %v1380_v2, %v7341_v16  ;;  %v1430_v53 = vadd.f32 %v1429_v36, %v7344_v17  ;;  %2349 = vmatpush.bf16.msrb.mxu2 %v6387_v61  ;;  %v6370_v2 = vld [vmem:[%s9042_s29 + $0x60] sm:$0xff] }
 0x261   : > { %v7457_v49 = vpack.c.b16 %v1901_v3, %v1897_v50  ;;  %v6396_v50 = vld [vmem:[%s9045_s0 + $0x30] sm:$0xff]  ;;  %v6378_v36 = vld [vmem:[%s9042_s29 + $0xa0] sm:$0xff]  ;;  %v1888_v3 = vunpack.c.l.b16 %v7394_v57 }
 0x262   : > { %v1641_v20 = vmax.f32 %v1381_v7, 0.0  ;;  %v1642_v37 = vmax.f32 %v1430_v53, 0.0  ;;  %2769 = vmatpush.bf16.msrb.mxu3 %v6396_v50  ;;  %v6377_v53 = vld [vmem:[%s9042_s29 + $0x98] sm:$0xff]  ;;  %v6386_v57 = vld [vmem:[%s9042_s29 + $0xe0] sm:$0xff] }
 0x263   : > { %2251 = vmatpush.bf16.msra.mxu0 %v6371_v21  ;;  %2301 = vmatpush.bf16.msra.mxu1 %v6378_v36 }
 0x264   : > { %v7461_v56 = vpack.c.bf16 %v1642_v37, %v1641_v20  ;;  %2350 = vmatpush.bf16.msrb.mxu2 %v6386_v57  ;;  %v1900_v20 = vunpack.c.l.b16 %v7434_v59  ;;  %v6395_v37 = vld [vmem:[%s9045_s0 + $0x28] sm:$0xff]  ;;  %v6385_v59 = vld [vmem:[%s9042_s29 + $0xd8] sm:$0xff]  ;;  %v1293_v57 = vadd.f32 %v7150_v55, %v7117_v14 }
 0x266   : > { %v1903_v30 = vunpack.c.h.b16 %v7461_v56  ;;  %2770 = vmatpush.bf16.msrb.mxu3 %v6395_v37  ;;  %v1952_v35 = vpack.c.b16 %v1900_v20, %v1896_v24  ;;  %v1886_v20 = vunpack.c.l.b16 %v7373_v58 }
 0x267   : > { %2252 = vmatpush.bf16.msra.mxu0 %v6370_v2  ;;  %2302 = vmatpush.bf16.msra.mxu1 %v6377_v53 }
 0x268   : > { %v7465_v39 = vpack.c.b16 %v1903_v30, %v1899_v28  ;;  %v6366_v28 = vld [vmem:[%s9042_s29 + $0x40] sm:$0xff]  ;;  %2351 = vmatpush.bf16.msrb.mxu2 %v6385_v59  ;;  %v1667_v59 = vmax.f32 %v1293_v57, 0.0 }
 0x269   : > { %v6374_v30 = vld [vmem:[%s9042_s29 + $0x80] sm:$0xff] }
 0x26a   : > { %2771 = vmatpush.bf16.msrb.mxu3 %v6394_v46 }
 0x26b   : > { %2303 = vmatpush.bf16.msra.mxu1 %v6376_v15 }
 0x26c   : > { %2352 = vmatpush.bf16.msrb.mxu2 %v6384_v6 }
 0x26d   : > { %5571 = vmatmul.msk.bf16.gmra.mxu0 %vm677_vm0, %v7326_v9  ;;  %5579 = vmatmul.msk.bf16.gmra.mxu1 %vm677_vm0, %v7326_v9 }
 0x26e   : > { %5559 = vmatmul.msk.bf16.gmra.mxu2 %vm677_vm0, %v7100_v62  ;;  %5567 = vmatmul.msk.bf16.gmra.mxu3 %vm677_vm0, %v7100_v62 }
 0x26f   : > { %2304 = vmatpush.bf16.msra.mxu1 %v6375_v51  ;;  %v7592_v51 = vperm.slane %v7111_v0, 5 }
 0x273   : > { %2305 = vmatpush.bf16.msra.mxu1 %v6374_v30  ;;  %v6393_v30 = vld [vmem:[%s9045_s0 + $0x18] sm:$0xff] }
 0x274   : > { %2772 = vmatpush.bf16.msrb.mxu3 %v6393_v30 }
 0x27d   : > { %5572 = vmatmul.msk.bf16.gmra.mxu0 %vm677_vm0, %v6961_v1  ;;  %5580 = vmatmul.msk.bf16.gmra.mxu1 %vm677_vm0, %v6961_v1 }
 0x27e   : > { %5584 = vmatmul.msk.bf16.vlgmr.msra.gmra.mxu2 %vm677_vm0, %v7142_v31  ;;  %2208 = vmatmul.bf16.vlgmr.msra.gmra.mxu3 %v1944_v60  ;;  %v1892_v31 = vunpack.c.l.b16 %v7396_v18  ;;  %v6369_v18 = vld [vmem:[%s9042_s29 + $0x58] sm:$0xff] }
 0x27f   : > { %2253 = vmatpush.bf16.msra.mxu0 %v6369_v18 }
 0x280   : > { %v1948_v7 = vpack.c.b16 %v1892_v31, %v1888_v3 }
 0x283   : > { %2254 = vmatpush.bf16.msra.mxu0 %v6368_v12  ;;  %v1342_v12 = vadd.f32 %v7154_v5, %v7133_v27 }
 0x28d   : > { %5573 = vmatmul.msk.bf16.gmra.mxu0 %vm677_vm0, %v7000_v4  ;;  %5581 = vmatmul.msk.bf16.gmra.mxu1 %vm677_vm0, %v7000_v4 }
 0x28e   : > { %5585 = vmatmul.msk.bf16.gmra.mxu2 %vm677_vm0, %v7192_v26  ;;  %2213 = vmatmul.bf16.gmra.mxu3 %v1948_v7  ;;  %v6367_v26 = vld [vmem:[%s9042_s29 + $0x48] sm:$0xff] }
 0x28f   : > { %2255 = vmatpush.bf16.msra.mxu0 %v6367_v26  ;;  %v7589_v26 = vperm.slane %v7111_v0, 4 }
 0x293   : > { %2256 = vmatpush.bf16.msra.mxu0 %v6366_v28 }
 0x29d   : > { %5574 = vmatmul.msk.bf16.gmra.mxu0 %vm677_vm0, %v7016_v45  ;;  %5582 = vmatmul.msk.bf16.gmra.mxu1 %vm677_vm0, %v7016_v45 }
 0x29e   : > { %5586 = vmatmul.msk.bf16.gmra.mxu2 %vm677_vm0, %v7217_v29  ;;  %2218 = vmatmul.bf16.gmra.mxu3 %v1952_v35 }
 0x2aa   : > { %v1285_v47 = vpop.f32.mrf.mxu0  ;;  %v1334_v43 = vpop.f32.mrf.mxu1 }
 0x2ab   : > { %v1286_v38 = vadd.f32 %v1285_v47, %v7117_v14  ;;  %v1335_v32 = vadd.f32 %v1334_v43, %v7133_v27  ;;  %v1882_v47 = vunpack.c.l.b16 %v7371_v33 }
 0x2ad   : > { %5575 = vmatmul.msk.bf16.gmra.mxu0 %vm677_vm0, %v7100_v62  ;;  %5583 = vmatmul.msk.bf16.gmra.mxu1 %vm677_vm0, %v7100_v62  ;;  %v1646_v29 = vmax.f32 %v1286_v38, 0.0  ;;  %v1647_v60 = vmax.f32 %v1335_v32, 0.0  ;;  %v1668_v38 = vmax.f32 %v1342_v12, 0.0 }
 0x2ae   : > { %5587 = vmatmul.msk.bf16.gmra.mxu2 %vm677_vm0, %v7326_v9 }
 0x2af   : > { %v7580_v7 = vpack.c.bf16 %v1647_v60, %v1646_v29 }
 0x2b1   : > { %v1383_v61 = vpop.f32.mrf.mxu2  ;;  %v1432_v21 = vpop.f32.mrf.mxu3  ;;  %v1904_v55 = vunpack.c.l.b16 %v7580_v7 }
 0x2b2   : > { %v1287_v50 = vpop.f32.mrf.mxu0  ;;  %v1336_v31 = vpop.f32.mrf.mxu1  ;;  %v1384_v3 = vadd.f32 %v1383_v61, %v7341_v16  ;;  %v1433_v9 = vadd.f32 %v1432_v21, %v7344_v17  ;;  %v7605_v61 = vpack.c.b16 %v1886_v20, %v1882_v47 }
 0x2b3   : > { %v1288_v2 = vadd.f32 %v1287_v50, %v7117_v14  ;;  %v1337_v36 = vadd.f32 %v1336_v31, %v7133_v27 }
 0x2b4   : > { %v1648_v37 = vmax.f32 %v1384_v3, 0.0  ;;  %v1649_v28 = vmax.f32 %v1433_v9, 0.0 }
 0x2b5   : > { %v1653_v18 = vmax.f32 %v1288_v2, 0.0  ;;  %v1654_v53 = vmax.f32 %v1337_v36, 0.0  ;;  %v7615_v36 = vpack.c.bf16 %v1668_v38, %v1667_v59 }
 0x2b6   : > { %v7607_v21 = vpack.c.bf16 %v1649_v28, %v1648_v37 }
 0x2b7   : > { %v7586_v15 = vpack.c.bf16 %v1654_v53, %v1653_v18  ;;  %v1916_v30 = vunpack.c.l.b16 %v7615_v36 }
 0x2b8   : > { %v1907_v9 = vunpack.c.h.b16 %v7607_v21 }
 0x2b9   : > { %v1385_v24 = vpop.f32.mrf.mxu2  ;;  %v1434_v5 = vpop.f32.mrf.mxu3  ;;  %v1908_v35 = vunpack.c.l.b16 %v7586_v15 }
 0x2ba   : > { %v1386_v0 = vadd.f32 %v1385_v24, %v7341_v16  ;;  %v1435_v43 = vadd.f32 %v1434_v5, %v7344_v17  ;;  %v1466_v58 = vpop.f32.mrf.mxu0  ;;  %v1515_v46 = vpop.f32.mrf.mxu1 }
 0x2bb   : > { %v1467_v32 = vadd.f32 %v1466_v58, %v7589_v26  ;;  %v1516_v29 = vadd.f32 %v1515_v46, %v7592_v51  ;;  %v1956_v60 = vpack.c.b16 %v1908_v35, %v1904_v55  ;;  %v1298_v55 = vadd.f32 %v7196_v11, %v7117_v14  ;;  %v6392_v11 = vld [vmem:[%s9045_s0 + $0x10] sm:$0xff] }
 0x2bc   : > { %v1655_v6 = vmax.f32 %v1386_v0, 0.0  ;;  %v1656_v50 = vmax.f32 %v1435_v43, 0.0  ;;  %v1912_v35 = vunpack.c.l.b16 %v7146_v54  ;;  %v1347_v0 = vadd.f32 %v7200_v34, %v7133_v27  ;;  %2773 = vmatpush.bf16.msrb.mxu3 %v6392_v11 }
 0x2bd   : > { %v1608_v33 = vmax.f32 %v1467_v32, 0.0  ;;  %v1609_v31 = vmax.f32 %v1516_v29, 0.0  ;;  %2223 = vmatmul.bf16.gmra.mxu3 %v1956_v60  ;;  %2257 = vmatmul.bf16.vlgmr.msra.gmra.mxu0 %v7365_v25  ;;  %v6383_v25 = vld [vmem:[%s9042_s29 + $0xc8] sm:$0xff]  ;;  %v1681_v46 = vmax.f32 %v1298_v55, 0.0  ;;  %v1894_v29 = vunpack.c.l.b16 %v7422_v10 }
 0x2be   : > { %v7610_v2 = vpack.c.bf16 %v1656_v50, %v1655_v6  ;;  %5588 = vmatmul.msk.bf16.gmra.mxu2 %vm677_vm0, %v6961_v1  ;;  %2306 = vmatmul.bf16.vlgmr.msra.gmra.mxu1 %v7605_v61  ;;  %v1960_v58 = vpack.c.b16 %v1916_v30, %v1912_v35  ;;  %v1890_v34 = vunpack.c.l.b16 %v7413_v52 }
 0x2bf   : > { %v1718_v3 = vpack.c.bf16 %v1609_v31, %v1608_v33  ;;  %2353 = vmatpush.bf16.msrb.mxu2 %v6383_v25 }
 0x2c0   : > { %v1911_v18 = vunpack.c.h.b16 %v7610_v2  ;;  %v7649_v52 = vpack.c.b16 %v1894_v29, %v1890_v34  ;;  %v1352_v34 = vadd.f32 %v7298_v41, %v7133_v27  ;;  %v1898_v41 = vunpack.c.l.b16 %v7459_v19 }
 0x2c1   : > { %v1388_v53 = vpop.f32.mrf.mxu2  ;;  %v1437_v57 = vpop.f32.mrf.mxu3  ;;  %v2512_v60 = vunpack.c.l.b16 %v1718_v3  ;;  %v2513_v6 = vunpack.c.h.b16 %v1718_v3 }
 0x2c2   : > { %v1468_v12 = vpop.f32.mrf.mxu0  ;;  %v1517_v20 = vpop.f32.mrf.mxu1  ;;  %v7622_v37 = vpack.c.b16 %v1911_v18, %v1907_v9  ;;  %v1389_v24 = vadd.f32 %v1388_v53, %v7341_v16  ;;  %v1438_v5 = vadd.f32 %v1437_v57, %v7344_v17  ;;  %v1682_v18 = vmax.f32 %v1347_v0, 0.0 }
 0x2c3   : > { %v1469_v1 = vadd.f32 %v1468_v12, %v7589_v26  ;;  %v1518_v28 = vadd.f32 %v1517_v20, %v7592_v51 }
 0x2c4   : > { %v1662_v38 = vmax.f32 %v1389_v24, 0.0  ;;  %v1663_v32 = vmax.f32 %v1438_v5, 0.0 }
 0x2c5   : > { %v1615_v59 = vmax.f32 %v1469_v1, 0.0  ;;  %v1616_v47 = vmax.f32 %v1518_v28, 0.0 }
 0x2c6   : > { %v7647_v28 = vpack.c.bf16 %v1663_v32, %v1662_v38 }
 0x2c7   : > { %v1722_v43 = vpack.c.bf16 %v1616_v47, %v1615_v59  ;;  %v7657_v59 = vpack.c.bf16 %v1682_v18, %v1681_v46 }
 0x2c8   : > { %v1915_v0 = vunpack.c.h.b16 %v7647_v28 }
 0x2c9   : > { %v2514_v50 = vunpack.c.l.b16 %v1722_v43  ;;  %v2515_v33 = vunpack.c.h.b16 %v1722_v43  ;;  %v1390_v31 = vpop.f32.mrf.mxu2  ;;  %v1439_v9 = vpop.f32.mrf.mxu3 }
 0x2ca   : > { %v1391_v53 = vadd.f32 %v1390_v31, %v7341_v16  ;;  %v1440_v57 = vadd.f32 %v1439_v9, %v7344_v17  ;;  %v1471_v25 = vpop.f32.mrf.mxu0  ;;  %v1520_v12 = vpop.f32.mrf.mxu1  ;;  %v1920_v31 = vunpack.c.l.b16 %v7190_v23 }
 0x2cb   : > { %v7641_v10 = vpack.c.b16 %v2514_v50, %v2512_v60  ;;  %v7643_v20 = vpack.c.b16 %v2515_v33, %v2513_v6  ;;  %v1472_v3 = vadd.f32 %v1471_v25, %v7589_v26  ;;  %v1521_v1 = vadd.f32 %v1520_v12, %v7592_v51 }
 0x2cc   : > { %v1669_v30 = vmax.f32 %v1391_v53, 0.0  ;;  %v1670_v55 = vmax.f32 %v1440_v57, 0.0  ;;  %v1924_v60 = vunpack.c.l.b16 %v7657_v59  ;;  %v1303_v6 = vadd.f32 %v7296_v40, %v7117_v14  ;;  %v6391_v40 = vld [vmem:[%s9045_s0 + $0x8] sm:$0xff] }
 0x2cd   : > { %v1622_v24 = vmax.f32 %v1472_v3, 0.0  ;;  %v1623_v5 = vmax.f32 %v1521_v1, 0.0  ;;  %2228 = vmatmul.bf16.gmra.mxu3 %v1960_v58  ;;  %2262 = vmatmul.bf16.gmra.mxu0 %v7415_v63  ;;  %v6382_v63 = vld [vmem:[%s9042_s29 + $0xc0] sm:$0xff]  ;;  %v1902_v1 = vunpack.c.l.b16 %v7461_v56 }
 0x2ce   : > { %v7652_v35 = vpack.c.bf16 %v1670_v55, %v1669_v30  ;;  %5589 = vmatmul.msk.bf16.gmra.mxu2 %vm677_vm0, %v7000_v4  ;;  %2311 = vmatmul.bf16.gmra.mxu1 %v7649_v52  ;;  %v1964_v57 = vpack.c.b16 %v1924_v60, %v1920_v31  ;;  %v1695_v25 = vmax.f32 %v1303_v6, 0.0 }
 0x2cf   : > { %v1726_v47 = vpack.c.bf16 %v1623_v5, %v1622_v24  ;;  %2354 = vmatpush.bf16.msrb.mxu2 %v6382_v63  ;;  %2774 = vmatpush.bf16.msrb.mxu3 %v6391_v40  ;;  %v7691_v19 = vpack.c.b16 %v1902_v1, %v1898_v41 }
 0x2d0   : > { %v1919_v43 = vunpack.c.h.b16 %v7652_v35 }
 0x2d1   : > { %v1393_v38 = vpop.f32.mrf.mxu2  ;;  %v1442_v32 = vpop.f32.mrf.mxu3  ;;  %v2516_v30 = vunpack.c.l.b16 %v1726_v47  ;;  %v2517_v55 = vunpack.c.h.b16 %v1726_v47 }
 0x2d2   : > { %v1473_v58 = vpop.f32.mrf.mxu0  ;;  %v1522_v29 = vpop.f32.mrf.mxu1  ;;  %v7664_v11 = vpack.c.b16 %v1919_v43, %v1915_v0  ;;  %v1394_v50 = vadd.f32 %v1393_v38, %v7341_v16  ;;  %v1443_v33 = vadd.f32 %v1442_v32, %v7344_v17  ;;  %v1696_v38 = vmax.f32 %v1352_v34, 0.0 }
 0x2d3   : > { %v1474_v4 = vadd.f32 %v1473_v58, %v7589_v26  ;;  %v1523_v46 = vadd.f32 %v1522_v29, %v7592_v51 }
 0x2d4   : > { %v1676_v12 = vmax.f32 %v1394_v50, 0.0  ;;  %v1677_v3 = vmax.f32 %v1443_v33, 0.0 }
 0x2d5   : > { %v1629_v9 = vmax.f32 %v1474_v4, 0.0  ;;  %v1630_v18 = vmax.f32 %v1523_v46, 0.0 }
 0x2d6   : > { %v7689_v60 = vpack.c.bf16 %v1677_v3, %v1676_v12 }
 0x2d7   : > { %v1730_v53 = vpack.c.bf16 %v1630_v18, %v1629_v9  ;;  %v7699_v18 = vpack.c.bf16 %v1696_v38, %v1695_v25 }
 0x2d9   : > { %v1395_v24 = vpop.f32.mrf.mxu2  ;;  %v1444_v5 = vpop.f32.mrf.mxu3  ;;  %v2518_v0 = vunpack.c.l.b16 %v1730_v53  ;;  %v2519_v43 = vunpack.c.h.b16 %v1730_v53  ;;  %v1923_v53 = vunpack.c.h.b16 %v7689_v60 }
 0x2da   : > { %v1396_v32 = vadd.f32 %v1395_v24, %v7341_v16  ;;  %v1445_v63 = vadd.f32 %v1444_v5, %v7344_v17  ;;  %v1476_v58 = vpop.f32.mrf.mxu0  ;;  %v1525_v29 = vpop.f32.mrf.mxu1  ;;  %v1932_v24 = vunpack.c.l.b16 %v7699_v18 }
 0x2db   : > { %v1477_v56 = vadd.f32 %v1476_v58, %v7589_v26  ;;  %v1526_v4 = vadd.f32 %v1525_v29, %v7592_v51  ;;  %v7685_v46 = vpack.c.b16 %v2518_v0, %v2516_v30  ;;  %v7687_v47 = vpack.c.b16 %v2519_v43, %v2517_v55 }
 0x2dc   : > { %v1683_v6 = vmax.f32 %v1396_v32, 0.0  ;;  %v1684_v50 = vmax.f32 %v1445_v63, 0.0  ;;  %v1928_v43 = vunpack.c.l.b16 %v7215_v44  ;;  %v1909_v32 = vunpack.c.h.b16 %v7586_v15  ;;  %v6390_v15 = vld [vmem:[%s9045_s0] sm:$0xff] }
 0x2dd   : > { %v1636_v33 = vmax.f32 %v1477_v56, 0.0  ;;  %v1637_v31 = vmax.f32 %v1526_v4, 0.0  ;;  %2233 = vmatmul.bf16.gmra.mxu3 %v1964_v57  ;;  %2267 = vmatmul.bf16.gmra.mxu0 %v7457_v49  ;;  %v6421_v49 = vld [vmem:[%s9045_s0 + $0xf8] sm:$0xff]  ;;  %v1308_v63 = vadd.f32 %v7324_v13, %v7117_v14  ;;  %v1357_v58 = vadd.f32 %v7328_v48, %v7133_v27 }
 0x2de   : > { %v7694_v9 = vpack.c.bf16 %v1684_v50, %v1683_v6  ;;  %5590 = vmatmul.msk.bf16.gmra.mxu2 %vm677_vm0, %v7016_v45  ;;  %2316 = vmatmul.bf16.gmra.mxu1 %v7691_v19  ;;  %v6405_v57 = vld [vmem:[%s9045_s0 + $0x78] sm:$0xff]  ;;  %v1968_v56 = vpack.c.b16 %v1932_v24, %v1928_v43  ;;  %v1905_v4 = vunpack.c.h.b16 %v7580_v7  ;;  %v1906_v7 = vunpack.c.l.b16 %v7607_v21 }
 0x2df   : > { %v1734_v34 = vpack.c.bf16 %v1637_v31, %v1636_v33  ;;  %2915 = vmatpush.bf16.msra.mxu2 %v6421_v49  ;;  %2817 = vmatpush.bf16.msrb.mxu0 %v6405_v57  ;;  %v1910_v33 = vunpack.c.l.b16 %v7610_v2  ;;  %v6413_v31 = vld [vmem:[%s9045_s0 + $0xb8] sm:$0xff] }
 0x2e0   : > { %v1927_v12 = vunpack.c.h.b16 %v7694_v9  ;;  %v1957_v57 = vpack.c.b16 %v1909_v32, %v1905_v4  ;;  %2866 = vmatpush.bf16.msrb.mxu1 %v6413_v31  ;;  %2775 = vmatpush.bf16.msrb.mxu3 %v6390_v15 }
 0x2e1   : > { %v1398_v3 = vpop.f32.mrf.mxu2  ;;  %v1447_v1 = vpop.f32.mrf.mxu3  ;;  %v2520_v14 = vunpack.c.l.b16 %v1734_v34  ;;  %v2521_v13 = vunpack.c.h.b16 %v1734_v34 }
 0x2e2   : > { %v1478_v45 = vpop.f32.mrf.mxu0  ;;  %v1527_v40 = vpop.f32.mrf.mxu1  ;;  %v7709_v30 = vpack.c.b16 %v1927_v12, %v1923_v53  ;;  %v1399_v5 = vadd.f32 %v1398_v3, %v7341_v16  ;;  %v1448_v0 = vadd.f32 %v1447_v1, %v7344_v17 }
 0x2e3   : > { %v1479_v25 = vadd.f32 %v1478_v45, %v7589_v26  ;;  %v1528_v55 = vadd.f32 %v1527_v40, %v7592_v51 }
 0x2e4   : > { %v1690_v6 = vmax.f32 %v1399_v5, 0.0  ;;  %v1691_v50 = vmax.f32 %v1448_v0, 0.0  ;;  %v7741_v5 = vpack.c.b16 %v1910_v33, %v1906_v7 }
 0x2e5   : > { %v1643_v38 = vmax.f32 %v1479_v25, 0.0  ;;  %v1644_v41 = vmax.f32 %v1528_v55, 0.0 }
 0x2e6   : > { %v7739_v55 = vpack.c.bf16 %v1691_v50, %v1690_v6 }
 0x2e7   : > { %v1738_v29 = vpack.c.bf16 %v1644_v41, %v1643_v38  ;;  %v1709_v38 = vmax.f32 %v1308_v63, 0.0  ;;  %v1710_v41 = vmax.f32 %v1357_v58, 0.0  ;;  %v6420_v63 = vld [vmem:[%s9045_s0 + $0xf0] sm:$0xff] }
 0x2e8   : > { %v1931_v4 = vunpack.c.h.b16 %v7739_v55  ;;  %2916 = vmatpush.bf16.msra.mxu2 %v6420_v63 }
 0x2e9   : > { %v1400_v53 = vpop.f32.mrf.mxu2  ;;  %v1449_v27 = vpop.f32.mrf.mxu3  ;;  %v2522_v48 = vunpack.c.l.b16 %v1738_v29  ;;  %v2523_v12 = vunpack.c.h.b16 %v1738_v29  ;;  %v7750_v31 = vpack.c.bf16 %v1710_v41, %v1709_v38 }
 0x2ea   : > { %v1401_v3 = vadd.f32 %v1400_v53, %v7341_v16  ;;  %v1450_v2 = vadd.f32 %v1449_v27, %v7344_v17  ;;  %v1481_v1 = vpop.f32.mrf.mxu0  ;;  %v1530_v49 = vpop.f32.mrf.mxu1  ;;  %v1917_v53 = vunpack.c.h.b16 %v7615_v36  ;;  %v1918_v36 = vunpack.c.l.b16 %v7652_v35 }
 0x2eb   : > { %v1482_v45 = vadd.f32 %v1481_v1, %v7589_v26  ;;  %v1531_v40 = vadd.f32 %v1530_v49, %v7592_v51  ;;  %v7735_v34 = vpack.c.b16 %v2522_v48, %v2520_v14  ;;  %v7737_v25 = vpack.c.b16 %v2523_v12, %v2521_v13 }
 0x2ec   : > { %v1697_v21 = vmax.f32 %v1401_v3, 0.0  ;;  %v1698_v24 = vmax.f32 %v1450_v2, 0.0  ;;  %v1913_v12 = vunpack.c.h.b16 %v7146_v54  ;;  %v1940_v2 = vunpack.c.l.b16 %v7750_v31  ;;  %v6429_v54 = vld [vmem:[%s9002_s7 + $0x38] sm:$0xff] }
 0x2ed   : > { %v1650_v0 = vmax.f32 %v1482_v45, 0.0  ;;  %v1651_v43 = vmax.f32 %v1531_v40, 0.0  ;;  %2238 = vmatmul.bf16.gmra.mxu3 %v1968_v56  ;;  %2272 = vmatmul.bf16.gmra.mxu0 %v1957_v57  ;;  %v1936_v57 = vunpack.c.l.b16 %v7320_v8 }
 0x2ee   : > { %v7743_v32 = vpack.c.bf16 %v1698_v24, %v1697_v21  ;;  %5591 = vmatmul.msk.bf16.gmra.mxu2 %vm677_vm0, %v7100_v62  ;;  %2321 = vmatmul.bf16.gmra.mxu1 %v7741_v5  ;;  %v6404_v62 = vld [vmem:[%s9045_s0 + $0x70] sm:$0xff]  ;;  %v1961_v49 = vpack.c.b16 %v1917_v53, %v1913_v12 }
 0x2ef   : > { %v1742_v29 = vpack.c.bf16 %v1651_v43, %v1650_v0  ;;  %2818 = vmatpush.bf16.msrb.mxu0 %v6404_v62  ;;  %v6412_v21 = vld [vmem:[%s9045_s0 + $0xb0] sm:$0xff]  ;;  %3240 = vmatpush.bf16.msra.mxu3 %v6429_v54 }
 0x2f0   : > { %v1935_v6 = vunpack.c.h.b16 %v7743_v32  ;;  %2867 = vmatpush.bf16.msrb.mxu1 %v6412_v21 }
 0x2f1   : > { %v1403_v50 = vpop.f32.mrf.mxu2  ;;  %v1452_v33 = vpop.f32.mrf.mxu3  ;;  %v2524_v24 = vunpack.c.l.b16 %v1742_v29  ;;  %v2525_v0 = vunpack.c.h.b16 %v1742_v29 }
 0x2f2   : > { %v1483_v56 = vpop.f32.mrf.mxu0  ;;  %v1532_v15 = vpop.f32.mrf.mxu1  ;;  %v7758_v58 = vpack.c.b16 %v1935_v6, %v1931_v4  ;;  %v1404_v27 = vadd.f32 %v1403_v50, %v7341_v16  ;;  %v1453_v48 = vadd.f32 %v1452_v33, %v7344_v17  ;;  %v1914_v6 = vunpack.c.l.b16 %v7647_v28 }
 0x2f3   : > { %v1484_v14 = vadd.f32 %v1483_v56, %v7589_v26  ;;  %v1533_v13 = vadd.f32 %v1532_v15, %v7592_v51  ;;  %v1972_v15 = vpack.c.b16 %v1940_v2, %v1936_v57 }
 0x2f4   : > { %v1704_v45 = vmax.f32 %v1404_v27, 0.0  ;;  %v1705_v40 = vmax.f32 %v1453_v48, 0.0 }
 0x2f5   : > { %v1657_v7 = vmax.f32 %v1484_v14, 0.0  ;;  %v1658_v3 = vmax.f32 %v1533_v13, 0.0 }
 0x2f6   : > { %v7784_v13 = vpack.c.bf16 %v1705_v40, %v1704_v45  ;;  %v6403_v45 = vld [vmem:[%s9045_s0 + $0x68] sm:$0xff] }
 0x2f7   : > { %v1746_v1 = vpack.c.bf16 %v1658_v3, %v1657_v7  ;;  %v6602_v3 = vld [vmem:[%s9035_s22] sm:$0xff]  ;;  %2819 = vmatpush.bf16.msrb.mxu0 %v6403_v45 }
 0x2f8   : > { %v1939_v7 = vunpack.c.h.b16 %v7784_v13  ;;  %v7796_v2 = vperm.slane %v6602_v3, 6 }
 0x2f9   : > { %v1405_v43 = vpop.f32.mrf.mxu2  ;;  %v1454_v38 = vpop.f32.mrf.mxu3  ;;  %v2526_v41 = vunpack.c.l.b16 %v1746_v1  ;;  %v2527_v4 = vunpack.c.h.b16 %v1746_v1 }
 0x2fa   : > { %v1406_v50 = vadd.f32 %v1405_v43, %v7341_v16  ;;  %v1455_v35 = vadd.f32 %v1454_v38, %v7344_v17  ;;  %v1486_v33 = vpop.f32.mrf.mxu0  ;;  %v1535_v56 = vpop.f32.mrf.mxu1  ;;  %v7786_v16 = vpack.c.b16 %v1918_v36, %v1914_v6  ;;  %v1925_v6 = vunpack.c.h.b16 %v7657_v59  ;;  %v6410_v59 = vld [vmem:[%s9045_s0 + $0xa0] sm:$0xff] }
 0x2fb   : > { %v1487_v63 = vadd.f32 %v1486_v33, %v7589_v26  ;;  %v1536_v62 = vadd.f32 %v1535_v56, %v7592_v51  ;;  %v7780_v29 = vpack.c.b16 %v2526_v41, %v2524_v24  ;;  %v7782_v14 = vpack.c.b16 %v2527_v4, %v2525_v0  ;;  %v6411_v4 = vld [vmem:[%s9045_s0 + $0xa8] sm:$0xff] }
 0x2fc   : > { %v1711_v28 = vmax.f32 %v1406_v50, 0.0  ;;  %v1712_v53 = vmax.f32 %v1455_v35, 0.0  ;;  %2868 = vmatpush.bf16.msrb.mxu1 %v6411_v4  ;;  %v1921_v35 = vunpack.c.h.b16 %v7190_v23  ;;  %v1926_v56 = vunpack.c.l.b16 %v7694_v9 }
 0x2fd   : > { %v1664_v17 = vmax.f32 %v1487_v63, 0.0  ;;  %v1665_v27 = vmax.f32 %v1536_v62, 0.0  ;;  %2243 = vmatmul.bf16.gmra.mxu3 %v1972_v15  ;;  %2277 = vmatmul.bf16.gmra.mxu0 %v1961_v49  ;;  %v6419_v49 = vld [vmem:[%s9045_s0 + $0xe8] sm:$0xff]  ;;  %v6428_v15 = vld [vmem:[%s9002_s7 + $0x30] sm:$0xff]  ;;  %v1922_v23 = vunpack.c.l.b16 %v7689_v60 }
 0x2fe   : > { %v7788_v48 = vpack.c.bf16 %v1712_v53, %v1711_v28  ;;  %2326 = vmatmul.bf16.gmra.mxu1 %v7786_v16  ;;  %2355 = vmatmul.bf16.vlgmr.msrb.gmra.mxu2 %v7388_v22  ;;  %v6402_v28 = vld [vmem:[%s9045_s0 + $0x60] sm:$0xff] }
 0x2ff   : > { %v1750_v12 = vpack.c.bf16 %v1665_v27, %v1664_v17  ;;  %2917 = vmatpush.bf16.msra.mxu2 %v6419_v49  ;;  %3241 = vmatpush.bf16.msra.mxu3 %v6428_v15  ;;  %v6408_v15 = vld [vmem:[%s9045_s0 + $0x90] sm:$0xff] }
 0x300   : > { %v1943_v1 = vunpack.c.h.b16 %v7788_v48  ;;  %2820 = vmatpush.bf16.msrb.mxu0 %v6402_v28  ;;  %2869 = vmatpush.bf16.msrb.mxu1 %v6410_v59 }
 0x301   : > { %v1564_v57 = vpop.f32.mrf.mxu2  ;;  %v7810_v43 = vpop.f32.mrf.mxu3  ;;  %v2528_v63 = vunpack.c.l.b16 %v1750_v12  ;;  %v2529_v27 = vunpack.c.h.b16 %v1750_v12 }
 0x302   : > { %v1488_v40 = vpop.f32.mrf.mxu0  ;;  %v1537_v36 = vpop.f32.mrf.mxu1  ;;  %v7805_v21 = vpack.c.b16 %v1943_v1, %v1939_v7  ;;  %v1565_v0 = vadd.f32 %v1564_v57, %v7796_v2  ;;  %v1965_v1 = vpack.c.b16 %v1925_v6, %v1921_v35 }
 0x303   : > { %v1489_v54 = vadd.f32 %v1488_v40, %v7589_v26  ;;  %v1538_v24 = vadd.f32 %v1537_v36, %v7592_v51 }
 0x304   : > { %v1610_v33 = vmax.f32 %v1565_v0, 0.0  ;;  %v6401_v0 = vld [vmem:[%s9045_s0 + $0x58] sm:$0xff] }
 0x305   : > { %v1671_v38 = vmax.f32 %v1489_v54, 0.0  ;;  %v1672_v41 = vmax.f32 %v1538_v24, 0.0  ;;  %v7833_v54 = vpack.c.b16 %v1926_v56, %v1922_v23  ;;  %2821 = vmatpush.bf16.msrb.mxu0 %v6401_v0  ;;  %v6400_v56 = vld [vmem:[%s9045_s0 + $0x50] sm:$0xff] }
 0x306   : > { %v1719_v40 = vpack.c.bf16 %v1610_v33, %v1610_v33  ;;  %v6418_v33 = vld [vmem:[%s9045_s0 + $0xe0] sm:$0xff] }
 0x307   : > { %v1754_v50 = vpack.c.bf16 %v1672_v41, %v1671_v38  ;;  %v6409_v38 = vld [vmem:[%s9045_s0 + $0x98] sm:$0xff]  ;;  %2918 = vmatpush.bf16.msra.mxu2 %v6418_v33 }
 0x308   : > { %2870 = vmatpush.bf16.msrb.mxu1 %v6409_v38 }
 0x309   : > { %v1566_v62 = vpop.f32.mrf.mxu2  ;;  %v2530_v53 = vunpack.c.l.b16 %v1754_v50  ;;  %v2531_v17 = vunpack.c.h.b16 %v1754_v50  ;;  %v7846_v4 = vpop.f32.mrf.mxu3  ;;  %v3064_v50 = vunpack.c.l.b16 %v1719_v40  ;;  %2822 = vmatpush.bf16.msrb.mxu0 %v6400_v56  ;;  %v1934_v40 = vunpack.c.l.b16 %v7743_v32 }
 0x30a   : > { %v1567_v9 = vadd.f32 %v1566_v62, %v7796_v2  ;;  %v1491_v7 = vpop.f32.mrf.mxu0  ;;  %v1540_v3 = vpop.f32.mrf.mxu1 }
 0x30b   : > { %v1492_v57 = vadd.f32 %v1491_v7, %v7589_v26  ;;  %v1541_v49 = vadd.f32 %v1540_v3, %v7592_v51  ;;  %v7831_v45 = vpack.c.b16 %v2530_v53, %v2528_v63  ;;  %v7835_v60 = vpack.c.b16 %v2531_v17, %v2529_v27  ;;  %v6407_v7 = vld [vmem:[%s9045_s0 + $0x88] sm:$0xff] }
 0x30c   : > { %v1617_v36 = vmax.f32 %v1567_v9, 0.0  ;;  %2871 = vmatpush.bf16.msrb.mxu1 %v6408_v15  ;;  %v6399_v9 = vld [vmem:[%s9045_s0 + $0x48] sm:$0xff]  ;;  %v1933_v3 = vunpack.c.h.b16 %v7699_v18  ;;  %v6398_v18 = vld [vmem:[%s9045_s0 + $0x40] sm:$0xff] }
 0x30d   : > { %v1678_v12 = vmax.f32 %v1492_v57, 0.0  ;;  %v1679_v24 = vmax.f32 %v1541_v49, 0.0  ;;  %2282 = vmatmul.bf16.gmra.mxu0 %v1965_v1  ;;  %2776 = vmatmul.bf16.vlgmr.msrb.gmra.mxu3 %v7605_v61  ;;  %v1929_v57 = vunpack.c.h.b16 %v7215_v44  ;;  %v6406_v44 = vld [vmem:[%s9045_s0 + $0x80] sm:$0xff] }
 0x30e   : > { %v1723_v41 = vpack.c.bf16 %v1617_v36, %v1617_v36  ;;  %2331 = vmatmul.bf16.gmra.mxu1 %v7833_v54  ;;  %2360 = vmatmul.bf16.gmra.mxu2 %v7426_v42  ;;  %v6427_v36 = vld [vmem:[%s9002_s7 + $0x28] sm:$0xff] }
 0x30f   : > { %v1758_v6 = vpack.c.bf16 %v1679_v24, %v1678_v12  ;;  %2823 = vmatpush.bf16.msrb.mxu0 %v6399_v9  ;;  %3242 = vmatpush.bf16.msra.mxu3 %v6427_v36 }
 0x310   : > { %v3065_v61 = vunpack.c.l.b16 %v1723_v41  ;;  %2872 = vmatpush.bf16.msrb.mxu1 %v6407_v7 }
 0x311   : > { %v1569_v35 = vpop.f32.mrf.mxu2  ;;  %v2532_v12 = vunpack.c.l.b16 %v1758_v6  ;;  %v2533_v24 = vunpack.c.h.b16 %v1758_v6  ;;  %v7874_v0 = vpop.f32.mrf.mxu3  ;;  %v1969_v6 = vpack.c.b16 %v1933_v3, %v1929_v57 }
 0x312   : > { %v7857_v63 = vpack.c.b16 %v3065_v61, %v3064_v50  ;;  %v1493_v62 = vpop.f32.mrf.mxu0  ;;  %v1542_v28 = vpop.f32.mrf.mxu1  ;;  %v1570_v17 = vadd.f32 %v1569_v35, %v7796_v2  ;;  %v1930_v50 = vunpack.c.l.b16 %v7739_v55 }
 0x313   : > { %v1494_v59 = vadd.f32 %v1493_v62, %v7589_v26  ;;  %v1543_v53 = vadd.f32 %v1542_v28, %v7592_v51  ;;  %2824 = vmatpush.bf16.msrb.mxu0 %v6398_v18 }
 0x314   : > { %v1624_v49 = vmax.f32 %v1570_v17, 0.0  ;;  %v7890_v17 = vpack.c.b16 %v1934_v40, %v1930_v50  ;;  %2873 = vmatpush.bf16.msrb.mxu1 %v6406_v44  ;;  %v1937_v50 = vunpack.c.h.b16 %v7320_v8 }
 0x315   : > { %v1685_v23 = vmax.f32 %v1494_v59, 0.0  ;;  %v1686_v27 = vmax.f32 %v1543_v53, 0.0 }
 0x316   : > { %v1727_v59 = vpack.c.bf16 %v1624_v49, %v1624_v49 }
 0x317   : > { %v1762_v1 = vpack.c.bf16 %v1686_v27, %v1685_v23 }
 0x318   : > { %v3066_v7 = vunpack.c.l.b16 %v1727_v59 }
 0x319   : > { %v1571_v38 = vpop.f32.mrf.mxu2  ;;  %v2534_v41 = vunpack.c.l.b16 %v1762_v1  ;;  %v2535_v32 = vunpack.c.h.b16 %v1762_v1  ;;  %v6417_v1 = vld [vmem:[%s9045_s0 + $0xd8] sm:$0xff] }
 0x31a   : > { %v1572_v61 = vadd.f32 %v1571_v38, %v7796_v2  ;;  %v1496_v35 = vpop.f32.mrf.mxu0  ;;  %v1545_v33 = vpop.f32.mrf.mxu1  ;;  %2919 = vmatpush.bf16.msra.mxu2 %v6417_v1 }
 0x31b   : > { %v1497_v56 = vadd.f32 %v1496_v35, %v7589_v26  ;;  %v1546_v15 = vadd.f32 %v1545_v33, %v7592_v51  ;;  %v7886_v62 = vpack.c.b16 %v2534_v41, %v2532_v12  ;;  %v7888_v28 = vpack.c.b16 %v2535_v32, %v2533_v24  ;;  %v7902_v24 = vpop.f32.mrf.mxu3  ;;  %v6426_v33 = vld [vmem:[%s9002_s7 + $0x20] sm:$0xff] }
 0x31c   : > { %v1631_v53 = vmax.f32 %v1572_v61, 0.0  ;;  %v1941_v41 = vunpack.c.h.b16 %v7750_v31  ;;  %v1942_v35 = vunpack.c.l.b16 %v7788_v48  ;;  %3243 = vmatpush.bf16.msra.mxu3 %v6426_v33 }
 0x31d   : > { %v1692_v55 = vmax.f32 %v1497_v56, 0.0  ;;  %v1693_v23 = vmax.f32 %v1546_v15, 0.0  ;;  %2287 = vmatmul.bf16.gmra.mxu0 %v1969_v6  ;;  %2781 = vmatmul.bf16.gmra.mxu3 %v7649_v52 }
 0x31e   : > { %v1731_v27 = vpack.c.bf16 %v1631_v53, %v1631_v53  ;;  %2336 = vmatmul.bf16.gmra.mxu1 %v7890_v17  ;;  %2365 = vmatmul.bf16.gmra.mxu2 %v7465_v39 }
 0x31f   : > { %v1766_v9 = vpack.c.bf16 %v1693_v23, %v1692_v55  ;;  %v1938_v55 = vunpack.c.l.b16 %v7784_v13 }
 0x320   : > { %v3067_v3 = vunpack.c.l.b16 %v1731_v27 }
 0x321   : > { %v1574_v57 = vpop.f32.mrf.mxu2  ;;  %v2536_v6 = vunpack.c.l.b16 %v1766_v9  ;;  %v2537_v56 = vunpack.c.h.b16 %v1766_v9 }
 0x322   : > { %v1498_v49 = vpop.f32.mrf.mxu0  ;;  %v1547_v40 = vpop.f32.mrf.mxu1  ;;  %v7898_v36 = vpack.c.b16 %v3067_v3, %v3066_v7  ;;  %v1575_v38 = vadd.f32 %v1574_v57, %v7796_v2  ;;  %v1973_v7 = vpack.c.b16 %v1941_v41, %v1937_v50  ;;  %v6416_v41 = vld [vmem:[%s9045_s0 + $0xd0] sm:$0xff] }
 0x323   : > { %v1499_v52 = vadd.f32 %v1498_v49, %v7589_v26  ;;  %v1548_v12 = vadd.f32 %v1547_v40, %v7592_v51  ;;  %v7919_v49 = vpack.c.b16 %v1942_v35, %v1938_v55  ;;  %2920 = vmatpush.bf16.msra.mxu2 %v6416_v41 }
 0x324   : > { %v1638_v61 = vmax.f32 %v1575_v38, 0.0 }
 0x325   : > { %v1699_v18 = vmax.f32 %v1499_v52, 0.0  ;;  %v1700_v44 = vmax.f32 %v1548_v12, 0.0  ;;  %v7922_v52 = vpop.f32.mrf.mxu3 }
 0x326   : > { %v1735_v9 = vpack.c.bf16 %v1638_v61, %v1638_v61 }
 0x327   : > { %v1770_v32 = vpack.c.bf16 %v1700_v44, %v1699_v18 }
 0x328   : > { %v3068_v18 = vunpack.c.l.b16 %v1735_v9 }
 0x329   : > { %v1576_v15 = vpop.f32.mrf.mxu2  ;;  %v2538_v59 = vunpack.c.l.b16 %v1770_v32  ;;  %v2539_v53 = vunpack.c.h.b16 %v1770_v32 }
 0x32a   : > { %v1577_v23 = vadd.f32 %v1576_v15, %v7796_v2  ;;  %v1501_v31 = vpop.f32.mrf.mxu0  ;;  %v1550_v27 = vpop.f32.mrf.mxu1 }
 0x32b   : > { %v1502_v8 = vadd.f32 %v1501_v31, %v7589_v26  ;;  %v1551_v48 = vadd.f32 %v1550_v27, %v7592_v51  ;;  %v7915_v3 = vpack.c.b16 %v2538_v59, %v2536_v6  ;;  %v7917_v1 = vpack.c.b16 %v2539_v53, %v2537_v56  ;;  %v7936_v6 = vld [vmem:[%s9046_s4] ss:$0 sm:$0xff] }
 0x32c   : > { %v1645_v57 = vmax.f32 %v1577_v23, 0.0  ;;  %v2210_v55 = vadd.f32 %v7936_v6, %v7810_v43 }
 0x32d   : > { %v1706_v40 = vmax.f32 %v1502_v8, 0.0  ;;  %v1707_v13 = vmax.f32 %v1551_v48, 0.0  ;;  %2292 = vmatmul.bf16.gmra.mxu0 %v1973_v7  ;;  %2786 = vmatmul.bf16.gmra.mxu3 %v7691_v19  ;;  %v7941_v23 = vpop.f32.mrf.mxu3 }
 0x32e   : > { %v1739_v12 = vpack.c.bf16 %v1645_v57, %v1645_v57  ;;  %2341 = vmatmul.bf16.gmra.mxu1 %v7919_v49  ;;  %2370 = vmatmul.bf16.gmra.mxu2 %v7622_v37 }
 0x32f   : > { %v1774_v38 = vpack.c.bf16 %v1707_v13, %v1706_v40 }
 0x330   : > { %v3069_v44 = vunpack.c.l.b16 %v1739_v12 }
 0x331   : > { %v1579_v32 = vpop.f32.mrf.mxu2  ;;  %v2541_v27 = vunpack.c.h.b16 %v1774_v38 }
 0x332   : > { %v1503_v50 = vpop.f32.mrf.mxu0  ;;  %v1552_v61 = vpop.f32.mrf.mxu1  ;;  %v7929_v35 = vpack.c.b16 %v3069_v44, %v3068_v18  ;;  %v1580_v56 = vadd.f32 %v1579_v32, %v7796_v2 }
 0x333   : > { %v1504_v19 = vadd.f32 %v1503_v50, %v7589_v26  ;;  %v1553_v33 = vadd.f32 %v1552_v61, %v7592_v51  ;;  %v6425_v26 = vld [vmem:[%s9002_s7 + $0x18] sm:$0xff]  ;;  %v2540_v51 = vunpack.c.l.b16 %v1774_v38 }
 0x334   : > { %v1652_v31 = vmax.f32 %v1580_v56, 0.0  ;;  %3244 = vmatpush.bf16.msra.mxu3 %v6425_v26 }
 0x335   : > { %v1713_v15 = vmax.f32 %v1504_v19, 0.0  ;;  %v1714_v59 = vmax.f32 %v1553_v33, 0.0  ;;  %v6415_v19 = vld [vmem:[%s9045_s0 + $0xc8] sm:$0xff]  ;;  %v2212_v33 = vadd.f32 %v7936_v6, %v7846_v4  ;;  %v2215_v4 = vadd.f32 %v7936_v6, %v7874_v0 }
 0x336   : > { %v1743_v18 = vpack.c.bf16 %v1652_v31, %v1652_v31  ;;  %2921 = vmatpush.bf16.msra.mxu2 %v6415_v19 }
 0x337   : > { %v1778_v53 = vpack.c.bf16 %v1714_v59, %v1713_v15 }
 0x338   : > { %v3070_v32 = vunpack.c.l.b16 %v1743_v18 }
 0x339   : > { %v1581_v7 = vpop.f32.mrf.mxu2  ;;  %v2542_v8 = vunpack.c.l.b16 %v1778_v53  ;;  %v2543_v48 = vunpack.c.h.b16 %v1778_v53 }
 0x33a   : > { %v1582_v9 = vadd.f32 %v1581_v7, %v7796_v2  ;;  %v2258_v57 = vpop.f32.mrf.mxu0 }
 0x33b   : > { %v2259_v40 = vadd.f32 %v2258_v57, %v2210_v55  ;;  %v2307_v13 = vpop.f32.mrf.mxu1  ;;  %v7947_v12 = vpack.c.b16 %v2542_v8, %v2540_v51  ;;  %v7949_v43 = vpack.c.b16 %v2543_v48, %v2541_v27  ;;  %v6424_v51 = vld [vmem:[%s9002_s7 + $0x10] sm:$0xff] }
 0x33c   : > { %v1659_v44 = vmax.f32 %v1582_v9, 0.0  ;;  %3245 = vmatpush.bf16.msra.mxu3 %v6424_v51 }
 0x33d   : > { %v7951_v41 = vadd.f32 %v2307_v13, %v2259_v40  ;;  %2791 = vmatmul.bf16.gmra.mxu3 %v7741_v5  ;;  %2825 = vmatmul.bf16.vlgmr.msrb.gmra.mxu0 %v7388_v22 }
 0x33e   : > { %v1747_v38 = vpack.c.bf16 %v1659_v44, %v1659_v44  ;;  %2375 = vmatmul.bf16.gmra.mxu2 %v7664_v11  ;;  %2874 = vmatmul.bf16.vlgmr.msrb.gmra.mxu1 %v7641_v10 }
 0x340   : > { %v3071_v50 = vunpack.c.l.b16 %v1747_v38  ;;  %v7957_v61 = vpop.f32.mrf.mxu3 }
 0x341   : > { %v1584_v56 = vpop.f32.mrf.mxu2 }
 0x342   : > { %v2260_v5 = vpop.f32.mrf.mxu0  ;;  %v7964_v22 = vpack.c.b16 %v3071_v50, %v3070_v32  ;;  %v1585_v53 = vadd.f32 %v1584_v56, %v7796_v2  ;;  %v6414_v32 = vld [vmem:[%s9045_s0 + $0xc0] sm:$0xff]  ;;  %v2217_v50 = vadd.f32 %v7936_v6, %v7902_v24  ;;  %v2220_v24 = vadd.f32 %v7936_v6, %v7922_v52 }
 0x343   : > { %v2261_v15 = vadd.f32 %v2260_v5, %v2212_v33  ;;  %v2309_v59 = vpop.f32.mrf.mxu1  ;;  %2922 = vmatpush.bf16.msra.mxu2 %v6414_v32 }
 0x344   : > { %v1666_v31 = vmax.f32 %v1585_v53, 0.0 }
 0x345   : > { %v7967_v55 = vadd.f32 %v2309_v59, %v2261_v15 }
 0x346   : > { %v1751_v57 = vpack.c.bf16 %v1666_v31, %v1666_v31  ;;  %v6423_v31 = vld [vmem:[%s9002_s7 + $0x8] sm:$0xff] }
 0x347   : > { %3246 = vmatpush.bf16.msra.mxu3 %v6423_v31  ;;  %v6445_v31 = vld [vmem:[%s9002_s7 + $0xb8] sm:$0xff] }
 0x348   : > { %v7969_v26 = vpop.f32.mrf.mxu3  ;;  %v3072_v0 = vunpack.c.l.b16 %v1751_v57  ;;  %3338 = vmatpush.bf16.msra.mxu1 %v6445_v31  ;;  %v6436_v31 = vld [vmem:[%s9002_s7 + $0x70] sm:$0xff] }
 0x349   : > { %v1586_v27 = vpop.f32.mrf.mxu2 }
 0x34a   : > { %v1587_v7 = vadd.f32 %v1586_v27, %v7796_v2  ;;  %v2263_v8 = vpop.f32.mrf.mxu0 }
 0x34b   : > { %v2264_v48 = vadd.f32 %v2263_v8, %v2215_v4  ;;  %v2312_v9 = vpop.f32.mrf.mxu1 }
 0x34c   : > { %v1673_v40 = vmax.f32 %v1587_v7, 0.0 }
 0x34d   : > { %v7977_v13 = vadd.f32 %v2312_v9, %v2264_v48  ;;  %2796 = vmatmul.bf16.gmra.mxu3 %v7786_v16  ;;  %2830 = vmatmul.bf16.gmra.mxu0 %v7426_v42 }
 0x34e   : > { %v1755_v18 = vpack.c.bf16 %v1673_v40, %v1673_v40  ;;  %2380 = vmatmul.bf16.gmra.mxu2 %v7709_v30  ;;  %2879 = vmatmul.bf16.gmra.mxu1 %v7685_v46 }
 0x350   : > { %v3073_v44 = vunpack.c.l.b16 %v1755_v18  ;;  %v7983_v38 = vpop.f32.mrf.mxu3 }
 0x351   : > { %v1589_v19 = vpop.f32.mrf.mxu2 }
 0x352   : > { %v2265_v16 = vpop.f32.mrf.mxu0  ;;  %v7990_v42 = vpack.c.b16 %v3073_v44, %v3072_v0  ;;  %v1590_v5 = vadd.f32 %v1589_v19, %v7796_v2  ;;  %v2222_v44 = vadd.f32 %v7936_v6, %v7941_v23  ;;  %v6422_v23 = vld [vmem:[%s9002_s7] sm:$0xff] }
 0x353   : > { %v2266_v33 = vadd.f32 %v2265_v16, %v2217_v50  ;;  %v2314_v56 = vpop.f32.mrf.mxu1  ;;  %3247 = vmatpush.bf16.msra.mxu3 %v6422_v23 }
 0x354   : > { %v1680_v59 = vmax.f32 %v1590_v5, 0.0 }
 0x355   : > { %v7993_v15 = vadd.f32 %v2314_v56, %v2266_v33 }
 0x356   : > { %v1759_v48 = vpack.c.bf16 %v1680_v59, %v1680_v59  ;;  %v6437_v59 = vld [vmem:[%s9002_s7 + $0x78] sm:$0xff] }
 0x357   : > { %3289 = vmatpush.bf16.msra.mxu0 %v6437_v59 }
 0x358   : > { %v7995_v53 = vpop.f32.mrf.mxu3  ;;  %v3074_v52 = vunpack.c.l.b16 %v1759_v48 }
 0x359   : > { %v1591_v51 = vpop.f32.mrf.mxu2 }
 0x35a   : > { %v1592_v4 = vadd.f32 %v1591_v51, %v7796_v2  ;;  %v2268_v27 = vpop.f32.mrf.mxu0 }
 0x35b   : > { %v2269_v7 = vadd.f32 %v2268_v27, %v2220_v24  ;;  %v2317_v8 = vpop.f32.mrf.mxu1  ;;  %v2225_v24 = vadd.f32 %v7936_v6, %v7957_v61  ;;  %3290 = vmatpush.bf16.msra.mxu0 %v6436_v31 }
 0x35c   : > { %v1687_v9 = vmax.f32 %v1592_v4, 0.0 }
 0x35d   : > { %v8003_v57 = vadd.f32 %v2317_v8, %v2269_v7  ;;  %2801 = vmatmul.bf16.gmra.mxu3 %v7833_v54  ;;  %2835 = vmatmul.bf16.gmra.mxu0 %v7465_v39 }
 0x35e   : > { %v1763_v40 = vpack.c.bf16 %v1687_v9, %v1687_v9  ;;  %2385 = vmatmul.bf16.gmra.mxu2 %v7758_v58  ;;  %2884 = vmatmul.bf16.gmra.mxu1 %v7735_v34 }
 0x360   : > { %v3075_v18 = vunpack.c.l.b16 %v1763_v40  ;;  %v8009_v0 = vpop.f32.mrf.mxu3 }
 0x361   : > { %v1594_v32 = vpop.f32.mrf.mxu2 }
 0x362   : > { %v2270_v50 = vpop.f32.mrf.mxu0  ;;  %v8013_v19 = vpack.c.b16 %v3075_v18, %v3074_v52  ;;  %v1595_v39 = vadd.f32 %v1594_v32, %v7796_v2  ;;  %v2227_v32 = vadd.f32 %v7936_v6, %v7969_v26  ;;  %v6453_v26 = vld [vmem:[%s9004_s9 + $0x38] sm:$0xff] }
 0x363   : > { %v2271_v16 = vadd.f32 %v2270_v50, %v2222_v44  ;;  %v2319_v54 = vpop.f32.mrf.mxu1  ;;  %3695 = vmatpush.bf16.msrb.mxu2 %v6453_v26  ;;  %v6435_v26 = vld [vmem:[%s9002_s7 + $0x68] sm:$0xff] }
 0x364   : > { %v1694_v56 = vmax.f32 %v1595_v39, 0.0  ;;  %3291 = vmatpush.bf16.msra.mxu0 %v6435_v26  ;;  %v6440_v26 = vld [vmem:[%s9002_s7 + $0x90] sm:$0xff] }
 0x365   : > { %v8016_v33 = vadd.f32 %v2319_v54, %v2271_v16 }
 0x366   : > { %v1767_v48 = vpack.c.bf16 %v1694_v56, %v1694_v56 }
 0x368   : > { %v8018_v5 = vpop.f32.mrf.mxu3  ;;  %v3076_v61 = vunpack.c.l.b16 %v1767_v48 }
 0x369   : > { %v1596_v51 = vpop.f32.mrf.mxu2 }
 0x36a   : > { %v1597_v4 = vadd.f32 %v1596_v51, %v7796_v2  ;;  %v2273_v27 = vpop.f32.mrf.mxu0  ;;  %v2230_v51 = vadd.f32 %v7936_v6, %v7983_v38 }
 0x36b   : > { %v2274_v7 = vadd.f32 %v2273_v27, %v2225_v24  ;;  %v2322_v8 = vpop.f32.mrf.mxu1  ;;  %v6444_v24 = vld [vmem:[%s9002_s7 + $0xb0] sm:$0xff]  ;;  %v6461_v27 = vld [vmem:[%s9004_s9 + $0x78] sm:$0xff] }
 0x36c   : > { %v1701_v9 = vmax.f32 %v1597_v4, 0.0  ;;  %3339 = vmatpush.bf16.msra.mxu1 %v6444_v24  ;;  %3744 = vmatpush.bf16.msrb.mxu3 %v6461_v27  ;;  %v6443_v24 = vld [vmem:[%s9002_s7 + $0xa8] sm:$0xff]  ;;  %v2235_v27 = vadd.f32 %v7936_v6, %v8009_v0 }
 0x36d   : > { %v8032_v40 = vadd.f32 %v2322_v8, %v2274_v7  ;;  %2806 = vmatmul.bf16.gmra.mxu3 %v7890_v17  ;;  %2840 = vmatmul.bf16.gmra.mxu0 %v7622_v37 }
 0x36e   : > { %v1771_v52 = vpack.c.bf16 %v1701_v9, %v1701_v9  ;;  %2390 = vmatmul.bf16.gmra.mxu2 %v7805_v21  ;;  %2889 = vmatmul.bf16.gmra.mxu1 %v7780_v29 }
 0x370   : > { %v3077_v18 = vunpack.c.l.b16 %v1771_v52  ;;  %v8038_v44 = vpop.f32.mrf.mxu3  ;;  %3340 = vmatpush.bf16.msra.mxu1 %v6443_v24 }
 0x371   : > { %v1599_v50 = vpop.f32.mrf.mxu2 }
 0x372   : > { %v2275_v16 = vpop.f32.mrf.mxu0  ;;  %v8042_v54 = vpack.c.b16 %v3077_v18, %v3076_v61  ;;  %v1600_v37 = vadd.f32 %v1599_v50, %v7796_v2 }
 0x373   : > { %v2276_v39 = vadd.f32 %v2275_v16, %v2227_v32  ;;  %v2324_v17 = vpop.f32.mrf.mxu1  ;;  %v2232_v16 = vadd.f32 %v7936_v6, %v7995_v53 }
 0x374   : > { %v1708_v59 = vmax.f32 %v1600_v37, 0.0 }
 0x375   : > { %v8045_v56 = vadd.f32 %v2324_v17, %v2276_v39 }
 0x376   : > { %v1775_v52 = vpack.c.bf16 %v1708_v59, %v1708_v59 }
 0x378   : > { %v8047_v23 = vpop.f32.mrf.mxu3 }
 0x379   : > { %v1601_v4 = vpop.f32.mrf.mxu2 }
 0x37a   : > { %v1602_v7 = vadd.f32 %v1601_v4, %v7796_v2  ;;  %v2278_v8 = vpop.f32.mrf.mxu0  ;;  %v3078_v2 = vunpack.c.l.b16 %v1775_v52  ;;  %v6460_v4 = vld [vmem:[%s9004_s9 + $0x70] sm:$0xff] }
 0x37b   : > { %v2279_v48 = vadd.f32 %v2278_v8, %v2230_v51  ;;  %v2327_v9 = vpop.f32.mrf.mxu1  ;;  %v6434_v8 = vld [vmem:[%s9002_s7 + $0x60] sm:$0xff]  ;;  %3745 = vmatpush.bf16.msrb.mxu3 %v6460_v4 }
 0x37c   : > { %v1715_v61 = vmax.f32 %v1602_v7, 0.0  ;;  %3292 = vmatpush.bf16.msra.mxu0 %v6434_v8  ;;  %v6439_v8 = vld [vmem:[%s9002_s7 + $0x88] sm:$0xff] }
 0x37d   : > { %v8064_v18 = vadd.f32 %v2327_v9, %v2279_v48  ;;  %2811 = vmatmul.bf16.gmra.mxu3 %v7919_v49  ;;  %2845 = vmatmul.bf16.gmra.mxu0 %v7664_v11  ;;  %v6442_v48 = vld [vmem:[%s9002_s7 + $0xa0] sm:$0xff] }
 0x37e   : > { %v1779_v38 = vpack.c.bf16 %v1715_v61, %v1715_v61  ;;  %2894 = vmatmul.bf16.gmra.mxu1 %v7831_v45  ;;  %2923 = vmatmul.bf16.vlgmr.msra.gmra.mxu2 %v7643_v20 }
 0x37f   : > { %3341 = vmatpush.bf16.msra.mxu1 %v6442_v48 }
 0x380   : > { %v3079_v32 = vunpack.c.l.b16 %v1779_v38  ;;  %v8070_v50 = vpop.f32.mrf.mxu3 }
 0x381   : > { %v2356_v39 = vpop.f32.mrf.mxu2 }
 0x382   : > { %v2357_v17 = vadd.f32 %v2356_v39, %v7951_v41  ;;  %v2280_v37 = vpop.f32.mrf.mxu0  ;;  %v8075_v59 = vpack.c.b16 %v3079_v32, %v3078_v2  ;;  %v6452_v41 = vld [vmem:[%s9004_s9 + $0x30] sm:$0xff] }
 0x383   : > { %v2281_v49 = vadd.f32 %v2280_v37, %v2232_v16  ;;  %v2329_v11 = vpop.f32.mrf.mxu1  ;;  %3696 = vmatpush.bf16.msrb.mxu2 %v6452_v41  ;;  %v6433_v16 = vld [vmem:[%s9002_s7 + $0x58] sm:$0xff] }
 0x384   : > { %v2396_v53 = vmax.f32 %v2357_v17, 0.0  ;;  %3293 = vmatpush.bf16.msra.mxu0 %v6433_v16 }
 0x385   : > { %v8077_v31 = vadd.f32 %v2329_v11, %v2281_v49  ;;  %v6432_v11 = vld [vmem:[%s9002_s7 + $0x50] sm:$0xff] }
 0x386   : > { %v2412_v2 = vpack.c.bf16 %v2396_v53, %v2396_v53 }
 0x388   : > { %v8085_v51 = vpop.f32.mrf.mxu3  ;;  %v3435_v17 = vunpack.c.l.b16 %v2412_v2  ;;  %3294 = vmatpush.bf16.msra.mxu0 %v6432_v11  ;;  %v6430_v2 = vld [vmem:[%s9002_s7 + $0x40] sm:$0xff] }
 0x389   : > { %v2358_v7 = vpop.f32.mrf.mxu2 }
 0x38a   : > { %v2359_v9 = vadd.f32 %v2358_v7, %v7967_v55  ;;  %v2283_v52 = vpop.f32.mrf.mxu0  ;;  %v6441_v55 = vld [vmem:[%s9002_s7 + $0x98] sm:$0xff] }
 0x38b   : > { %v2284_v61 = vadd.f32 %v2283_v52, %v2235_v27  ;;  %v2332_v38 = vpop.f32.mrf.mxu1  ;;  %3342 = vmatpush.bf16.msra.mxu1 %v6441_v55  ;;  %v6459_v52 = vld [vmem:[%s9004_s9 + $0x68] sm:$0xff] }
 0x38c   : > { %v2397_v0 = vmax.f32 %v2359_v9, 0.0  ;;  %3746 = vmatpush.bf16.msrb.mxu3 %v6459_v52  ;;  %v6450_v52 = vld [vmem:[%s9004_s9 + $0x20] sm:$0xff] }
 0x38d   : > { %v8102_v32 = vadd.f32 %v2332_v38, %v2284_v61  ;;  %2850 = vmatmul.bf16.gmra.mxu0 %v7709_v30  ;;  %3248 = vmatmul.bf16.vlgmr.msra.gmra.mxu3 %v7641_v10  ;;  %v2237_v10 = vadd.f32 %v7936_v6, %v8018_v5  ;;  %v6431_v5 = vld [vmem:[%s9002_s7 + $0x48] sm:$0xff]  ;;  %v2240_v61 = vadd.f32 %v7936_v6, %v8038_v44 }
 0x38e   : > { %v2413_v39 = vpack.c.bf16 %v2397_v0, %v2397_v0  ;;  %2899 = vmatmul.bf16.gmra.mxu1 %v7886_v62  ;;  %2928 = vmatmul.bf16.gmra.mxu2 %v7687_v47  ;;  %v6438_v0 = vld [vmem:[%s9002_s7 + $0x80] sm:$0xff] }
 0x38f   : > { %3343 = vmatpush.bf16.msra.mxu1 %v6440_v26  ;;  %3295 = vmatpush.bf16.msra.mxu0 %v6431_v5 }
 0x390   : > { %v3436_v37 = vunpack.c.l.b16 %v2413_v39  ;;  %v8114_v30 = vpop.f32.mrf.mxu3 }
 0x391   : > { %v2361_v49 = vpop.f32.mrf.mxu2 }
 0x392   : > { %v8124_v24 = vpack.c.b16 %v3436_v37, %v3435_v17  ;;  %v2362_v53 = vadd.f32 %v2361_v49, %v7977_v13  ;;  %v2285_v41 = vpop.f32.mrf.mxu0  ;;  %v6451_v13 = vld [vmem:[%s9004_s9 + $0x28] sm:$0xff] }
 0x393   : > { %v2286_v4 = vadd.f32 %v2285_v41, %v2237_v10  ;;  %v2334_v27 = vpop.f32.mrf.mxu1  ;;  %3344 = vmatpush.bf16.msra.mxu1 %v6439_v8  ;;  %3697 = vmatpush.bf16.msrb.mxu2 %v6451_v13 }
 0x394   : > { %v2398_v48 = vmax.f32 %v2362_v53, 0.0  ;;  %3296 = vmatpush.bf16.msra.mxu0 %v6430_v2  ;;  %v2242_v53 = vadd.f32 %v7936_v6, %v8047_v23  ;;  %v6458_v23 = vld [vmem:[%s9004_s9 + $0x60] sm:$0xff] }
 0x395   : > { %v8127_v7 = vadd.f32 %v2334_v27, %v2286_v4  ;;  %3747 = vmatpush.bf16.msrb.mxu3 %v6458_v23 }
 0x396   : > { %v2414_v37 = vpack.c.bf16 %v2398_v48, %v2398_v48 }
 0x397   : > { %3345 = vmatpush.bf16.msra.mxu1 %v6438_v0  ;;  %3698 = vmatpush.bf16.msrb.mxu2 %v6450_v52 }
 0x398   : > { %v8135_v9 = vpop.f32.mrf.mxu3 }
 0x399   : > { %v2363_v38 = vpop.f32.mrf.mxu2 }
 0x39a   : > { %v2364_v16 = vadd.f32 %v2363_v38, %v7993_v15  ;;  %v2288_v55 = vpop.f32.mrf.mxu0  ;;  %v3437_v15 = vunpack.c.l.b16 %v2414_v37 }
 0x39b   : > { %v2289_v39 = vadd.f32 %v2288_v55, %v2240_v61  ;;  %v2337_v17 = vpop.f32.mrf.mxu1 }
 0x39c   : > { %v2399_v44 = vmax.f32 %v2364_v16, 0.0 }
 0x39d   : > { %v8152_v10 = vadd.f32 %v2337_v17, %v2289_v39  ;;  %2855 = vmatmul.bf16.gmra.mxu0 %v7758_v58  ;;  %3253 = vmatmul.bf16.gmra.mxu3 %v7685_v46 }
 0x39e   : > { %v2415_v49 = vpack.c.bf16 %v2399_v44, %v2399_v44  ;;  %2904 = vmatmul.bf16.gmra.mxu1 %v7915_v3  ;;  %2933 = vmatmul.bf16.gmra.mxu2 %v7737_v25 }
 0x3a0   : > { %v3438_v11 = vunpack.c.l.b16 %v2415_v49  ;;  %v8158_v26 = vpop.f32.mrf.mxu3  ;;  %v2247_v49 = vadd.f32 %v7936_v6, %v8085_v51 }
 0x3a1   : > { %v2366_v41 = vpop.f32.mrf.mxu2 }
 0x3a2   : > { %v2367_v4 = vadd.f32 %v2366_v41, %v8003_v57  ;;  %v2290_v27 = vpop.f32.mrf.mxu0  ;;  %v8163_v5 = vpack.c.b16 %v3438_v11, %v3437_v15  ;;  %v2245_v57 = vadd.f32 %v7936_v6, %v8070_v50  ;;  %v6449_v6 = vld [vmem:[%s9004_s9 + $0x18] sm:$0xff] }
 0x3a3   : > { %v2291_v58 = vadd.f32 %v2290_v27, %v2242_v53  ;;  %v2339_v46 = vpop.f32.mrf.mxu1  ;;  %3699 = vmatpush.bf16.msrb.mxu2 %v6449_v6 }
 0x3a4   : > { %v2400_v48 = vmax.f32 %v2367_v4, 0.0  ;;  %v8194_v4 = vld [vmem:[%s9001_s6] ss:$0 sm:$0xff] }
 0x3a5   : > { %v8165_v8 = vadd.f32 %v2339_v46, %v2291_v58  ;;  %v2778_v51 = vadd.f32 %v8194_v4, %v8114_v30 }
 0x3a6   : > { %v2416_v55 = vpack.c.bf16 %v2400_v48, %v2400_v48 }
 0x3a8   : > { %v8167_v13 = vpop.f32.mrf.mxu3  ;;  %v3439_v50 = vunpack.c.l.b16 %v2416_v55 }
 0x3a9   : > { %v2368_v61 = vpop.f32.mrf.mxu2 }
 0x3aa   : > { %v2369_v38 = vadd.f32 %v2368_v61, %v8016_v33  ;;  %v2293_v2 = vpop.f32.mrf.mxu0 }
 0x3ab   : > { %v2294_v0 = vadd.f32 %v2293_v2, %v2245_v57  ;;  %v2342_v16 = vpop.f32.mrf.mxu1 }
 0x3ac   : > { %v2401_v39 = vmax.f32 %v2369_v38, 0.0 }
 0x3ad   : > { %v8178_v17 = vadd.f32 %v2342_v16, %v2294_v0  ;;  %2860 = vmatmul.bf16.gmra.mxu0 %v7805_v21  ;;  %3258 = vmatmul.bf16.gmra.mxu3 %v7735_v34 }
 0x3ae   : > { %v2417_v37 = vpack.c.bf16 %v2401_v39, %v2401_v39  ;;  %2909 = vmatmul.bf16.gmra.mxu1 %v7947_v12  ;;  %2938 = vmatmul.bf16.gmra.mxu2 %v7782_v14  ;;  %v2780_v39 = vadd.f32 %v8194_v4, %v8135_v9  ;;  %v6456_v9 = vld [vmem:[%s9004_s9 + $0x50] sm:$0xff] }
 0x3b0   : > { %v3440_v33 = vunpack.c.l.b16 %v2417_v37  ;;  %v8184_v44 = vpop.f32.mrf.mxu3 }
 0x3b1   : > { %v2371_v15 = vpop.f32.mrf.mxu2 }
 0x3b2   : > { %v2372_v11 = vadd.f32 %v2371_v15, %v8032_v40  ;;  %v2295_v53 = vpop.f32.mrf.mxu0  ;;  %v8189_v41 = vpack.c.b16 %v3440_v33, %v3439_v50  ;;  %v6457_v40 = vld [vmem:[%s9004_s9 + $0x58] sm:$0xff] }
 0x3b3   : > { %v2296_v21 = vadd.f32 %v2295_v53, %v2247_v49  ;;  %v2344_v34 = vpop.f32.mrf.mxu1  ;;  %3748 = vmatpush.bf16.msrb.mxu3 %v6457_v40 }
 0x3b4   : > { %v2402_v58 = vmax.f32 %v2372_v11, 0.0 }
 0x3b5   : > { %v8196_v27 = vadd.f32 %v2344_v34, %v2296_v21 }
 0x3b6   : > { %v2418_v38 = vpack.c.bf16 %v2402_v58, %v2402_v58 }
 0x3b7   : > { %3749 = vmatpush.bf16.msrb.mxu3 %v6456_v9 }
 0x3b8   : > { %v8198_v46 = vpop.f32.mrf.mxu3  ;;  %v3441_v30 = vunpack.c.l.b16 %v2418_v38 }
 0x3b9   : > { %v2373_v48 = vpop.f32.mrf.mxu2 }
 0x3ba   : > { %v2374_v52 = vadd.f32 %v2373_v48, %v8045_v56  ;;  %v2826_v23 = vpop.f32.mrf.mxu0 }
 0x3bb   : > { %v2827_v57 = vadd.f32 %v2826_v23, %v2778_v51  ;;  %v2875_v61 = vpop.f32.mrf.mxu1 }
 0x3bc   : > { %v2403_v2 = vmax.f32 %v2374_v52, 0.0 }
 0x3bd   : > { %v8209_v0 = vadd.f32 %v2875_v61, %v2827_v57  ;;  %3263 = vmatmul.bf16.gmra.mxu3 %v7780_v29  ;;  %3297 = vmatmul.bf16.vlgmr.msra.gmra.mxu0 %v7643_v20  ;;  %v2785_v61 = vadd.f32 %v8194_v4, %v8167_v13  ;;  %v6455_v13 = vld [vmem:[%s9004_s9 + $0x48] sm:$0xff] }
 0x3be   : > { %v2419_v16 = vpack.c.bf16 %v2403_v2, %v2403_v2  ;;  %2943 = vmatmul.bf16.gmra.mxu2 %v7835_v60  ;;  %3346 = vmatmul.bf16.vlgmr.msra.gmra.mxu1 %v7857_v63  ;;  %v6448_v63 = vld [vmem:[%s9004_s9 + $0x10] sm:$0xff] }
 0x3bf   : > { %3700 = vmatpush.bf16.msrb.mxu2 %v6448_v63  ;;  %3750 = vmatpush.bf16.msrb.mxu3 %v6455_v13 }
 0x3c0   : > { %v3442_v56 = vunpack.c.l.b16 %v2419_v16  ;;  %v8215_v55 = vpop.f32.mrf.mxu3 }
 0x3c1   : > { %v2376_v37 = vpop.f32.mrf.mxu2 }
 0x3c2   : > { %v2377_v50 = vadd.f32 %v2376_v37, %v8064_v18  ;;  %v2828_v33 = vpop.f32.mrf.mxu0  ;;  %v8220_v49 = vpack.c.b16 %v3442_v56, %v3441_v30  ;;  %v2783_v18 = vadd.f32 %v8194_v4, %v8158_v26 }
 0x3c3   : > { %v2829_v29 = vadd.f32 %v2828_v33, %v2780_v39  ;;  %v2877_v20 = vpop.f32.mrf.mxu1  ;;  %v6446_v33 = vld [vmem:[%s9004_s9] sm:$0xff] }
 0x3c4   : > { %v2404_v11 = vmax.f32 %v2377_v50, 0.0 }
 0x3c5   : > { %v8222_v15 = vadd.f32 %v2877_v20, %v2829_v29 }
 0x3c6   : > { %v2420_v51 = vpack.c.bf16 %v2404_v11, %v2404_v11 }
 0x3c8   : > { %v8224_v53 = vpop.f32.mrf.mxu3  ;;  %v3443_v26 = vunpack.c.l.b16 %v2420_v51 }
 0x3c9   : > { %v2378_v21 = vpop.f32.mrf.mxu2 }
 0x3ca   : > { %v2379_v34 = vadd.f32 %v2378_v21, %v8077_v31  ;;  %v2831_v58 = vpop.f32.mrf.mxu0 }
 0x3cb   : > { %v2832_v6 = vadd.f32 %v2831_v58, %v2783_v18  ;;  %v2880_v40 = vpop.f32.mrf.mxu1 }
 0x3cc   : > { %v2405_v48 = vmax.f32 %v2379_v34, 0.0 }
 0x3cd   : > { %v8235_v52 = vadd.f32 %v2880_v40, %v2832_v6  ;;  %3268 = vmatmul.bf16.gmra.mxu3 %v7831_v45  ;;  %3302 = vmatmul.bf16.gmra.mxu0 %v7687_v47  ;;  %v2790_v6 = vadd.f32 %v8194_v4, %v8198_v46  ;;  %v2793_v46 = vadd.f32 %v8194_v4, %v8215_v55 }
 0x3ce   : > { %v2421_v23 = vpack.c.bf16 %v2405_v48, %v2405_v48  ;;  %2948 = vmatmul.bf16.gmra.mxu2 %v7888_v28  ;;  %3351 = vmatmul.bf16.gmra.mxu1 %v7898_v36  ;;  %v6447_v36 = vld [vmem:[%s9004_s9 + $0x8] sm:$0xff] }
 0x3cf   : > { %3701 = vmatpush.bf16.msrb.mxu2 %v6447_v36 }
 0x3d0   : > { %v3444_v31 = vunpack.c.l.b16 %v2421_v23  ;;  %v8241_v57 = vpop.f32.mrf.mxu3 }
 0x3d1   : > { %v2381_v38 = vpop.f32.mrf.mxu2 }
 0x3d2   : > { %v2382_v2 = vadd.f32 %v2381_v38, %v8102_v32  ;;  %v2833_v16 = vpop.f32.mrf.mxu0  ;;  %v8246_v30 = vpack.c.b16 %v3444_v31, %v3443_v26  ;;  %v2788_v32 = vadd.f32 %v8194_v4, %v8184_v44 }
 0x3d3   : > { %v2834_v45 = vadd.f32 %v2833_v16, %v2785_v61  ;;  %v2882_v47 = vpop.f32.mrf.mxu1  ;;  %3702 = vmatpush.bf16.msrb.mxu2 %v6446_v33 }
 0x3d4   : > { %v2406_v39 = vmax.f32 %v2382_v2, 0.0 }
 0x3d5   : > { %v8248_v56 = vadd.f32 %v2882_v47, %v2834_v45 }
 0x3d6   : > { %v2422_v9 = vpack.c.bf16 %v2406_v39, %v2406_v39 }
 0x3d8   : > { %v8253_v37 = vpop.f32.mrf.mxu3  ;;  %v3445_v34 = vunpack.c.l.b16 %v2422_v9 }
 0x3d9   : > { %v2383_v50 = vpop.f32.mrf.mxu2 }
 0x3da   : > { %v2384_v29 = vadd.f32 %v2383_v50, %v8127_v7  ;;  %v2836_v20 = vpop.f32.mrf.mxu0  ;;  %v2795_v50 = vadd.f32 %v8194_v4, %v8224_v53  ;;  %v6493_v53 = vld [vmem:[%s9008_s13 + $0x78] sm:$0xff] }
 0x3db   : > { %v2837_v11 = vadd.f32 %v2836_v20, %v2788_v32  ;;  %v2885_v63 = vpop.f32.mrf.mxu1 }
 0x3dc   : > { %v2407_v18 = vmax.f32 %v2384_v29, 0.0 }
 0x3dd   : > { %v8264_v21 = vadd.f32 %v2885_v63, %v2837_v11  ;;  %3273 = vmatmul.bf16.gmra.mxu3 %v7886_v62  ;;  %3307 = vmatmul.bf16.gmra.mxu0 %v7737_v25 }
 0x3de   : > { %v2423_v44 = vpack.c.bf16 %v2407_v18, %v2407_v18  ;;  %2953 = vmatmul.bf16.gmra.mxu2 %v7917_v1  ;;  %3356 = vmatmul.bf16.gmra.mxu1 %v7929_v35  ;;  %v6454_v35 = vld [vmem:[%s9004_s9 + $0x40] sm:$0xff] }
 0x3df   : > { %3751 = vmatpush.bf16.msrb.mxu3 %v6454_v35 }
 0x3e0   : > { %v3446_v7 = vunpack.c.l.b16 %v2423_v44  ;;  %v8270_v58 = vpop.f32.mrf.mxu3  ;;  %v2798_v44 = vadd.f32 %v8194_v4, %v8241_v57 }
 0x3e1   : > { %v2386_v40 = vpop.f32.mrf.mxu2 }
 0x3e2   : > { %v2387_v51 = vadd.f32 %v2386_v40, %v8152_v10  ;;  %v2838_v48 = vpop.f32.mrf.mxu0  ;;  %v8275_v23 = vpack.c.b16 %v3446_v7, %v3445_v34  ;;  %v6477_v7 = vld [vmem:[%s9006_s11 + $0x78] sm:$0xff] }
 0x3e3   : > { %v2839_v62 = vadd.f32 %v2838_v48, %v2790_v6  ;;  %v2887_v25 = vpop.f32.mrf.mxu1  ;;  %4268 = vmatpush.bf16.msra.mxu3 %v6493_v53  ;;  %4006 = vmatpush.bf16.msrb.mxu1 %v6477_v7 }
 0x3e4   : > { %v2408_v31 = vmax.f32 %v2387_v51, 0.0 }
 0x3e5   : > { %v8277_v26 = vadd.f32 %v2887_v25, %v2839_v62 }
 0x3e6   : > { %v2424_v47 = vpack.c.bf16 %v2408_v31, %v2408_v31 }
 0x3e8   : > { %v8279_v61 = vpop.f32.mrf.mxu3  ;;  %v3447_v55 = vunpack.c.l.b16 %v2424_v47 }
 0x3e9   : > { %v2388_v38 = vpop.f32.mrf.mxu2 }
 0x3ea   : > { %v2389_v10 = vadd.f32 %v2388_v38, %v8165_v8  ;;  %v2841_v2 = vpop.f32.mrf.mxu0  ;;  %v2800_v38 = vadd.f32 %v8194_v4, %v8253_v37  ;;  %v6467_v37 = vld [vmem:[%s9006_s11 + $0x28] sm:$0xff] }
 0x3eb   : > { %v2842_v16 = vadd.f32 %v2841_v2, %v2793_v46  ;;  %v2890_v45 = vpop.f32.mrf.mxu1  ;;  %v6468_v2 = vld [vmem:[%s9006_s11 + $0x30] sm:$0xff] }
 0x3ec   : > { %v2409_v36 = vmax.f32 %v2389_v10, 0.0 }
 0x3ed   : > { %v8287_v39 = vadd.f32 %v2890_v45, %v2842_v16  ;;  %3278 = vmatmul.bf16.gmra.mxu3 %v7915_v3  ;;  %3312 = vmatmul.bf16.gmra.mxu0 %v7782_v14 }
 0x3ee   : > { %v2425_v13 = vpack.c.bf16 %v2409_v36, %v2409_v36  ;;  %2958 = vmatmul.bf16.gmra.mxu2 %v7949_v43  ;;  %3361 = vmatmul.bf16.gmra.mxu1 %v7964_v22  ;;  %v6485_v22 = vld [vmem:[%s9008_s13 + $0x38] sm:$0xff] }
 0x3ef   : > { %4219 = vmatpush.bf16.msra.mxu2 %v6485_v22 }
 0x3f0   : > { %v3448_v32 = vunpack.c.l.b16 %v2425_v13  ;;  %v8293_v8 = vpop.f32.mrf.mxu3  ;;  %v6475_v13 = vld [vmem:[%s9006_s11 + $0x68] sm:$0xff] }
 0x3f1   : > { %v2391_v33 = vpop.f32.mrf.mxu2 }
 0x3f2   : > { %v2392_v29 = vadd.f32 %v2391_v33, %v8178_v17  ;;  %v2843_v20 = vpop.f32.mrf.mxu0  ;;  %v8298_v11 = vpack.c.b16 %v3448_v32, %v3447_v55  ;;  %v6469_v17 = vld [vmem:[%s9006_s11 + $0x38] sm:$0xff]  ;;  %v2803_v33 = vadd.f32 %v8194_v4, %v8270_v58 }
 0x3f3   : > { %v2844_v3 = vadd.f32 %v2843_v20, %v2795_v50  ;;  %v2892_v14 = vpop.f32.mrf.mxu1  ;;  %3957 = vmatpush.bf16.msrb.mxu0 %v6469_v17  ;;  %v6484_v50 = vld [vmem:[%s9008_s13 + $0x30] sm:$0xff]  ;;  %v6466_v20 = vld [vmem:[%s9006_s11 + $0x20] sm:$0xff] }
 0x3f4   : > { %v2410_v9 = vmax.f32 %v2392_v29, 0.0  ;;  %4220 = vmatpush.bf16.msra.mxu2 %v6484_v50 }
 0x3f5   : > { %v8300_v63 = vadd.f32 %v2892_v14, %v2844_v3  ;;  %v6474_v3 = vld [vmem:[%s9006_s11 + $0x60] sm:$0xff] }
 0x3f6   : > { %v2426_v62 = vpack.c.bf16 %v2410_v9, %v2410_v9 }
 0x3f7   : > { %3958 = vmatpush.bf16.msrb.mxu0 %v6468_v2  ;;  %v6471_v2 = vld [vmem:[%s9006_s11 + $0x48] sm:$0xff] }
 0x3f8   : > { %v8302_v18 = vpop.f32.mrf.mxu3 }
 0x3f9   : > { %v2393_v34 = vpop.f32.mrf.mxu2 }
 0x3fa   : > { %v2394_v6 = vadd.f32 %v2393_v34, %v8196_v27  ;;  %v2846_v40 = vpop.f32.mrf.mxu0  ;;  %v3449_v27 = vunpack.c.l.b16 %v2426_v62  ;;  %v6465_v34 = vld [vmem:[%s9006_s11 + $0x18] sm:$0xff]  ;;  %v6464_v62 = vld [vmem:[%s9006_s11 + $0x10] sm:$0xff] }
 0x3fb   : > { %v2847_v51 = vadd.f32 %v2846_v40, %v2798_v44  ;;  %v2895_v48 = vpop.f32.mrf.mxu1  ;;  %3959 = vmatpush.bf16.msrb.mxu0 %v6467_v37  ;;  %v6462_v37 = vld [vmem:[%s9006_s11] sm:$0xff] }
 0x3fc   : > { %v2411_v25 = vmax.f32 %v2394_v6, 0.0 }
 0x3fd   : > { %v8319_v31 = vadd.f32 %v2895_v48, %v2847_v51  ;;  %3283 = vmatmul.bf16.gmra.mxu3 %v7947_v12  ;;  %3317 = vmatmul.bf16.gmra.mxu0 %v7835_v60  ;;  %v6476_v60 = vld [vmem:[%s9006_s11 + $0x70] sm:$0xff] }
 0x3fe   : > { %v2427_v57 = vpack.c.bf16 %v2411_v25, %v2411_v25  ;;  %3366 = vmatmul.bf16.gmra.mxu1 %v7990_v42  ;;  %3703 = vmatmul.bf16.vlgmr.msrb.gmra.mxu2 %v8124_v24 }
 0x3ff   : > { %4007 = vmatpush.bf16.msrb.mxu1 %v6476_v60  ;;  %3960 = vmatpush.bf16.msrb.mxu0 %v6466_v20 }
 0x400   : > { %v3450_v35 = vunpack.c.l.b16 %v2427_v57  ;;  %v8325_v46 = vpop.f32.mrf.mxu3 }
 0x401   : > { %v2924_v10 = vpop.f32.mrf.mxu2 }
 0x402   : > { %v2848_v12 = vpop.f32.mrf.mxu0  ;;  %v8335_v42 = vpack.c.b16 %v3450_v35, %v3449_v27  ;;  %v2925_v47 = vadd.f32 %v2924_v10, %v8209_v0  ;;  %v6492_v0 = vld [vmem:[%s9008_s13 + $0x70] sm:$0xff]  ;;  %v6463_v10 = vld [vmem:[%s9006_s11 + $0x8] sm:$0xff] }
 0x403   : > { %v2849_v16 = vadd.f32 %v2848_v12, %v2800_v38  ;;  %v2897_v45 = vpop.f32.mrf.mxu1  ;;  %4008 = vmatpush.bf16.msrb.mxu1 %v6475_v13  ;;  %4269 = vmatpush.bf16.msra.mxu3 %v6492_v0  ;;  %v6470_v13 = vld [vmem:[%s9006_s11 + $0x40] sm:$0xff] }
 0x404   : > { %v2964_v55 = vmax.f32 %v2925_v47, 0.0  ;;  %3961 = vmatpush.bf16.msrb.mxu0 %v6465_v34 }
 0x405   : > { %v8338_v36 = vadd.f32 %v2897_v45, %v2849_v16  ;;  %v6491_v16 = vld [vmem:[%s9008_s13 + $0x68] sm:$0xff]  ;;  %v2808_v45 = vadd.f32 %v8194_v4, %v8293_v8 }
 0x406   : > { %v2980_v17 = vpack.c.bf16 %v2964_v55, %v2964_v55 }
 0x407   : > { %4009 = vmatpush.bf16.msrb.mxu1 %v6474_v3  ;;  %4270 = vmatpush.bf16.msra.mxu3 %v6491_v16 }
 0x408   : > { %v8346_v32 = vpop.f32.mrf.mxu3  ;;  %v3483_v6 = vunpack.c.l.b16 %v2980_v17  ;;  %3962 = vmatpush.bf16.msrb.mxu0 %v6464_v62 }
 0x409   : > { %v2926_v29 = vpop.f32.mrf.mxu2 }
 0x40a   : > { %v2927_v14 = vadd.f32 %v2926_v29, %v8222_v15  ;;  %v2851_v9 = vpop.f32.mrf.mxu0  ;;  %v6473_v15 = vld [vmem:[%s9006_s11 + $0x58] sm:$0xff] }
 0x40b   : > { %v2852_v22 = vadd.f32 %v2851_v9, %v2803_v33  ;;  %v2900_v53 = vpop.f32.mrf.mxu1  ;;  %4010 = vmatpush.bf16.msrb.mxu1 %v6473_v15 }
 0x40c   : > { %v2965_v58 = vmax.f32 %v2927_v14, 0.0  ;;  %3963 = vmatpush.bf16.msrb.mxu0 %v6463_v10 }
 0x40d   : > { %v8363_v44 = vadd.f32 %v2900_v53, %v2852_v22  ;;  %3322 = vmatmul.bf16.gmra.mxu0 %v7888_v28  ;;  %v2805_v28 = vadd.f32 %v8194_v4, %v8279_v61  ;;  %v2810_v22 = vadd.f32 %v8194_v4, %v8302_v18  ;;  %v2813_v18 = vadd.f32 %v8194_v4, %v8325_v46 }
 0x40e   : > { %v2981_v7 = vpack.c.bf16 %v2965_v58, %v2965_v58  ;;  %3371 = vmatmul.bf16.gmra.mxu1 %v8013_v19  ;;  %3708 = vmatmul.bf16.gmra.mxu2 %v8163_v5  ;;  %v6472_v19 = vld [vmem:[%s9006_s11 + $0x50] sm:$0xff] }
 0x40f   : > { %4011 = vmatpush.bf16.msrb.mxu1 %v6472_v19 }
 0x410   : > { %v3484_v40 = vunpack.c.l.b16 %v2981_v7  ;;  %v8374_v51 = vpop.f32.mrf.mxu3  ;;  %3964 = vmatpush.bf16.msrb.mxu0 %v6462_v37 }
 0x411   : > { %v2929_v48 = vpop.f32.mrf.mxu2 }
 0x412   : > { %v8384_v25 = vpack.c.b16 %v3484_v40, %v3483_v6  ;;  %v2853_v57 = vpop.f32.mrf.mxu0  ;;  %v2930_v38 = vadd.f32 %v2929_v48, %v8235_v52  ;;  %v6483_v52 = vld [vmem:[%s9008_s13 + $0x28] sm:$0xff]  ;;  %v6482_v40 = vld [vmem:[%s9008_s13 + $0x20] sm:$0xff] }
 0x413   : > { %v2854_v27 = vadd.f32 %v2853_v57, %v2805_v28  ;;  %v2902_v35 = vpop.f32.mrf.mxu1  ;;  %4012 = vmatpush.bf16.msrb.mxu1 %v6471_v2  ;;  %4221 = vmatpush.bf16.msra.mxu2 %v6483_v52 }
 0x414   : > { %3752 = vmatmul.bf16.vlgmr.msrb.gmra.mxu3 %v8384_v25  ;;  %v2966_v60 = vmax.f32 %v2930_v38, 0.0  ;;  %v6490_v38 = vld [vmem:[%s9008_s13 + $0x60] sm:$0xff] }
 0x415   : > { %v8388_v61 = vadd.f32 %v2902_v35, %v2854_v27  ;;  %4271 = vmatpush.bf16.msra.mxu3 %v6490_v38 }
 0x416   : > { %v2982_v29 = vpack.c.bf16 %v2966_v60, %v2966_v60  ;;  %v2815_v60 = vadd.f32 %v8194_v4, %v8346_v32  ;;  %v6481_v4 = vld [vmem:[%s9008_s13 + $0x18] sm:$0xff] }
 0x417   : > { %4013 = vmatpush.bf16.msrb.mxu1 %v6470_v13  ;;  %4222 = vmatpush.bf16.msra.mxu2 %v6482_v40 }
 0x418   : > { %v8396_v12 = vpop.f32.mrf.mxu3  ;;  %v3485_v14 = vunpack.c.l.b16 %v2982_v29 }
 0x419   : > { %v2931_v47 = vpop.f32.mrf.mxu2 }
 0x41a   : > { %v2932_v55 = vadd.f32 %v2931_v47, %v8248_v56  ;;  %v2856_v50 = vpop.f32.mrf.mxu0 }
 0x41b   : > { %v2857_v0 = vadd.f32 %v2856_v50, %v2808_v45  ;;  %v2905_v33 = vpop.f32.mrf.mxu1  ;;  %4223 = vmatpush.bf16.msra.mxu2 %v6481_v4 }
 0x41c   : > { %v2967_v8 = vmax.f32 %v2932_v55, 0.0 }
 0x41d   : > { %v8413_v20 = vadd.f32 %v2905_v33, %v2857_v0  ;;  %3327 = vmatmul.bf16.gmra.mxu0 %v7917_v1 }
 0x41e   : > { %v2983_v3 = vpack.c.bf16 %v2967_v8, %v2967_v8  ;;  %3376 = vmatmul.bf16.gmra.mxu1 %v8042_v54  ;;  %3713 = vmatmul.bf16.gmra.mxu2 %v8189_v41 }
 0x420   : > { %v3486_v56 = vunpack.c.l.b16 %v2983_v3  ;;  %v8418_v9 = vpop.f32.mrf.mxu3  ;;  %v6489_v3 = vld [vmem:[%s9008_s13 + $0x58] sm:$0xff] }
 0x421   : > { %v2934_v53 = vpop.f32.mrf.mxu2  ;;  %4272 = vmatpush.bf16.msra.mxu3 %v6489_v3 }
 0x422   : > { %v2858_v17 = vpop.f32.mrf.mxu0  ;;  %v8422_v58 = vpack.c.b16 %v3486_v56, %v3485_v14  ;;  %v2935_v1 = vadd.f32 %v2934_v53, %v8264_v21 }
 0x423   : > { %v2859_v34 = vadd.f32 %v2858_v17, %v2810_v22  ;;  %v2907_v15 = vpop.f32.mrf.mxu1 }
 0x424   : > { %3757 = vmatmul.bf16.gmra.mxu3 %v8422_v58  ;;  %v2968_v7 = vmax.f32 %v2935_v1, 0.0 }
 0x425   : > { %v8426_v54 = vadd.f32 %v2907_v15, %v2859_v34 }
 0x426   : > { %v2984_v57 = vpack.c.bf16 %v2968_v7, %v2968_v7 }
 0x428   : > { %v8428_v6 = vpop.f32.mrf.mxu3 }
 0x429   : > { %v2936_v28 = vpop.f32.mrf.mxu2 }
 0x42a   : > { %v2937_v48 = vadd.f32 %v2936_v28, %v8277_v26  ;;  %v2861_v62 = vpop.f32.mrf.mxu0  ;;  %v3487_v26 = vunpack.c.l.b16 %v2984_v57 }
 0x42b   : > { %v2862_v21 = vadd.f32 %v2861_v62, %v2813_v18  ;;  %v2910_v19 = vpop.f32.mrf.mxu1 }
 0x42c   : > { %v2969_v27 = vmax.f32 %v2937_v48, 0.0 }
 0x42d   : > { %v8436_v35 = vadd.f32 %v2910_v19, %v2862_v21  ;;  %3332 = vmatmul.bf16.gmra.mxu0 %v7949_v43 }
 0x42e   : > { %v2985_v10 = vpack.c.bf16 %v2969_v27, %v2969_v27  ;;  %3381 = vmatmul.bf16.gmra.mxu1 %v8075_v59  ;;  %3718 = vmatmul.bf16.gmra.mxu2 %v8220_v49  ;;  %v8455_v59 = vld [vmem:[%s9003_s8] ss:$0 sm:$0xff] }
 0x42f   : > { %v3250_v32 = vadd.f32 %v8455_v59, %v8374_v51  ;;  %v3252_v34 = vadd.f32 %v8455_v59, %v8396_v12  ;;  %v6480_v12 = vld [vmem:[%s9008_s13 + $0x10] sm:$0xff]  ;;  %v3255_v27 = vadd.f32 %v8455_v59, %v8418_v9 }
 0x430   : > { %v3488_v46 = vunpack.c.l.b16 %v2985_v10  ;;  %v8444_v2 = vpop.f32.mrf.mxu3  ;;  %4224 = vmatpush.bf16.msra.mxu2 %v6480_v12 }
 0x431   : > { %v2939_v52 = vpop.f32.mrf.mxu2 }
 0x432   : > { %v2863_v16 = vpop.f32.mrf.mxu0  ;;  %v8448_v43 = vpack.c.b16 %v3488_v46, %v3487_v26  ;;  %v2940_v37 = vadd.f32 %v2939_v52, %v8287_v39 }
 0x433   : > { %v2864_v45 = vadd.f32 %v2863_v16, %v2815_v60  ;;  %v2912_v47 = vpop.f32.mrf.mxu1 }
 0x434   : > { %3762 = vmatmul.bf16.gmra.mxu3 %v8448_v43  ;;  %v2970_v55 = vmax.f32 %v2940_v37, 0.0 }
 0x435   : > { %v8457_v13 = vadd.f32 %v2912_v47, %v2864_v45  ;;  %v6488_v45 = vld [vmem:[%s9008_s13 + $0x50] sm:$0xff] }
 0x436   : > { %v2986_v14 = vpack.c.bf16 %v2970_v55, %v2970_v55  ;;  %4273 = vmatpush.bf16.msra.mxu3 %v6488_v45 }
 0x438   : > { %v8459_v50 = vpop.f32.mrf.mxu3 }
 0x439   : > { %v2941_v39 = vpop.f32.mrf.mxu2 }
 0x43a   : > { %v2942_v0 = vadd.f32 %v2941_v39, %v8300_v63  ;;  %v3298_v33 = vpop.f32.mrf.mxu0  ;;  %v3489_v63 = vunpack.c.l.b16 %v2986_v14 }
 0x43b   : > { %v3299_v29 = vadd.f32 %v3298_v33, %v3250_v32  ;;  %v3347_v8 = vpop.f32.mrf.mxu1 }
 0x43c   : > { %v2971_v56 = vmax.f32 %v2942_v0, 0.0  ;;  %v3257_v0 = vadd.f32 %v8455_v59, %v8428_v6 }
 0x43d   : > { %v3348_v22 = vadd.f32 %v3347_v8, %v3299_v29  ;;  %3965 = vmatmul.bf16.vlgmr.msrb.gmra.mxu0 %v8124_v24 }
 0x43e   : > { %v2987_v53 = vpack.c.bf16 %v2971_v56, %v2971_v56  ;;  %3723 = vmatmul.bf16.gmra.mxu2 %v8246_v30  ;;  %4014 = vmatmul.bf16.vlgmr.msrb.gmra.mxu1 %v8384_v25 }
 0x43f   : > { %v3387_v40 = vmax.f32 %v3348_v22, 0.0 }
 0x440   : > { %v3490_v51 = vunpack.c.l.b16 %v2987_v53  ;;  %v8473_v17 = vpop.f32.mrf.mxu3  ;;  %v6479_v53 = vld [vmem:[%s9008_s13 + $0x8] sm:$0xff] }
 0x441   : > { %v2944_v15 = vpop.f32.mrf.mxu2  ;;  %v3403_v62 = vpack.c.bf16 %v3387_v40, %v3387_v40  ;;  %4225 = vmatpush.bf16.msra.mxu2 %v6479_v53  ;;  %v6486_v53 = vld [vmem:[%s9008_s13 + $0x40] sm:$0xff] }
 0x442   : > { %v3300_v1 = vpop.f32.mrf.mxu0  ;;  %v8477_v7 = vpack.c.b16 %v3490_v51, %v3489_v63  ;;  %v2945_v28 = vadd.f32 %v2944_v15, %v8319_v31  ;;  %v3260_v15 = vadd.f32 %v8455_v59, %v8444_v2 }
 0x443   : > { %v3301_v18 = vadd.f32 %v3300_v1, %v3252_v34  ;;  %v3349_v24 = vpop.f32.mrf.mxu1  ;;  %v3531_v46 = vunpack.c.l.b16 %v3403_v62 }
 0x444   : > { %3767 = vmatmul.bf16.gmra.mxu3 %v8477_v7  ;;  %v2972_v19 = vmax.f32 %v2945_v28, 0.0 }
 0x445   : > { %v3350_v48 = vadd.f32 %v3349_v24, %v3301_v18 }
 0x446   : > { %v2988_v47 = vpack.c.bf16 %v2972_v19, %v2972_v19  ;;  %v6487_v19 = vld [vmem:[%s9008_s13 + $0x48] sm:$0xff] }
 0x447   : > { %v3388_v21 = vmax.f32 %v3350_v48, 0.0  ;;  %4274 = vmatpush.bf16.msra.mxu3 %v6487_v19 }
 0x448   : > { %v8481_v57 = vpop.f32.mrf.mxu3 }
 0x449   : > { %v3404_v38 = vpack.c.bf16 %v3388_v21, %v3388_v21  ;;  %v2946_v10 = vpop.f32.mrf.mxu2 }
 0x44a   : > { %v2947_v26 = vadd.f32 %v2946_v10, %v8338_v36  ;;  %v3303_v31 = vpop.f32.mrf.mxu0  ;;  %v3491_v36 = vunpack.c.l.b16 %v2988_v47 }
 0x44b   : > { %v3532_v60 = vunpack.c.l.b16 %v3404_v38  ;;  %v3304_v52 = vadd.f32 %v3303_v31, %v3255_v27  ;;  %v3352_v16 = vpop.f32.mrf.mxu1  ;;  %4275 = vmatpush.bf16.msra.mxu3 %v6486_v53 }
 0x44c   : > { %v2973_v37 = vmax.f32 %v2947_v26, 0.0 }
 0x44d   : > { %v8492_v55 = vpack.c.b16 %v3532_v60, %v3531_v46  ;;  %v3353_v4 = vadd.f32 %v3352_v16, %v3304_v52  ;;  %3970 = vmatmul.bf16.gmra.mxu0 %v8163_v5  ;;  %v3262_v46 = vadd.f32 %v8455_v59, %v8459_v50  ;;  %v3265_v50 = vadd.f32 %v8455_v59, %v8473_v17 }
 0x44e   : > { %v2989_v9 = vpack.c.bf16 %v2973_v37, %v2973_v37  ;;  %3728 = vmatmul.bf16.gmra.mxu2 %v8275_v23  ;;  %4019 = vmatmul.bf16.gmra.mxu1 %v8422_v58 }
 0x44f   : > { %v3389_v3 = vmax.f32 %v3353_v4, 0.0 }
 0x450   : > { %v3492_v32 = vunpack.c.l.b16 %v2989_v9  ;;  %v8497_v39 = vpop.f32.mrf.mxu3 }
 0x451   : > { %v2949_v33 = vpop.f32.mrf.mxu2  ;;  %v3405_v63 = vpack.c.bf16 %v3389_v3, %v3389_v3 }
 0x452   : > { %v3305_v29 = vpop.f32.mrf.mxu0  ;;  %v8501_v8 = vpack.c.b16 %v3492_v32, %v3491_v36  ;;  %v2950_v56 = vadd.f32 %v2949_v33, %v8363_v44  ;;  %v6478_v44 = vld [vmem:[%s9008_s13] sm:$0xff] }
 0x453   : > { %v3306_v14 = vadd.f32 %v3305_v29, %v3257_v0  ;;  %v3354_v5 = vpop.f32.mrf.mxu1  ;;  %v3533_v28 = vunpack.c.l.b16 %v3405_v63  ;;  %4226 = vmatpush.bf16.msra.mxu2 %v6478_v44 }
 0x454   : > { %3772 = vmatmul.bf16.gmra.mxu3 %v8501_v8  ;;  %v2974_v6 = vmax.f32 %v2950_v56, 0.0 }
 0x455   : > { %v3355_v22 = vadd.f32 %v3354_v5, %v3306_v14 }
 0x456   : > { %v2990_v12 = vpack.c.bf16 %v2974_v6, %v2974_v6 }
 0x457   : > { %v3390_v51 = vmax.f32 %v3355_v22, 0.0 }
 0x458   : > { %v8508_v34 = vpop.f32.mrf.mxu3 }
 0x459   : > { %v3406_v1 = vpack.c.bf16 %v3390_v51, %v3390_v51  ;;  %v2951_v40 = vpop.f32.mrf.mxu2 }
 0x45a   : > { %v2952_v18 = vadd.f32 %v2951_v40, %v8388_v61  ;;  %v3308_v24 = vpop.f32.mrf.mxu0  ;;  %v3493_v61 = vunpack.c.l.b16 %v2990_v12  ;;  %v3267_v40 = vadd.f32 %v8455_v59, %v8481_v57  ;;  %v3270_v57 = vadd.f32 %v8455_v59, %v8497_v39  ;;  %v6501_v39 = vld [vmem:[%s9010_s15 + $0x38] sm:$0xff] }
 0x45b   : > { %v3534_v48 = vunpack.c.l.b16 %v3406_v1  ;;  %v3309_v62 = vadd.f32 %v3308_v24, %v3260_v15  ;;  %v3357_v21 = vpop.f32.mrf.mxu1  ;;  %4625 = vmatpush.bf16.msra.mxu0 %v6501_v39 }
 0x45c   : > { %v2975_v2 = vmax.f32 %v2952_v18, 0.0 }
 0x45d   : > { %v3358_v27 = vadd.f32 %v3357_v21, %v3309_v62  ;;  %3975 = vmatmul.bf16.gmra.mxu0 %v8189_v41  ;;  %v8520_v38 = vpack.c.b16 %v3534_v48, %v3533_v28 }
 0x45e   : > { %v2991_v10 = vpack.c.bf16 %v2975_v2, %v2975_v2  ;;  %3733 = vmatmul.bf16.gmra.mxu2 %v8298_v11  ;;  %4024 = vmatmul.bf16.gmra.mxu1 %v8448_v43 }
 0x45f   : > { %v3391_v41 = vmax.f32 %v3358_v27, 0.0 }
 0x460   : > { %v3494_v26 = vunpack.c.l.b16 %v2991_v10  ;;  %v8524_v31 = vpop.f32.mrf.mxu3 }
 0x461   : > { %v2954_v60 = vpop.f32.mrf.mxu2  ;;  %v3407_v9 = vpack.c.bf16 %v3391_v41, %v3391_v41 }
 0x462   : > { %v3310_v52 = vpop.f32.mrf.mxu0  ;;  %v8528_v16 = vpack.c.b16 %v3494_v26, %v3493_v61  ;;  %v2955_v37 = vadd.f32 %v2954_v60, %v8413_v20 }
 0x463   : > { %v3311_v45 = vadd.f32 %v3310_v52, %v3262_v46  ;;  %v3359_v47 = vpop.f32.mrf.mxu1  ;;  %v3535_v5 = vunpack.c.l.b16 %v3407_v9 }
 0x464   : > { %3777 = vmatmul.bf16.gmra.mxu3 %v8528_v16  ;;  %v2976_v32 = vmax.f32 %v2955_v37, 0.0 }
 0x465   : > { %v3360_v4 = vadd.f32 %v3359_v47, %v3311_v45 }
 0x466   : > { %v2992_v63 = vpack.c.bf16 %v2976_v32, %v2976_v32 }
 0x467   : > { %v3392_v36 = vmax.f32 %v3360_v4, 0.0 }
 0x468   : > { %v8532_v0 = vpop.f32.mrf.mxu3 }
 0x469   : > { %v3408_v33 = vpack.c.bf16 %v3392_v36, %v3392_v36  ;;  %v2956_v29 = vpop.f32.mrf.mxu2 }
 0x46a   : > { %v2957_v3 = vadd.f32 %v2956_v29, %v8426_v54  ;;  %v3313_v14 = vpop.f32.mrf.mxu0  ;;  %v3495_v54 = vunpack.c.l.b16 %v2992_v63  ;;  %v3275_v63 = vadd.f32 %v8455_v59, %v8524_v31  ;;  %v6497_v31 = vld [vmem:[%s9010_s15 + $0x18] sm:$0xff] }
 0x46b   : > { %v3536_v56 = vunpack.c.l.b16 %v3408_v33  ;;  %v3314_v22 = vadd.f32 %v3313_v14, %v3265_v50  ;;  %v3362_v20 = vpop.f32.mrf.mxu1  ;;  %v3272_v50 = vadd.f32 %v8455_v59, %v8508_v34  ;;  %v6499_v34 = vld [vmem:[%s9010_s15 + $0x28] sm:$0xff] }
 0x46c   : > { %v2977_v51 = vmax.f32 %v2957_v3, 0.0 }
 0x46d   : > { %v3363_v6 = vadd.f32 %v3362_v20, %v3314_v22  ;;  %3980 = vmatmul.bf16.gmra.mxu0 %v8220_v49  ;;  %v8541_v17 = vpack.c.b16 %v3536_v56, %v3535_v5 }
 0x46e   : > { %v2993_v15 = vpack.c.bf16 %v2977_v51, %v2977_v51  ;;  %3738 = vmatmul.bf16.gmra.mxu2 %v8335_v42  ;;  %4029 = vmatmul.bf16.gmra.mxu1 %v8477_v7 }
 0x46f   : > { %v3393_v49 = vmax.f32 %v3363_v6, 0.0 }
 0x470   : > { %v3496_v1 = vunpack.c.l.b16 %v2993_v15  ;;  %v8547_v18 = vpop.f32.mrf.mxu3  ;;  %v6498_v15 = vld [vmem:[%s9010_s15 + $0x20] sm:$0xff] }
 0x471   : > { %v2959_v44 = vpop.f32.mrf.mxu2  ;;  %v3409_v12 = vpack.c.bf16 %v3393_v49, %v3393_v49 }
 0x472   : > { %v3315_v24 = vpop.f32.mrf.mxu0  ;;  %v8549_v28 = vpack.c.b16 %v3496_v1, %v3495_v54  ;;  %v2960_v21 = vadd.f32 %v2959_v44, %v8436_v35 }
 0x473   : > { %v3316_v48 = vadd.f32 %v3315_v24, %v3267_v40  ;;  %v3364_v62 = vpop.f32.mrf.mxu1  ;;  %v3537_v60 = vunpack.c.l.b16 %v3409_v12 }
 0x474   : > { %3782 = vmatmul.bf16.gmra.mxu3 %v8549_v28  ;;  %v2978_v27 = vmax.f32 %v2960_v21, 0.0  ;;  %v6525_v21 = vld [vmem:[%s9012_s17 + $0x78] sm:$0xff] }
 0x475   : > { %v3365_v19 = vadd.f32 %v3364_v62, %v3316_v48  ;;  %v6517_v62 = vld [vmem:[%s9012_s17 + $0x38] sm:$0xff]  ;;  %4936 = vmatpush.bf16.msrb.mxu3 %v6525_v21 }
 0x476   : > { %v2994_v47 = vpack.c.bf16 %v2978_v27, %v2978_v27  ;;  %4887 = vmatpush.bf16.msrb.mxu2 %v6517_v62 }
 0x477   : > { %v3394_v2 = vmax.f32 %v3365_v19, 0.0 }
 0x478   : > { %v8556_v41 = vpop.f32.mrf.mxu3 }
 0x479   : > { %v3410_v10 = vpack.c.bf16 %v3394_v2, %v3394_v2  ;;  %v2961_v61 = vpop.f32.mrf.mxu2  ;;  %v6496_v2 = vld [vmem:[%s9010_s15 + $0x10] sm:$0xff] }
 0x47a   : > { %v2962_v26 = vadd.f32 %v2961_v61, %v8457_v13  ;;  %v3318_v46 = vpop.f32.mrf.mxu0  ;;  %v3497_v13 = vunpack.c.l.b16 %v2994_v47  ;;  %v3280_v47 = vadd.f32 %v8455_v59, %v8547_v18 }
 0x47b   : > { %v3538_v52 = vunpack.c.l.b16 %v3410_v10  ;;  %v3319_v45 = vadd.f32 %v3318_v46, %v3270_v57  ;;  %v3367_v35 = vpop.f32.mrf.mxu1 }
 0x47c   : > { %v2979_v37 = vmax.f32 %v2962_v26, 0.0  ;;  %v6508_v26 = vld [vmem:[%s9010_s15 + $0x70] sm:$0xff] }
 0x47d   : > { %v3368_v4 = vadd.f32 %v3367_v35, %v3319_v45  ;;  %3985 = vmatmul.bf16.gmra.mxu0 %v8246_v30  ;;  %v8562_v9 = vpack.c.b16 %v3538_v52, %v3537_v60  ;;  %v6500_v30 = vld [vmem:[%s9010_s15 + $0x30] sm:$0xff]  ;;  %v6507_v35 = vld [vmem:[%s9010_s15 + $0x68] sm:$0xff] }
 0x47e   : > { %v2995_v36 = vpack.c.bf16 %v2979_v37, %v2979_v37  ;;  %4034 = vmatmul.bf16.gmra.mxu1 %v8501_v8  ;;  %4227 = vmatmul.bf16.vlgmr.msra.gmra.mxu2 %v8384_v25 }
 0x47f   : > { %v3395_v14 = vmax.f32 %v3368_v4, 0.0  ;;  %4626 = vmatpush.bf16.msra.mxu0 %v6500_v30  ;;  %v6506_v30 = vld [vmem:[%s9010_s15 + $0x60] sm:$0xff] }
 0x480   : > { %v3498_v32 = vunpack.c.l.b16 %v2995_v36  ;;  %v8576_v25 = vpop.f32.mrf.mxu3 }
 0x481   : > { %v8568_v33 = vpop.f32.mrf.mxu2  ;;  %v3411_v20 = vpack.c.bf16 %v3395_v14, %v3395_v14  ;;  %v6516_v14 = vld [vmem:[%s9012_s17 + $0x30] sm:$0xff] }
 0x482   : > { %v3320_v29 = vpop.f32.mrf.mxu0  ;;  %v8573_v3 = vpack.c.b16 %v3498_v32, %v3497_v13  ;;  %4888 = vmatpush.bf16.msrb.mxu2 %v6516_v14 }
 0x483   : > { %v3321_v5 = vadd.f32 %v3320_v29, %v3272_v50  ;;  %v3369_v56 = vpop.f32.mrf.mxu1  ;;  %4627 = vmatpush.bf16.msra.mxu0 %v6499_v34  ;;  %v3539_v1 = vunpack.c.l.b16 %v3411_v20 }
 0x484   : > { %3787 = vmatmul.bf16.gmra.mxu3 %v8573_v3 }
 0x485   : > { %v3370_v22 = vadd.f32 %v3369_v56, %v3321_v5  ;;  %v6524_v5 = vld [vmem:[%s9012_s17 + $0x70] sm:$0xff] }
 0x486   : > { %4937 = vmatpush.bf16.msrb.mxu3 %v6524_v5 }
 0x487   : > { %v3396_v53 = vmax.f32 %v3370_v22, 0.0  ;;  %4628 = vmatpush.bf16.msra.mxu0 %v6498_v15  ;;  %v3282_v22 = vadd.f32 %v8455_v59, %v8556_v41 }
 0x488   : > { %v8602_v19 = vpop.f32.mrf.mxu3 }
 0x489   : > { %v3412_v51 = vpack.c.bf16 %v3396_v53, %v3396_v53  ;;  %v8583_v6 = vpop.f32.mrf.mxu2 }
 0x48a   : > { %v3323_v54 = vpop.f32.mrf.mxu0 }
 0x48b   : > { %v3540_v40 = vunpack.c.l.b16 %v3412_v51  ;;  %v3324_v44 = vadd.f32 %v3323_v54, %v3275_v63  ;;  %v3372_v24 = vpop.f32.mrf.mxu1  ;;  %4629 = vmatpush.bf16.msra.mxu0 %v6497_v31  ;;  %v6504_v51 = vld [vmem:[%s9010_s15 + $0x50] sm:$0xff]  ;;  %v8659_v54 = vld [vmem:[%s9005_s10] ss:$0 sm:$0xff] }
 0x48c   : > { %v3705_v62 = vadd.f32 %v8659_v54, %v8568_v33  ;;  %v6515_v33 = vld [vmem:[%s9012_s17 + $0x28] sm:$0xff] }
 0x48d   : > { %v3373_v49 = vadd.f32 %v3372_v24, %v3324_v44  ;;  %3990 = vmatmul.bf16.gmra.mxu0 %v8275_v23  ;;  %v8592_v48 = vpack.c.b16 %v3540_v40, %v3539_v1  ;;  %v6509_v23 = vld [vmem:[%s9010_s15 + $0x78] sm:$0xff]  ;;  %v6503_v44 = vld [vmem:[%s9010_s15 + $0x48] sm:$0xff]  ;;  %v3707_v24 = vadd.f32 %v8659_v54, %v8583_v6  ;;  %v6502_v6 = vld [vmem:[%s9010_s15 + $0x40] sm:$0xff]  ;;  %4889 = vmatpush.bf16.msrb.mxu2 %v6515_v33 }
 0x48e   : > { %4039 = vmatmul.bf16.gmra.mxu1 %v8528_v16  ;;  %4232 = vmatmul.bf16.gmra.mxu2 %v8422_v58  ;;  %v3277_v58 = vadd.f32 %v8455_v59, %v8532_v0  ;;  %v6495_v0 = vld [vmem:[%s9010_s15 + $0x8] sm:$0xff] }
 0x48f   : > { %4674 = vmatpush.bf16.msra.mxu1 %v6509_v23  ;;  %v3397_v57 = vmax.f32 %v3373_v49, 0.0  ;;  %4630 = vmatpush.bf16.msra.mxu0 %v6496_v2 }
 0x491   : > { %v8609_v12 = vpop.f32.mrf.mxu2  ;;  %v3413_v60 = vpack.c.bf16 %v3397_v57, %v3397_v57 }
 0x492   : > { %v3325_v27 = vpop.f32.mrf.mxu0 }
 0x493   : > { %v3326_v10 = vadd.f32 %v3325_v27, %v3277_v58  ;;  %v3374_v61 = vpop.f32.mrf.mxu1  ;;  %4675 = vmatpush.bf16.msra.mxu1 %v6508_v26  ;;  %4631 = vmatpush.bf16.msra.mxu0 %v6495_v0  ;;  %v3541_v36 = vunpack.c.l.b16 %v3413_v60 }
 0x494   : > { %4276 = vmatmul.bf16.vlgmr.msra.gmra.mxu3 %v8492_v55  ;;  %v6494_v55 = vld [vmem:[%s9010_s15] sm:$0xff] }
 0x495   : > { %v3375_v46 = vadd.f32 %v3374_v61, %v3326_v10 }
 0x497   : > { %v3398_v52 = vmax.f32 %v3375_v46, 0.0  ;;  %v3753_v45 = vpop.f32.mrf.mxu3  ;;  %4676 = vmatpush.bf16.msra.mxu1 %v6507_v35  ;;  %4632 = vmatpush.bf16.msra.mxu0 %v6494_v55  ;;  %v6523_v46 = vld [vmem:[%s9012_s17 + $0x68] sm:$0xff] }
 0x498   : > { %v3754_v10 = vadd.f32 %v3753_v45, %v3705_v62  ;;  %4938 = vmatpush.bf16.msrb.mxu3 %v6523_v46 }
 0x499   : > { %v3414_v37 = vpack.c.bf16 %v3398_v52, %v3398_v52  ;;  %v8626_v4 = vpop.f32.mrf.mxu2 }
 0x49a   : > { %v3328_v39 = vpop.f32.mrf.mxu0  ;;  %v3793_v60 = vmax.f32 %v3754_v10, 0.0 }
 0x49b   : > { %v3542_v13 = vunpack.c.l.b16 %v3414_v37  ;;  %v3329_v32 = vadd.f32 %v3328_v39, %v3280_v47  ;;  %v3377_v50 = vpop.f32.mrf.mxu1  ;;  %4677 = vmatpush.bf16.msra.mxu1 %v6506_v30  ;;  %v8694_v30 = vld [vmem:[%s9007_s12] ss:$0 sm:$0xff] }
 0x49c   : > { %v3809_v55 = vpack.c.bf16 %v3793_v60, %v3793_v60 }
 0x49d   : > { %v3378_v29 = vadd.f32 %v3377_v50, %v3329_v32  ;;  %3995 = vmatmul.bf16.gmra.mxu0 %v8298_v11  ;;  %v8635_v18 = vpack.c.b16 %v3542_v13, %v3541_v36  ;;  %v6505_v11 = vld [vmem:[%s9010_s15 + $0x58] sm:$0xff] }
 0x49e   : > { %4044 = vmatmul.bf16.gmra.mxu1 %v8549_v28  ;;  %4237 = vmatmul.bf16.gmra.mxu2 %v8448_v43 }
 0x49f   : > { %v3755_v56 = vpop.f32.mrf.mxu3  ;;  %4678 = vmatpush.bf16.msra.mxu1 %v6505_v11  ;;  %v3399_v20 = vmax.f32 %v3378_v29, 0.0 }
 0x4a0   : > { %v3756_v21 = vadd.f32 %v3755_v56, %v3707_v24 }
 0x4a1   : > { %v8650_v34 = vpop.f32.mrf.mxu2  ;;  %v3415_v41 = vpack.c.bf16 %v3399_v20, %v3399_v20 }
 0x4a2   : > { %v3330_v43 = vpop.f32.mrf.mxu0  ;;  %v3794_v26 = vmax.f32 %v3756_v21, 0.0  ;;  %v3715_v33 = vadd.f32 %v8659_v54, %v8650_v34  ;;  %v6521_v34 = vld [vmem:[%s9012_s17 + $0x58] sm:$0xff] }
 0x4a3   : > { %v3331_v53 = vadd.f32 %v3330_v43, %v3282_v22  ;;  %v3379_v63 = vpop.f32.mrf.mxu1  ;;  %4679 = vmatpush.bf16.msra.mxu1 %v6504_v51  ;;  %v3543_v58 = vunpack.c.l.b16 %v3415_v41 }
 0x4a4   : > { %4281 = vmatmul.bf16.gmra.mxu3 %v8520_v38  ;;  %v3285_v38 = vadd.f32 %v8455_v59, %v8576_v25  ;;  %v3810_v45 = vpack.c.bf16 %v3794_v26, %v3794_v26 }
 0x4a5   : > { %v3380_v15 = vadd.f32 %v3379_v63, %v3331_v53 }
 0x4a6   : > { %v4366_v36 = vunpack.c.l.b16 %v3810_v45 }
 0x4a7   : > { %v3400_v1 = vmax.f32 %v3380_v15, 0.0  ;;  %v3758_v40 = vpop.f32.mrf.mxu3  ;;  %4680 = vmatpush.bf16.msra.mxu1 %v6503_v44 }
 0x4a9   : > { %v3416_v49 = vpack.c.bf16 %v3400_v1, %v3400_v1  ;;  %v8668_v31 = vpop.f32.mrf.mxu2 }
 0x4aa   : > { %v3333_v23 = vpop.f32.mrf.mxu0 }
 0x4ab   : > { %v3544_v2 = vunpack.c.l.b16 %v3416_v49  ;;  %v3334_v27 = vadd.f32 %v3333_v23, %v3285_v38  ;;  %v3382_v57 = vpop.f32.mrf.mxu1  ;;  %4681 = vmatpush.bf16.msra.mxu1 %v6502_v6  ;;  %v3717_v6 = vadd.f32 %v8659_v54, %v8668_v31  ;;  %v6513_v31 = vld [vmem:[%s9012_s17 + $0x18] sm:$0xff] }
 0x4ad   : > { %v3383_v61 = vadd.f32 %v3382_v57, %v3334_v27  ;;  %4000 = vmatmul.bf16.gmra.mxu0 %v8335_v42  ;;  %v8676_v25 = vpack.c.b16 %v3544_v2, %v3543_v58  ;;  %v3287_v42 = vadd.f32 %v8455_v59, %v8602_v19  ;;  %v4365_v59 = vunpack.c.l.b16 %v3809_v55 }
 0x4ae   : > { %4049 = vmatmul.bf16.gmra.mxu1 %v8573_v3  ;;  %4242 = vmatmul.bf16.gmra.mxu2 %v8477_v7  ;;  %v3712_v19 = vadd.f32 %v8659_v54, %v8626_v4  ;;  %v6514_v4 = vld [vmem:[%s9012_s17 + $0x20] sm:$0xff] }
 0x4af   : > { %v3760_v0 = vpop.f32.mrf.mxu3  ;;  %v3401_v7 = vmax.f32 %v3383_v61, 0.0  ;;  %v4381_v5 = vpack.c.b16 %v4366_v36, %v4365_v59  ;;  %4890 = vmatpush.bf16.msrb.mxu2 %v6514_v4 }
 0x4b0   : > { %v3761_v22 = vadd.f32 %v3760_v0, %v3712_v19 }
 0x4b1   : > { %v8688_v52 = vpop.f32.mrf.mxu2  ;;  %v3417_v13 = vpack.c.bf16 %v3401_v7, %v3401_v7 }
 0x4b2   : > { %v3335_v35 = vpop.f32.mrf.mxu0  ;;  %v3796_v15 = vmax.f32 %v3761_v22, 0.0 }
 0x4b3   : > { %v3336_v47 = vadd.f32 %v3335_v35, %v3287_v42  ;;  %v3384_v37 = vpop.f32.mrf.mxu1  ;;  %v3545_v11 = vunpack.c.l.b16 %v3417_v13  ;;  %4891 = vmatpush.bf16.msrb.mxu2 %v6513_v31 }
 0x4b4   : > { %4286 = vmatmul.bf16.gmra.mxu3 %v8541_v17  ;;  %v3710_v17 = vadd.f32 %v8659_v54, %v8609_v12  ;;  %v6522_v12 = vld [vmem:[%s9012_s17 + $0x60] sm:$0xff]  ;;  %v3812_v38 = vpack.c.bf16 %v3796_v15, %v3796_v15  ;;  %v3720_v15 = vadd.f32 %v8659_v54, %v8688_v52 }
 0x4b5   : > { %v3385_v39 = vadd.f32 %v3384_v37, %v3336_v47  ;;  %4939 = vmatpush.bf16.msrb.mxu3 %v6522_v12 }
 0x4b6   : > { %v3759_v63 = vadd.f32 %v3758_v40, %v3710_v17  ;;  %v4368_v58 = vunpack.c.l.b16 %v3812_v38 }
 0x4b7   : > { %v3402_v32 = vmax.f32 %v3385_v39, 0.0  ;;  %v3763_v50 = vpop.f32.mrf.mxu3 }
 0x4b8   : > { %v3795_v44 = vmax.f32 %v3759_v63, 0.0  ;;  %v3764_v7 = vadd.f32 %v3763_v50, %v3715_v33 }
 0x4b9   : > { %v3418_v29 = vpack.c.bf16 %v3402_v32, %v3402_v32  ;;  %v8698_v14 = vpop.f32.mrf.mxu2  ;;  %4940 = vmatpush.bf16.msrb.mxu3 %v6521_v34  ;;  %v6512_v32 = vld [vmem:[%s9012_s17 + $0x10] sm:$0xff] }
 0x4ba   : > { %v3966_v56 = vpop.f32.mrf.mxu0  ;;  %v3811_v21 = vpack.c.bf16 %v3795_v44, %v3795_v44  ;;  %v3797_v36 = vmax.f32 %v3764_v7, 0.0  ;;  %4892 = vmatpush.bf16.msrb.mxu2 %v6512_v32  ;;  %v3722_v63 = vadd.f32 %v8659_v54, %v8698_v14 }
 0x4bb   : > { %v3546_v43 = vunpack.c.l.b16 %v3418_v29  ;;  %v3967_v20 = vadd.f32 %v8694_v30, %v3966_v56  ;;  %v4015_v53 = vpop.f32.mrf.mxu1  ;;  %v6511_v56 = vld [vmem:[%s9012_s17 + $0x8] sm:$0xff] }
 0x4bc   : > { %v4367_v10 = vunpack.c.l.b16 %v3811_v21  ;;  %v3813_v17 = vpack.c.bf16 %v3797_v36, %v3797_v36  ;;  %v6520_v21 = vld [vmem:[%s9012_s17 + $0x50] sm:$0xff] }
 0x4bd   : > { %4633 = vmatmul.bf16.vlgmr.msra.gmra.mxu0 %v4381_v5  ;;  %v8703_v51 = vpack.c.b16 %v3546_v43, %v3545_v11  ;;  %v4016_v41 = vadd.f32 %v4015_v53, %v3967_v20  ;;  %4941 = vmatpush.bf16.msrb.mxu3 %v6520_v21 }
 0x4be   : > { %4247 = vmatmul.bf16.gmra.mxu2 %v8501_v8  ;;  %v4382_v35 = vpack.c.b16 %v4368_v58, %v4367_v10  ;;  %v4369_v53 = vunpack.c.l.b16 %v3813_v17 }
 0x4bf   : > { %v3765_v1 = vpop.f32.mrf.mxu3  ;;  %v4055_v49 = vmax.f32 %v4016_v41, 0.0  ;;  %4893 = vmatpush.bf16.msrb.mxu2 %v6511_v56 }
 0x4c0   : > { %v3766_v46 = vadd.f32 %v3765_v1, %v3717_v6 }
 0x4c1   : > { %v8712_v40 = vpop.f32.mrf.mxu2  ;;  %v4071_v2 = vpack.c.bf16 %v4055_v49, %v4055_v49 }
 0x4c2   : > { %v3968_v24 = vpop.f32.mrf.mxu0  ;;  %v3798_v37 = vmax.f32 %v3766_v46, 0.0 }
 0x4c3   : > { %v3969_v8 = vadd.f32 %v8694_v30, %v3968_v24  ;;  %v4017_v62 = vpop.f32.mrf.mxu1  ;;  %v4413_v60 = vunpack.c.l.b16 %v4071_v2 }
 0x4c4   : > { %4291 = vmatmul.bf16.gmra.mxu3 %v8562_v9  ;;  %v3814_v50 = vpack.c.bf16 %v3798_v37, %v3798_v37  ;;  %v3725_v37 = vadd.f32 %v8659_v54, %v8712_v40 }
 0x4c5   : > { %v4018_v23 = vadd.f32 %v4017_v62, %v3969_v8 }
 0x4c6   : > { %v4370_v11 = vunpack.c.l.b16 %v3814_v50 }
 0x4c7   : > { %v4056_v27 = vmax.f32 %v4018_v23, 0.0  ;;  %v3768_v57 = vpop.f32.mrf.mxu3 }
 0x4c8   : > { %v4383_v1 = vpack.c.b16 %v4370_v11, %v4369_v53  ;;  %v3769_v14 = vadd.f32 %v3768_v57, %v3720_v15 }
 0x4c9   : > { %v4072_v61 = vpack.c.bf16 %v4056_v27, %v4056_v27  ;;  %v8718_v26 = vpop.f32.mrf.mxu2 }
 0x4ca   : > { %v3971_v0 = vpop.f32.mrf.mxu0  ;;  %v3799_v2 = vmax.f32 %v3769_v14, 0.0 }
 0x4cb   : > { %v4414_v9 = vunpack.c.l.b16 %v4072_v61  ;;  %v3972_v42 = vadd.f32 %v8694_v30, %v3971_v0  ;;  %v4020_v45 = vpop.f32.mrf.mxu1 }
 0x4cd   : > { %v8723_v47 = vpack.c.b16 %v4414_v9, %v4413_v60  ;;  %4638 = vmatmul.bf16.gmra.mxu0 %v4382_v35  ;;  %v4021_v55 = vadd.f32 %v4020_v45, %v3972_v42  ;;  %v3727_v45 = vadd.f32 %v8659_v54, %v8718_v26 }
 0x4ce   : > { %4252 = vmatmul.bf16.gmra.mxu2 %v8528_v16 }
 0x4cf   : > { %v3770_v39 = vpop.f32.mrf.mxu3  ;;  %4682 = vmatmul.bf16.vlgmr.msra.gmra.mxu1 %v8723_v47  ;;  %v4057_v16 = vmax.f32 %v4021_v55, 0.0 }
 0x4d0   : > { %v3771_v24 = vadd.f32 %v3770_v39, %v3722_v63 }
 0x4d1   : > { %v8733_v13 = vpop.f32.mrf.mxu2  ;;  %v4073_v22 = vpack.c.bf16 %v4057_v16, %v4057_v16 }
 0x4d2   : > { %v3973_v59 = vpop.f32.mrf.mxu0  ;;  %v3800_v52 = vmax.f32 %v3771_v24, 0.0 }
 0x4d3   : > { %v3974_v19 = vadd.f32 %v8694_v30, %v3973_v59  ;;  %v4022_v29 = vpop.f32.mrf.mxu1  ;;  %v4415_v44 = vunpack.c.l.b16 %v4073_v22 }
 0x4d4   : > { %4296 = vmatmul.bf16.gmra.mxu3 %v8592_v48  ;;  %v6510_v48 = vld [vmem:[%s9012_s17] sm:$0xff]  ;;  %v3816_v57 = vpack.c.bf16 %v3800_v52, %v3800_v52 }
 0x4d5   : > { %v4023_v5 = vadd.f32 %v4022_v29, %v3974_v19  ;;  %4894 = vmatpush.bf16.msrb.mxu2 %v6510_v48  ;;  %v6519_v19 = vld [vmem:[%s9012_s17 + $0x48] sm:$0xff] }
 0x4d6   : > { %v4372_v0 = vunpack.c.l.b16 %v3816_v57  ;;  %4942 = vmatpush.bf16.msrb.mxu3 %v6519_v19 }
 0x4d7   : > { %v4058_v43 = vmax.f32 %v4023_v5, 0.0  ;;  %v3773_v20 = vpop.f32.mrf.mxu3 }
 0x4d8   : > { %v3774_v59 = vadd.f32 %v3773_v20, %v3725_v37 }
 0x4d9   : > { %v4074_v4 = vpack.c.bf16 %v4058_v43, %v4058_v43  ;;  %v8745_v12 = vpop.f32.mrf.mxu2 }
 0x4da   : > { %v3976_v41 = vpop.f32.mrf.mxu0  ;;  %v3801_v17 = vmax.f32 %v3774_v59, 0.0 }
 0x4db   : > { %v4416_v38 = vunpack.c.l.b16 %v4074_v4  ;;  %v3977_v49 = vadd.f32 %v8694_v30, %v3976_v41  ;;  %v4025_v8 = vpop.f32.mrf.mxu1 }
 0x4dc   : > { %v3817_v53 = vpack.c.bf16 %v3801_v17, %v3801_v17 }
 0x4dd   : > { %4643 = vmatmul.bf16.gmra.mxu0 %v4383_v1  ;;  %v8753_v62 = vpack.c.b16 %v4416_v38, %v4415_v44  ;;  %v4026_v23 = vadd.f32 %v4025_v8, %v3977_v49  ;;  %v3732_v1 = vadd.f32 %v8659_v54, %v8745_v12  ;;  %v3730_v38 = vadd.f32 %v8659_v54, %v8733_v13  ;;  %v6518_v12 = vld [vmem:[%s9012_s17 + $0x40] sm:$0xff] }
 0x4de   : > { %4257 = vmatmul.bf16.gmra.mxu2 %v8549_v28  ;;  %v3815_v28 = vpack.c.bf16 %v3799_v2, %v3799_v2  ;;  %v4373_v41 = vunpack.c.l.b16 %v3817_v53  ;;  %4943 = vmatpush.bf16.msrb.mxu3 %v6518_v12 }
 0x4df   : > { %v3775_v58 = vpop.f32.mrf.mxu3  ;;  %4687 = vmatmul.bf16.gmra.mxu1 %v8753_v62  ;;  %v4059_v10 = vmax.f32 %v4026_v23, 0.0 }
 0x4e0   : > { %v4371_v35 = vunpack.c.l.b16 %v3815_v28  ;;  %v3776_v34 = vadd.f32 %v3775_v58, %v3727_v45 }
 0x4e1   : > { %v8760_v27 = vpop.f32.mrf.mxu2  ;;  %v4075_v60 = vpack.c.bf16 %v4059_v10, %v4059_v10 }
 0x4e2   : > { %v3978_v6 = vpop.f32.mrf.mxu0  ;;  %v4384_v50 = vpack.c.b16 %v4372_v0, %v4371_v35  ;;  %v3802_v26 = vmax.f32 %v3776_v34, 0.0 }
 0x4e3   : > { %v3979_v61 = vadd.f32 %v8694_v30, %v3978_v6  ;;  %v4027_v33 = vpop.f32.mrf.mxu1  ;;  %v4417_v39 = vunpack.c.l.b16 %v4075_v60 }
 0x4e4   : > { %4301 = vmatmul.bf16.gmra.mxu3 %v8635_v18  ;;  %v3818_v56 = vpack.c.bf16 %v3802_v26, %v3802_v26 }
 0x4e5   : > { %v4028_v46 = vadd.f32 %v4027_v33, %v3979_v61 }
 0x4e6   : > { %v4374_v63 = vunpack.c.l.b16 %v3818_v56 }
 0x4e7   : > { %v4060_v9 = vmax.f32 %v4028_v46, 0.0  ;;  %v3778_v42 = vpop.f32.mrf.mxu3 }
 0x4e8   : > { %v4385_v8 = vpack.c.b16 %v4374_v63, %v4373_v41  ;;  %v3779_v58 = vadd.f32 %v3778_v42, %v3730_v38 }
 0x4e9   : > { %v4076_v7 = vpack.c.bf16 %v4060_v9, %v4060_v9  ;;  %v8766_v31 = vpop.f32.mrf.mxu2 }
 0x4ea   : > { %v3981_v55 = vpop.f32.mrf.mxu0  ;;  %v3803_v10 = vmax.f32 %v3779_v58, 0.0  ;;  %v3737_v37 = vadd.f32 %v8659_v54, %v8766_v31 }
 0x4eb   : > { %v4418_v18 = vunpack.c.l.b16 %v4076_v7  ;;  %v3982_v36 = vadd.f32 %v8694_v30, %v3981_v55  ;;  %v4030_v32 = vpop.f32.mrf.mxu1 }
 0x4ed   : > { %4648 = vmatmul.bf16.gmra.mxu0 %v4384_v50  ;;  %v8771_v16 = vpack.c.b16 %v4418_v18, %v4417_v39  ;;  %v4031_v40 = vadd.f32 %v4030_v32, %v3982_v36  ;;  %v3735_v18 = vadd.f32 %v8659_v54, %v8760_v27 }
 0x4ee   : > { %4262 = vmatmul.bf16.gmra.mxu2 %v8573_v3 }
 0x4ef   : > { %v3780_v29 = vpop.f32.mrf.mxu3  ;;  %4692 = vmatmul.bf16.gmra.mxu1 %v8771_v16  ;;  %v4061_v22 = vmax.f32 %v4031_v40, 0.0 }
 0x4f0   : > { %v3781_v21 = vadd.f32 %v3780_v29, %v3732_v1 }
 0x4f1   : > { %v8778_v5 = vpop.f32.mrf.mxu2  ;;  %v4077_v4 = vpack.c.bf16 %v4061_v22, %v4061_v22 }
 0x4f2   : > { %v3983_v11 = vpop.f32.mrf.mxu0  ;;  %v3804_v6 = vmax.f32 %v3781_v21, 0.0  ;;  %v3740_v21 = vadd.f32 %v8659_v54, %v8778_v5 }
 0x4f3   : > { %v3984_v43 = vadd.f32 %v8694_v30, %v3983_v11  ;;  %v4032_v20 = vpop.f32.mrf.mxu1  ;;  %v4419_v14 = vunpack.c.l.b16 %v4077_v4  ;;  %v8811_v4 = vld [vmem:[%s9009_s14] ss:$0 sm:$0xff] }
 0x4f4   : > { %4306 = vmatmul.bf16.gmra.mxu3 %v8676_v25  ;;  %v3820_v28 = vpack.c.bf16 %v3804_v6, %v3804_v6 }
 0x4f5   : > { %v4033_v3 = vadd.f32 %v4032_v20, %v3984_v43 }
 0x4f6   : > { %v4376_v42 = vunpack.c.l.b16 %v3820_v28 }
 0x4f7   : > { %v4062_v48 = vmax.f32 %v4033_v3, 0.0  ;;  %v3783_v15 = vpop.f32.mrf.mxu3 }
 0x4f8   : > { %v3784_v40 = vadd.f32 %v3783_v15, %v3735_v18 }
 0x4f9   : > { %v4078_v44 = vpack.c.bf16 %v4062_v48, %v4062_v48  ;;  %v8784_v24 = vpop.f32.mrf.mxu2 }
 0x4fa   : > { %v3986_v49 = vpop.f32.mrf.mxu0  ;;  %v3805_v27 = vmax.f32 %v3784_v40, 0.0  ;;  %v6531_v40 = vld [vmem:[%s9014_s19 + $0x28] sm:$0xff] }
 0x4fb   : > { %v4420_v25 = vunpack.c.l.b16 %v4078_v44  ;;  %v3987_v52 = vadd.f32 %v8694_v30, %v3986_v49  ;;  %v4035_v23 = vpop.f32.mrf.mxu1  ;;  %v3742_v49 = vadd.f32 %v8659_v54, %v8784_v24  ;;  %v6533_v54 = vld [vmem:[%s9014_s19 + $0x38] sm:$0xff] }
 0x4fc   : > { %v3821_v63 = vpack.c.bf16 %v3805_v27, %v3805_v27  ;;  %5245 = vmatpush.bf16.msrb.mxu0 %v6533_v54 }
 0x4fd   : > { %4653 = vmatmul.bf16.gmra.mxu0 %v4385_v8  ;;  %v8789_v2 = vpack.c.b16 %v4420_v25, %v4419_v14  ;;  %v4036_v13 = vadd.f32 %v4035_v23, %v3987_v52 }
 0x4fe   : > { %4895 = vmatmul.bf16.vlgmr.msrb.gmra.mxu2 %v8723_v47  ;;  %v3819_v47 = vpack.c.bf16 %v3803_v10, %v3803_v10  ;;  %v4377_v44 = vunpack.c.l.b16 %v3821_v63 }
 0x4ff   : > { %v3785_v57 = vpop.f32.mrf.mxu3  ;;  %4697 = vmatmul.bf16.gmra.mxu1 %v8789_v2  ;;  %v4063_v46 = vmax.f32 %v4036_v13, 0.0 }
 0x500   : > { %v4375_v34 = vunpack.c.l.b16 %v3819_v47  ;;  %v3786_v36 = vadd.f32 %v3785_v57, %v3737_v37 }
 0x501   : > { %v4228_v61 = vpop.f32.mrf.mxu2  ;;  %v4079_v45 = vpack.c.bf16 %v4063_v46, %v4063_v46 }
 0x502   : > { %v3988_v33 = vpop.f32.mrf.mxu0  ;;  %v4386_v19 = vpack.c.b16 %v4376_v42, %v4375_v34  ;;  %v3806_v17 = vmax.f32 %v3786_v36, 0.0  ;;  %v4229_v38 = vadd.f32 %v8811_v4, %v4228_v61  ;;  %v6532_v34 = vld [vmem:[%s9014_s19 + $0x30] sm:$0xff] }
 0x503   : > { %v3989_v0 = vadd.f32 %v8694_v30, %v3988_v33  ;;  %v4037_v60 = vpop.f32.mrf.mxu1  ;;  %v4421_v50 = vunpack.c.l.b16 %v4079_v45  ;;  %5246 = vmatpush.bf16.msrb.mxu0 %v6532_v34 }
 0x504   : > { %4311 = vmatmul.bf16.gmra.mxu3 %v8703_v51  ;;  %v3822_v22 = vpack.c.bf16 %v3806_v17, %v3806_v17 }
 0x505   : > { %v4038_v9 = vadd.f32 %v4037_v60, %v3989_v0 }
 0x507   : > { %v4064_v35 = vmax.f32 %v4038_v9, 0.0  ;;  %v3788_v7 = vpop.f32.mrf.mxu3  ;;  %5247 = vmatpush.bf16.msrb.mxu0 %v6531_v40 }
 0x508   : > { %v3789_v10 = vadd.f32 %v3788_v7, %v3740_v21 }
 0x509   : > { %v4080_v55 = vpack.c.bf16 %v4064_v35, %v4064_v35  ;;  %v4230_v39 = vpop.f32.mrf.mxu2 }
 0x50a   : > { %v3991_v32 = vpop.f32.mrf.mxu0  ;;  %v4231_v24 = vadd.f32 %v8811_v4, %v4230_v39  ;;  %v3807_v60 = vmax.f32 %v3789_v10, 0.0 }
 0x50b   : > { %v4422_v59 = vunpack.c.l.b16 %v4080_v55  ;;  %v3992_v51 = vadd.f32 %v8694_v30, %v3991_v32  ;;  %v4040_v26 = vpop.f32.mrf.mxu1 }
 0x50c   : > { %v3823_v39 = vpack.c.bf16 %v3807_v60, %v3807_v60 }
 0x50d   : > { %4658 = vmatmul.bf16.gmra.mxu0 %v4386_v19  ;;  %v8803_v29 = vpack.c.b16 %v4422_v59, %v4421_v50  ;;  %v4041_v31 = vadd.f32 %v4040_v26, %v3992_v51  ;;  %v6541_v50 = vld [vmem:[%s9014_s19 + $0x78] sm:$0xff] }
 0x50e   : > { %4900 = vmatmul.bf16.gmra.mxu2 %v8753_v62  ;;  %v4378_v62 = vunpack.c.l.b16 %v3822_v22  ;;  %5294 = vmatpush.bf16.msrb.mxu1 %v6541_v50 }
 0x50f   : > { %v3790_v56 = vpop.f32.mrf.mxu3  ;;  %4702 = vmatmul.bf16.gmra.mxu1 %v8803_v29  ;;  %v4065_v20 = vmax.f32 %v4041_v31, 0.0 }
 0x510   : > { %v4387_v23 = vpack.c.b16 %v4378_v62, %v4377_v44  ;;  %v3791_v12 = vadd.f32 %v3790_v56, %v3742_v49  ;;  %v4379_v56 = vunpack.c.l.b16 %v3823_v39  ;;  %v6529_v49 = vld [vmem:[%s9014_s19 + $0x18] sm:$0xff] }
 0x511   : > { %v4233_v11 = vpop.f32.mrf.mxu2  ;;  %v4081_v15 = vpack.c.bf16 %v4065_v20, %v4065_v20 }
 0x512   : > { %v3993_v43 = vpop.f32.mrf.mxu0  ;;  %v3808_v5 = vmax.f32 %v3791_v12, 0.0  ;;  %v4234_v17 = vadd.f32 %v8811_v4, %v4233_v11 }
 0x513   : > { %v3994_v53 = vadd.f32 %v8694_v30, %v3993_v43  ;;  %v4042_v3 = vpop.f32.mrf.mxu1  ;;  %v4423_v58 = vunpack.c.l.b16 %v4081_v15  ;;  %v6530_v15 = vld [vmem:[%s9014_s19 + $0x20] sm:$0xff] }
 0x514   : > { %v3824_v35 = vpack.c.bf16 %v3808_v5, %v3808_v5  ;;  %5248 = vmatpush.bf16.msrb.mxu0 %v6530_v15 }
 0x515   : > { %v4043_v48 = vadd.f32 %v4042_v3, %v3994_v53 }
 0x516   : > { %v4380_v59 = vunpack.c.l.b16 %v3824_v35 }
 0x517   : > { %v4066_v41 = vmax.f32 %v4043_v48, 0.0  ;;  %v4277_v1 = vpop.f32.mrf.mxu3 }
 0x518   : > { %v4278_v25 = vadd.f32 %v4277_v1, %v4229_v38  ;;  %v4388_v62 = vpack.c.b16 %v4380_v59, %v4379_v56  ;;  %5249 = vmatpush.bf16.msrb.mxu0 %v6529_v49 }
 0x519   : > { %v4082_v8 = vpack.c.bf16 %v4066_v41, %v4066_v41  ;;  %v8816_v14 = vpop.f32.mrf.mxu2 }
 0x51a   : > { %v3996_v52 = vpop.f32.mrf.mxu0  ;;  %v4317_v33 = vmax.f32 %v4278_v25, 0.0  ;;  %v4236_v41 = vadd.f32 %v8811_v4, %v8816_v14 }
 0x51b   : > { %v4424_v6 = vunpack.c.l.b16 %v4082_v8  ;;  %v3997_v13 = vadd.f32 %v8694_v30, %v3996_v52  ;;  %v4045_v57 = vpop.f32.mrf.mxu1 }
 0x51c   : > { %v4333_v9 = vpack.c.bf16 %v4317_v33, %v4317_v33 }
 0x51d   : > { %4663 = vmatmul.bf16.gmra.mxu0 %v4387_v23  ;;  %v8821_v61 = vpack.c.b16 %v4424_v6, %v4423_v58  ;;  %v4046_v28 = vadd.f32 %v4045_v57, %v3997_v13 }
 0x51e   : > { %4905 = vmatmul.bf16.gmra.mxu2 %v8771_v16  ;;  %v4461_v36 = vunpack.c.l.b16 %v4333_v9 }
 0x51f   : > { %v4279_v46 = vpop.f32.mrf.mxu3  ;;  %4707 = vmatmul.bf16.gmra.mxu1 %v8821_v61  ;;  %v4067_v7 = vmax.f32 %v4046_v28, 0.0 }
 0x520   : > { %v4280_v0 = vadd.f32 %v4279_v46, %v4231_v24  ;;  %v6540_v24 = vld [vmem:[%s9014_s19 + $0x70] sm:$0xff] }
 0x521   : > { %v8829_v47 = vpop.f32.mrf.mxu2  ;;  %v4083_v51 = vpack.c.bf16 %v4067_v7, %v4067_v7  ;;  %5295 = vmatpush.bf16.msrb.mxu1 %v6540_v24  ;;  %v6526_v7 = vld [vmem:[%s9014_s19] sm:$0xff] }
 0x522   : > { %v4318_v42 = vmax.f32 %v4280_v0, 0.0  ;;  %v3998_v45 = vpop.f32.mrf.mxu0  ;;  %v4239_v28 = vadd.f32 %v8811_v4, %v8829_v47 }
 0x523   : > { %v3999_v16 = vadd.f32 %v8694_v30, %v3998_v45  ;;  %v4047_v37 = vpop.f32.mrf.mxu1  ;;  %v4425_v53 = vunpack.c.l.b16 %v4083_v51 }
 0x524   : > { %v4334_v55 = vpack.c.bf16 %v4318_v42, %v4318_v42 }
 0x525   : > { %v4048_v18 = vadd.f32 %v4047_v37, %v3999_v16 }
 0x526   : > { %v4462_v32 = vunpack.c.l.b16 %v4334_v55 }
 0x527   : > { %v4068_v26 = vmax.f32 %v4048_v18, 0.0  ;;  %v4282_v19 = vpop.f32.mrf.mxu3 }
 0x528   : > { %v4477_v31 = vpack.c.b16 %v4462_v32, %v4461_v36  ;;  %v4283_v43 = vadd.f32 %v4282_v19, %v4234_v17  ;;  %v8882_v17 = vld [vmem:[%s9011_s16] ss:$0 sm:$0xff] }
 0x529   : > { %v4084_v27 = vpack.c.bf16 %v4068_v26, %v4068_v26  ;;  %v4240_v22 = vpop.f32.mrf.mxu2  ;;  %v6539_v26 = vld [vmem:[%s9014_s19 + $0x68] sm:$0xff] }
 0x52a   : > { %4944 = vmatmul.bf16.vlgmr.msrb.gmra.mxu3 %v4477_v31  ;;  %v4001_v20 = vpop.f32.mrf.mxu0  ;;  %v4319_v1 = vmax.f32 %v4283_v43, 0.0  ;;  %v4241_v37 = vadd.f32 %v8811_v4, %v4240_v22  ;;  %5296 = vmatpush.bf16.msrb.mxu1 %v6539_v26 }
 0x52b   : > { %v4426_v3 = vunpack.c.l.b16 %v4084_v27  ;;  %v4002_v63 = vadd.f32 %v8694_v30, %v4001_v20  ;;  %v4050_v48 = vpop.f32.mrf.mxu1 }
 0x52c   : > { %v4335_v25 = vpack.c.bf16 %v4319_v1, %v4319_v1 }
 0x52d   : > { %4668 = vmatmul.bf16.gmra.mxu0 %v4388_v62  ;;  %v8846_v11 = vpack.c.b16 %v4426_v3, %v4425_v53  ;;  %v4051_v44 = vadd.f32 %v4050_v48, %v4002_v63 }
 0x52e   : > { %4910 = vmatmul.bf16.gmra.mxu2 %v8789_v2  ;;  %v6528_v2 = vld [vmem:[%s9014_s19 + $0x10] sm:$0xff]  ;;  %v4463_v57 = vunpack.c.l.b16 %v4335_v25 }
 0x52f   : > { %v4284_v38 = vpop.f32.mrf.mxu3  ;;  %4712 = vmatmul.bf16.gmra.mxu1 %v8846_v11  ;;  %v4069_v58 = vmax.f32 %v4051_v44, 0.0  ;;  %5250 = vmatpush.bf16.msrb.mxu0 %v6528_v2 }
 0x530   : > { %v4285_v8 = vadd.f32 %v4284_v38, %v4236_v41 }
 0x531   : > { %v4243_v21 = vpop.f32.mrf.mxu2  ;;  %v4085_v33 = vpack.c.bf16 %v4069_v58, %v4069_v58 }
 0x532   : > { %v4320_v52 = vmax.f32 %v4285_v8, 0.0  ;;  %v4003_v23 = vpop.f32.mrf.mxu0  ;;  %v4244_v40 = vadd.f32 %v8811_v4, %v4243_v21 }
 0x533   : > { %v4004_v14 = vadd.f32 %v8694_v30, %v4003_v23  ;;  %v4052_v6 = vpop.f32.mrf.mxu1  ;;  %v6527_v30 = vld [vmem:[%s9014_s19 + $0x8] sm:$0xff]  ;;  %v4427_v45 = vunpack.c.l.b16 %v4085_v33  ;;  %v6538_v23 = vld [vmem:[%s9014_s19 + $0x60] sm:$0xff] }
 0x534   : > { %v4336_v12 = vpack.c.bf16 %v4320_v52, %v4320_v52  ;;  %5251 = vmatpush.bf16.msrb.mxu0 %v6527_v30  ;;  %5297 = vmatpush.bf16.msrb.mxu1 %v6538_v23  ;;  %v6536_v23 = vld [vmem:[%s9014_s19 + $0x50] sm:$0xff] }
 0x535   : > { %v4053_v13 = vadd.f32 %v4052_v6, %v4004_v14 }
 0x536   : > { %v4464_v10 = vunpack.c.l.b16 %v4336_v12 }
 0x537   : > { %v4070_v54 = vmax.f32 %v4053_v13, 0.0  ;;  %v4287_v5 = vpop.f32.mrf.mxu3 }
 0x538   : > { %v4478_v46 = vpack.c.b16 %v4464_v10, %v4463_v57  ;;  %v4288_v9 = vadd.f32 %v4287_v5, %v4239_v28  ;;  %5252 = vmatpush.bf16.msrb.mxu0 %v6526_v7 }
 0x539   : > { %v4086_v0 = vpack.c.bf16 %v4070_v54, %v4070_v54  ;;  %v4245_v60 = vpop.f32.mrf.mxu2 }
 0x53a   : > { %4949 = vmatmul.bf16.gmra.mxu3 %v4478_v46  ;;  %v4634_v42 = vpop.f32.mrf.mxu0  ;;  %v4321_v34 = vmax.f32 %v4288_v9, 0.0  ;;  %v4246_v20 = vadd.f32 %v8811_v4, %v4245_v60 }
 0x53b   : > { %v4428_v35 = vunpack.c.l.b16 %v4086_v0  ;;  %v4635_v43 = vadd.f32 %v8882_v17, %v4634_v42 }
 0x53c   : > { %v4337_v18 = vpack.c.bf16 %v4321_v34, %v4321_v34 }
 0x53d   : > { %v8870_v16 = vpack.c.b16 %v4428_v35, %v4427_v45 }
 0x53e   : > { %4915 = vmatmul.bf16.gmra.mxu2 %v8803_v29  ;;  %v4465_v59 = vunpack.c.l.b16 %v4337_v18 }
 0x53f   : > { %v4289_v47 = vpop.f32.mrf.mxu3  ;;  %4717 = vmatmul.bf16.gmra.mxu1 %v8870_v16 }
 0x540   : > { %v4290_v55 = vadd.f32 %v4289_v47, %v4241_v37 }
 0x541   : > { %v4248_v39 = vpop.f32.mrf.mxu2 }
 0x542   : > { %v4322_v36 = vmax.f32 %v4290_v55, 0.0  ;;  %v4636_v32 = vpop.f32.mrf.mxu0  ;;  %v4249_v2 = vadd.f32 %v8811_v4, %v4248_v39 }
 0x543   : > { %v4637_v44 = vadd.f32 %v8882_v17, %v4636_v32 }
 0x544   : > { %v4338_v50 = vpack.c.bf16 %v4322_v36, %v4322_v36 }
 0x546   : > { %v4466_v51 = vunpack.c.l.b16 %v4338_v50 }
 0x547   : > { %v4292_v19 = vpop.f32.mrf.mxu3 }
 0x548   : > { %v4479_v29 = vpack.c.b16 %v4466_v51, %v4465_v59  ;;  %v4293_v56 = vadd.f32 %v4292_v19, %v4244_v40 }
 0x549   : > { %v4250_v31 = vpop.f32.mrf.mxu2 }
 0x54a   : > { %4954 = vmatmul.bf16.gmra.mxu3 %v4479_v29  ;;  %v4639_v27 = vpop.f32.mrf.mxu0  ;;  %v4323_v53 = vmax.f32 %v4293_v56, 0.0  ;;  %v4251_v28 = vadd.f32 %v8811_v4, %v4250_v31 }
 0x54b   : > { %v4640_v5 = vadd.f32 %v8882_v17, %v4639_v27 }
 0x54c   : > { %v4683_v22 = vpop.f32.mrf.mxu1  ;;  %v4339_v15 = vpack.c.bf16 %v4323_v53, %v4323_v53 }
 0x54d   : > { %v4684_v3 = vadd.f32 %v4683_v22, %v4635_v43 }
 0x54e   : > { %4920 = vmatmul.bf16.gmra.mxu2 %v8821_v61  ;;  %v4467_v25 = vunpack.c.l.b16 %v4339_v15 }
 0x54f   : > { %v4294_v63 = vpop.f32.mrf.mxu3  ;;  %v4723_v38 = vmax.f32 %v4684_v3, 0.0 }
 0x550   : > { %v4295_v48 = vadd.f32 %v4294_v63, %v4246_v20 }
 0x551   : > { %v4253_v62 = vpop.f32.mrf.mxu2  ;;  %v4739_v61 = vpack.c.bf16 %v4723_v38, %v4723_v38 }
 0x552   : > { %v4324_v41 = vmax.f32 %v4295_v48, 0.0  ;;  %v4641_v1 = vpop.f32.mrf.mxu0  ;;  %v4254_v51 = vadd.f32 %v8811_v4, %v4253_v62 }
 0x553   : > { %v5033_v24 = vunpack.c.l.b16 %v4739_v61  ;;  %v4642_v7 = vadd.f32 %v8882_v17, %v4641_v1 }
 0x554   : > { %v4340_v49 = vpack.c.bf16 %v4324_v41, %v4324_v41  ;;  %v4685_v8 = vpop.f32.mrf.mxu1 }
 0x555   : > { %v4686_v21 = vadd.f32 %v4685_v8, %v4637_v44 }
 0x556   : > { %v4468_v52 = vunpack.c.l.b16 %v4340_v49 }
 0x557   : > { %v4724_v58 = vmax.f32 %v4686_v21, 0.0  ;;  %v4297_v14 = vpop.f32.mrf.mxu3 }
 0x558   : > { %v4480_v12 = vpack.c.b16 %v4468_v52, %v4467_v25  ;;  %v4298_v57 = vadd.f32 %v4297_v14, %v4249_v2 }
 0x559   : > { %v4740_v6 = vpack.c.bf16 %v4724_v58, %v4724_v58  ;;  %v4255_v13 = vpop.f32.mrf.mxu2 }
 0x55a   : > { %4959 = vmatmul.bf16.gmra.mxu3 %v4480_v12  ;;  %v4644_v10 = vpop.f32.mrf.mxu0  ;;  %v4325_v46 = vmax.f32 %v4298_v57, 0.0  ;;  %v4256_v53 = vadd.f32 %v8811_v4, %v4255_v13 }
 0x55b   : > { %v5034_v33 = vunpack.c.l.b16 %v4740_v6  ;;  %v4645_v22 = vadd.f32 %v8882_v17, %v4644_v10 }
 0x55c   : > { %v4688_v54 = vpop.f32.mrf.mxu1  ;;  %v4341_v42 = vpack.c.bf16 %v4325_v46, %v4325_v46 }
 0x55d   : > { %v5049_v30 = vpack.c.b16 %v5034_v33, %v5033_v24  ;;  %v4689_v0 = vadd.f32 %v4688_v54, %v4640_v5 }
 0x55e   : > { %4925 = vmatmul.bf16.gmra.mxu2 %v8846_v11  ;;  %v4469_v18 = vunpack.c.l.b16 %v4341_v42  ;;  %v6537_v11 = vld [vmem:[%s9014_s19 + $0x58] sm:$0xff] }
 0x55f   : > { %v4299_v60 = vpop.f32.mrf.mxu3  ;;  %5253 = vmatmul.bf16.vlgmr.msrb.gmra.mxu0 %v5049_v30  ;;  %v4725_v37 = vmax.f32 %v4689_v0, 0.0  ;;  %5298 = vmatpush.bf16.msrb.mxu1 %v6537_v11 }
 0x560   : > { %v4300_v9 = vadd.f32 %v4299_v60, %v4251_v28 }
 0x561   : > { %v4258_v34 = vpop.f32.mrf.mxu2  ;;  %v4741_v32 = vpack.c.bf16 %v4725_v37, %v4725_v37  ;;  %v6535_v37 = vld [vmem:[%s9014_s19 + $0x48] sm:$0xff] }
 0x562   : > { %v4326_v45 = vmax.f32 %v4300_v9, 0.0  ;;  %v4646_v35 = vpop.f32.mrf.mxu0  ;;  %v4259_v2 = vadd.f32 %v8811_v4, %v4258_v34 }
 0x563   : > { %v5035_v31 = vunpack.c.l.b16 %v4741_v32  ;;  %v4647_v44 = vadd.f32 %v8882_v17, %v4646_v35  ;;  %5299 = vmatpush.bf16.msrb.mxu1 %v6536_v23 }
 0x564   : > { %v4342_v47 = vpack.c.bf16 %v4326_v45, %v4326_v45  ;;  %v4690_v55 = vpop.f32.mrf.mxu1 }
 0x565   : > { %v4691_v39 = vadd.f32 %v4690_v55, %v4642_v7 }
 0x566   : > { %v4470_v36 = vunpack.c.l.b16 %v4342_v47 }
 0x567   : > { %v4726_v50 = vmax.f32 %v4691_v39, 0.0  ;;  %v4302_v59 = vpop.f32.mrf.mxu3  ;;  %5300 = vmatpush.bf16.msrb.mxu1 %v6535_v37 }
 0x568   : > { %v4481_v26 = vpack.c.b16 %v4470_v36, %v4469_v18  ;;  %v4303_v40 = vadd.f32 %v4302_v59, %v4254_v51 }
 0x569   : > { %v4742_v19 = vpack.c.bf16 %v4726_v50, %v4726_v50  ;;  %v4260_v43 = vpop.f32.mrf.mxu2 }
 0x56a   : > { %4964 = vmatmul.bf16.gmra.mxu3 %v4481_v26  ;;  %v4649_v29 = vpop.f32.mrf.mxu0  ;;  %v4327_v3 = vmax.f32 %v4303_v40, 0.0  ;;  %v4261_v30 = vadd.f32 %v8811_v4, %v4260_v43 }
 0x56b   : > { %v5036_v56 = vunpack.c.l.b16 %v4742_v19  ;;  %v4650_v54 = vadd.f32 %v8882_v17, %v4649_v29 }
 0x56c   : > { %v4693_v27 = vpop.f32.mrf.mxu1  ;;  %v4343_v15 = vpack.c.bf16 %v4327_v3, %v4327_v3 }
 0x56d   : > { %v5050_v20 = vpack.c.b16 %v5036_v56, %v5035_v31  ;;  %v4694_v63 = vadd.f32 %v4693_v27, %v4645_v22 }
 0x56e   : > { %4930 = vmatmul.bf16.gmra.mxu2 %v8870_v16  ;;  %v4471_v25 = vunpack.c.l.b16 %v4343_v15 }
 0x56f   : > { %v4304_v48 = vpop.f32.mrf.mxu3  ;;  %5258 = vmatmul.bf16.gmra.mxu0 %v5050_v20  ;;  %v4727_v38 = vmax.f32 %v4694_v63, 0.0 }
 0x570   : > { %v4305_v62 = vadd.f32 %v4304_v48, %v4256_v53 }
 0x571   : > { %v4743_v16 = vpack.c.bf16 %v4727_v38, %v4727_v38  ;;  %v4263_v61 = vpop.f32.mrf.mxu2 }
 0x572   : > { %v4328_v41 = vmax.f32 %v4305_v62, 0.0  ;;  %v4651_v1 = vpop.f32.mrf.mxu0  ;;  %v4264_v59 = vadd.f32 %v8811_v4, %v4263_v61 }
 0x573   : > { %v5037_v10 = vunpack.c.l.b16 %v4743_v16  ;;  %v4652_v35 = vadd.f32 %v8882_v17, %v4651_v1 }
 0x574   : > { %v4344_v49 = vpack.c.bf16 %v4328_v41, %v4328_v41  ;;  %v4695_v8 = vpop.f32.mrf.mxu1 }
 0x575   : > { %v4696_v21 = vadd.f32 %v4695_v8, %v4647_v44 }
 0x576   : > { %v4472_v52 = vunpack.c.l.b16 %v4344_v49  ;;  %v6534_v49 = vld [vmem:[%s9014_s19 + $0x40] sm:$0xff] }
 0x577   : > { %v4728_v58 = vmax.f32 %v4696_v21, 0.0  ;;  %v4307_v14 = vpop.f32.mrf.mxu3  ;;  %5301 = vmatpush.bf16.msrb.mxu1 %v6534_v49 }
 0x578   : > { %v4482_v12 = vpack.c.b16 %v4472_v52, %v4471_v25  ;;  %v4308_v13 = vadd.f32 %v4307_v14, %v4259_v2 }
 0x579   : > { %v4744_v6 = vpack.c.bf16 %v4728_v58, %v4728_v58  ;;  %v4265_v9 = vpop.f32.mrf.mxu2 }
 0x57a   : > { %4969 = vmatmul.bf16.gmra.mxu3 %v4482_v12  ;;  %v4654_v57 = vpop.f32.mrf.mxu0  ;;  %v4329_v28 = vmax.f32 %v4308_v13, 0.0  ;;  %v4266_v43 = vadd.f32 %v8811_v4, %v4265_v9  ;;  %v8926_v9 = vld [vmem:[%s9013_s18] ss:$0 sm:$0xff] }
 0x57b   : > { %v5038_v24 = vunpack.c.l.b16 %v4744_v6  ;;  %v4655_v27 = vadd.f32 %v8882_v17, %v4654_v57 }
 0x57c   : > { %v4698_v33 = vpop.f32.mrf.mxu1  ;;  %v4345_v42 = vpack.c.bf16 %v4329_v28, %v4329_v28 }
 0x57d   : > { %v5051_v5 = vpack.c.b16 %v5038_v24, %v5037_v10  ;;  %v4699_v46 = vadd.f32 %v4698_v33, %v4650_v54 }
 0x57e   : > { %v4473_v18 = vunpack.c.l.b16 %v4345_v42 }
 0x57f   : > { %v4309_v0 = vpop.f32.mrf.mxu3  ;;  %5263 = vmatmul.bf16.gmra.mxu0 %v5051_v5  ;;  %v4729_v7 = vmax.f32 %v4699_v46, 0.0 }
 0x580   : > { %v4310_v60 = vadd.f32 %v4309_v0, %v4261_v30 }
 0x581   : > { %v4745_v11 = vpack.c.bf16 %v4729_v7, %v4729_v7  ;;  %v4896_v29 = vpop.f32.mrf.mxu2 }
 0x582   : > { %v4330_v45 = vmax.f32 %v4310_v60, 0.0  ;;  %v4656_v47 = vpop.f32.mrf.mxu0 }
 0x583   : > { %v5039_v40 = vunpack.c.l.b16 %v4745_v11  ;;  %v4657_v41 = vadd.f32 %v8882_v17, %v4656_v47 }
 0x584   : > { %v4346_v34 = vpack.c.bf16 %v4330_v45, %v4330_v45  ;;  %v4700_v55 = vpop.f32.mrf.mxu1 }
 0x585   : > { %v4701_v39 = vadd.f32 %v4700_v55, %v4652_v35  ;;  %v4897_v55 = vadd.f32 %v8926_v9, %v4896_v29 }
 0x586   : > { %v4474_v36 = vunpack.c.l.b16 %v4346_v34 }
 0x587   : > { %v4730_v32 = vmax.f32 %v4701_v39, 0.0  ;;  %v4312_v50 = vpop.f32.mrf.mxu3 }
 0x588   : > { %v4483_v51 = vpack.c.b16 %v4474_v36, %v4473_v18  ;;  %v4313_v19 = vadd.f32 %v4312_v50, %v4264_v59 }
 0x589   : > { %v4746_v26 = vpack.c.bf16 %v4730_v32, %v4730_v32  ;;  %v4898_v8 = vpop.f32.mrf.mxu2 }
 0x58a   : > { %4974 = vmatmul.bf16.gmra.mxu3 %v4483_v51  ;;  %v4331_v20 = vmax.f32 %v4313_v19, 0.0  ;;  %v4659_v53 = vpop.f32.mrf.mxu0  ;;  %v4899_v50 = vadd.f32 %v8926_v9, %v4898_v8 }
 0x58b   : > { %v5040_v31 = vunpack.c.l.b16 %v4746_v26  ;;  %v4660_v6 = vadd.f32 %v8882_v17, %v4659_v53 }
 0x58c   : > { %v4703_v56 = vpop.f32.mrf.mxu1  ;;  %v4347_v62 = vpack.c.bf16 %v4331_v20, %v4331_v20 }
 0x58d   : > { %v5052_v22 = vpack.c.b16 %v5040_v31, %v5039_v40  ;;  %v4704_v3 = vadd.f32 %v4703_v56, %v4655_v27 }
 0x58e   : > { %v4475_v4 = vunpack.c.l.b16 %v4347_v62 }
 0x58f   : > { %v4314_v63 = vpop.f32.mrf.mxu3  ;;  %5268 = vmatmul.bf16.gmra.mxu0 %v5052_v22  ;;  %v4731_v1 = vmax.f32 %v4704_v3, 0.0 }
 0x590   : > { %v4315_v48 = vadd.f32 %v4314_v63, %v4266_v43 }
 0x591   : > { %v4747_v52 = vpack.c.bf16 %v4731_v1, %v4731_v1  ;;  %v4901_v57 = vpop.f32.mrf.mxu2 }
 0x592   : > { %v4332_v15 = vmax.f32 %v4315_v48, 0.0  ;;  %v4661_v16 = vpop.f32.mrf.mxu0 }
 0x593   : > { %v5041_v14 = vunpack.c.l.b16 %v4747_v52  ;;  %v4662_v33 = vadd.f32 %v8882_v17, %v4661_v16 }
 0x594   : > { %v4348_v44 = vpack.c.bf16 %v4332_v15, %v4332_v15  ;;  %v4705_v38 = vpop.f32.mrf.mxu1 }
 0x595   : > { %v4706_v21 = vadd.f32 %v4705_v38, %v4657_v41  ;;  %v4902_v38 = vadd.f32 %v8926_v9, %v4901_v57 }
 0x596   : > { %v4476_v25 = vunpack.c.l.b16 %v4348_v44 }
 0x597   : > { %v4732_v23 = vmax.f32 %v4706_v21, 0.0 }
 0x598   : > { %v4484_v61 = vpack.c.b16 %v4476_v25, %v4475_v4 }
 0x599   : > { %v4748_v58 = vpack.c.bf16 %v4732_v23, %v4732_v23  ;;  %v4903_v0 = vpop.f32.mrf.mxu2 }
 0x59a   : > { %4979 = vmatmul.bf16.gmra.mxu3 %v4484_v61  ;;  %v4664_v24 = vpop.f32.mrf.mxu0  ;;  %v4904_v23 = vadd.f32 %v8926_v9, %v4903_v0 }
 0x59b   : > { %v5042_v2 = vunpack.c.l.b16 %v4748_v58  ;;  %v4665_v37 = vadd.f32 %v8882_v17, %v4664_v24 }
 0x59c   : > { %v4708_v12 = vpop.f32.mrf.mxu1 }
 0x59d   : > { %v5053_v13 = vpack.c.b16 %v5042_v2, %v5041_v14  ;;  %v4709_v10 = vadd.f32 %v4708_v12, %v4660_v6 }
 0x59f   : > { %5273 = vmatmul.bf16.gmra.mxu0 %v5053_v13  ;;  %v4733_v54 = vmax.f32 %v4709_v10, 0.0 }
 0x5a1   : > { %v4749_v28 = vpack.c.bf16 %v4733_v54, %v4733_v54  ;;  %v4906_v36 = vpop.f32.mrf.mxu2 }
 0x5a2   : > { %v4666_v35 = vpop.f32.mrf.mxu0  ;;  %v4907_v0 = vadd.f32 %v8926_v9, %v4906_v36 }
 0x5a3   : > { %v5043_v42 = vunpack.c.l.b16 %v4749_v28  ;;  %v4667_v11 = vadd.f32 %v8882_v17, %v4666_v35 }
 0x5a4   : > { %v4710_v5 = vpop.f32.mrf.mxu1 }
 0x5a5   : > { %v4711_v30 = vadd.f32 %v4710_v5, %v4662_v33 }
 0x5a7   : > { %v4734_v46 = vmax.f32 %v4711_v30, 0.0 }
 0x5a9   : > { %v4750_v60 = vpack.c.bf16 %v4734_v46, %v4734_v46  ;;  %v4908_v15 = vpop.f32.mrf.mxu2 }
 0x5aa   : > { %v4669_v40 = vpop.f32.mrf.mxu0  ;;  %v4909_v35 = vadd.f32 %v8926_v9, %v4908_v15 }
 0x5ab   : > { %v5044_v45 = vunpack.c.l.b16 %v4750_v60  ;;  %v4670_v41 = vadd.f32 %v8882_v17, %v4669_v40 }
 0x5ac   : > { %v4713_v7 = vpop.f32.mrf.mxu1 }
 0x5ad   : > { %v4945_v34 = vpop.f32.mrf.mxu3  ;;  %v5054_v47 = vpack.c.b16 %v5044_v45, %v5043_v42  ;;  %v4714_v39 = vadd.f32 %v4713_v7, %v4665_v37 }
 0x5ae   : > { %v4946_v18 = vadd.f32 %v4945_v34, %v4897_v55 }
 0x5af   : > { %5278 = vmatmul.bf16.gmra.mxu0 %v5054_v47  ;;  %v4735_v32 = vmax.f32 %v4714_v39, 0.0 }
 0x5b0   : > { %v4985_v59 = vmax.f32 %v4946_v18, 0.0 }
 0x5b1   : > { %v4751_v56 = vpack.c.bf16 %v4735_v32, %v4735_v32  ;;  %v4911_v12 = vpop.f32.mrf.mxu2 }
 0x5b2   : > { %v5001_v22 = vpack.c.bf16 %v4985_v59, %v4985_v59  ;;  %v4671_v21 = vpop.f32.mrf.mxu0  ;;  %v4912_v59 = vadd.f32 %v8926_v9, %v4911_v12 }
 0x5b3   : > { %v5045_v53 = vunpack.c.l.b16 %v4751_v56  ;;  %v4672_v25 = vadd.f32 %v8882_v17, %v4671_v21 }
 0x5b4   : > { %v4715_v51 = vpop.f32.mrf.mxu1  ;;  %v5081_v63 = vunpack.c.l.b16 %v5001_v22 }
 0x5b5   : > { %v4716_v26 = vadd.f32 %v4715_v51, %v4667_v11  ;;  %v4947_v19 = vpop.f32.mrf.mxu3 }
 0x5b6   : > { %v4948_v31 = vadd.f32 %v4947_v19, %v4899_v50 }
 0x5b7   : > { %v4736_v27 = vmax.f32 %v4716_v26, 0.0 }
 0x5b8   : > { %v4986_v43 = vmax.f32 %v4948_v31, 0.0 }
 0x5b9   : > { %v4752_v29 = vpack.c.bf16 %v4736_v27, %v4736_v27  ;;  %v4913_v45 = vpop.f32.mrf.mxu2 }
 0x5ba   : > { %v5002_v20 = vpack.c.bf16 %v4986_v43, %v4986_v43  ;;  %v4914_v26 = vadd.f32 %v8926_v9, %v4913_v45 }
 0x5bb   : > { %v5046_v3 = vunpack.c.l.b16 %v4752_v29 }
 0x5bc   : > { %v5082_v48 = vunpack.c.l.b16 %v5002_v20  ;;  %v4718_v62 = vpop.f32.mrf.mxu1 }
 0x5bd   : > { %v4950_v1 = vpop.f32.mrf.mxu3  ;;  %v5055_v44 = vpack.c.b16 %v5046_v3, %v5045_v53  ;;  %v4719_v8 = vadd.f32 %v4718_v62, %v4670_v41 }
 0x5be   : > { %v5097_v49 = vpack.c.b16 %v5082_v48, %v5081_v63  ;;  %v4951_v4 = vadd.f32 %v4950_v1, %v4902_v38 }
 0x5bf   : > { %5283 = vmatmul.bf16.gmra.mxu0 %v5055_v44  ;;  %v4737_v52 = vmax.f32 %v4719_v8, 0.0 }
 0x5c0   : > { %5302 = vmatmul.bf16.vlgmr.msrb.gmra.mxu1 %v5097_v49  ;;  %v4987_v16 = vmax.f32 %v4951_v4, 0.0 }
 0x5c1   : > { %v4753_v6 = vpack.c.bf16 %v4737_v52, %v4737_v52  ;;  %v4916_v18 = vpop.f32.mrf.mxu2 }
 0x5c2   : > { %v5003_v57 = vpack.c.bf16 %v4987_v16, %v4987_v16  ;;  %v4917_v3 = vadd.f32 %v8926_v9, %v4916_v18 }
 0x5c3   : > { %v5047_v54 = vunpack.c.l.b16 %v4753_v6 }
 0x5c4   : > { %v4720_v61 = vpop.f32.mrf.mxu1  ;;  %v5083_v30 = vunpack.c.l.b16 %v5003_v57 }
 0x5c5   : > { %v4721_v58 = vadd.f32 %v4720_v61, %v4672_v25  ;;  %v4952_v14 = vpop.f32.mrf.mxu3 }
 0x5c6   : > { %v4953_v2 = vadd.f32 %v4952_v14, %v4904_v23 }
 0x5c7   : > { %v4738_v13 = vmax.f32 %v4721_v58, 0.0 }
 0x5c8   : > { %v4988_v10 = vmax.f32 %v4953_v2, 0.0 }
 0x5c9   : > { %v4754_v24 = vpack.c.bf16 %v4738_v13, %v4738_v13  ;;  %v4918_v40 = vpop.f32.mrf.mxu2 }
 0x5ca   : > { %v5004_v33 = vpack.c.bf16 %v4988_v10, %v4988_v10  ;;  %v4919_v15 = vadd.f32 %v8926_v9, %v4918_v40 }
 0x5cb   : > { %v5048_v5 = vunpack.c.l.b16 %v4754_v24 }
 0x5cc   : > { %v5084_v28 = vunpack.c.l.b16 %v5004_v33 }
 0x5cd   : > { %v4955_v17 = vpop.f32.mrf.mxu3  ;;  %v5056_v46 = vpack.c.b16 %v5048_v5, %v5047_v54 }
 0x5ce   : > { %v5098_v60 = vpack.c.b16 %v5084_v28, %v5083_v30  ;;  %v4956_v42 = vadd.f32 %v4955_v17, %v4907_v0 }
 0x5cf   : > { %5288 = vmatmul.bf16.gmra.mxu0 %v5056_v46 }
 0x5d0   : > { %5307 = vmatmul.bf16.gmra.mxu1 %v5098_v60  ;;  %v4989_v7 = vmax.f32 %v4956_v42, 0.0 }
 0x5d1   : > { %v4921_v48 = vpop.f32.mrf.mxu2 }
 0x5d2   : > { %v5005_v47 = vpack.c.bf16 %v4989_v7, %v4989_v7  ;;  %v4922_v23 = vadd.f32 %v8926_v9, %v4921_v48 }
 0x5d4   : > { %v5085_v11 = vunpack.c.l.b16 %v5005_v47 }
 0x5d5   : > { %v4957_v37 = vpop.f32.mrf.mxu3 }
 0x5d6   : > { %v4958_v34 = vadd.f32 %v4957_v37, %v4909_v35 }
 0x5d8   : > { %v4990_v55 = vmax.f32 %v4958_v34, 0.0 }
 0x5d9   : > { %v4923_v8 = vpop.f32.mrf.mxu2 }
 0x5da   : > { %v5006_v39 = vpack.c.bf16 %v4990_v55, %v4990_v55  ;;  %v4924_v14 = vadd.f32 %v8926_v9, %v4923_v8 }
 0x5dc   : > { %v5086_v32 = vunpack.c.l.b16 %v5006_v39  ;;  %v5254_v34 = vpop.f32.mrf.mxu0 }
 0x5dd   : > { %v4960_v50 = vpop.f32.mrf.mxu3 }
 0x5de   : > { %v5099_v36 = vpack.c.b16 %v5086_v32, %v5085_v11  ;;  %v4961_v51 = vadd.f32 %v4960_v50, %v4912_v59 }
 0x5e0   : > { %5312 = vmatmul.bf16.gmra.mxu1 %v5099_v36  ;;  %v4991_v19 = vmax.f32 %v4961_v51, 0.0 }
 0x5e1   : > { %v4926_v58 = vpop.f32.mrf.mxu2 }
 0x5e2   : > { %v5007_v27 = vpack.c.bf16 %v4991_v19, %v4991_v19  ;;  %v4927_v30 = vadd.f32 %v8926_v9, %v4926_v58 }
 0x5e4   : > { %v5087_v29 = vunpack.c.l.b16 %v5007_v27  ;;  %v5256_v51 = vpop.f32.mrf.mxu0 }
 0x5e5   : > { %v4962_v31 = vpop.f32.mrf.mxu3 }
 0x5e6   : > { %v4963_v56 = vadd.f32 %v4962_v31, %v4914_v26 }
 0x5e8   : > { %v4992_v22 = vmax.f32 %v4963_v56, 0.0 }
 0x5e9   : > { %v4928_v54 = vpop.f32.mrf.mxu2 }
 0x5ea   : > { %v5008_v43 = vpack.c.bf16 %v4992_v22, %v4992_v22  ;;  %v4929_v46 = vadd.f32 %v8926_v9, %v4928_v54 }
 0x5ec   : > { %v5088_v20 = vunpack.c.l.b16 %v5008_v43 }
 0x5ed   : > { %v4965_v53 = vpop.f32.mrf.mxu3 }
 0x5ee   : > { %v5100_v63 = vpack.c.b16 %v5088_v20, %v5087_v29  ;;  %v4966_v62 = vadd.f32 %v4965_v53, %v4917_v3  ;;  %v5259_v29 = vpop.f32.mrf.mxu0  ;;  %v8951_v20 = vld [vmem:[%s9015_s20] ss:$0 sm:$0xff] }
 0x5f0   : > { %5317 = vmatmul.bf16.gmra.mxu1 %v5100_v63  ;;  %v4993_v41 = vmax.f32 %v4966_v62, 0.0  ;;  %v5257_v62 = vadd.f32 %v8951_v20, %v5256_v51 }
 0x5f1   : > { %v4931_v45 = vpop.f32.mrf.mxu2 }
 0x5f2   : > { %v5009_v38 = vpack.c.bf16 %v4993_v41, %v4993_v41  ;;  %v4932_v18 = vadd.f32 %v8926_v9, %v4931_v45 }
 0x5f4   : > { %v5089_v4 = vunpack.c.l.b16 %v5009_v38 }
 0x5f5   : > { %v4967_v1 = vpop.f32.mrf.mxu3 }
 0x5f6   : > { %v4968_v44 = vadd.f32 %v4967_v1, %v4919_v15  ;;  %v5261_v53 = vpop.f32.mrf.mxu0  ;;  %v5260_v1 = vadd.f32 %v8951_v20, %v5259_v29 }
 0x5f7   : > { %v5262_v8 = vadd.f32 %v8951_v20, %v5261_v53 }
 0x5f8   : > { %v4994_v49 = vmax.f32 %v4968_v44, 0.0 }
 0x5f9   : > { %v4933_v50 = vpop.f32.mrf.mxu2 }
 0x5fa   : > { %v5010_v21 = vpack.c.bf16 %v4994_v49, %v4994_v49  ;;  %v4934_v59 = vadd.f32 %v8926_v9, %v4933_v50  ;;  %v5255_v9 = vadd.f32 %v8951_v20, %v5254_v34 }
 0x5fc   : > { %v5090_v25 = vunpack.c.l.b16 %v5010_v21 }
 0x5fd   : > { %v4970_v52 = vpop.f32.mrf.mxu3 }
 0x5fe   : > { %v5101_v16 = vpack.c.b16 %v5090_v25, %v5089_v4  ;;  %v4971_v61 = vadd.f32 %v4970_v52, %v4922_v23  ;;  %v5264_v48 = vpop.f32.mrf.mxu0 }
 0x5ff   : > { %v5265_v52 = vadd.f32 %v8951_v20, %v5264_v48 }
 0x600   : > { %5322 = vmatmul.bf16.gmra.mxu1 %v5101_v16  ;;  %v4995_v2 = vmax.f32 %v4971_v61, 0.0 }
 0x602   : > { %v5011_v13 = vpack.c.bf16 %v4995_v2, %v4995_v2 }
 0x604   : > { %v5091_v24 = vunpack.c.l.b16 %v5011_v13 }
 0x605   : > { %v4972_v12 = vpop.f32.mrf.mxu3 }
 0x606   : > { %v4973_v6 = vadd.f32 %v4972_v12, %v4924_v14  ;;  %v5266_v44 = vpop.f32.mrf.mxu0 }
 0x607   : > { %v5267_v58 = vadd.f32 %v8951_v20, %v5266_v44 }
 0x608   : > { %v4996_v57 = vmax.f32 %v4973_v6, 0.0 }
 0x60a   : > { %v5012_v10 = vpack.c.bf16 %v4996_v57, %v4996_v57 }
 0x60c   : > { %v5092_v33 = vunpack.c.l.b16 %v5012_v10 }
 0x60d   : > { %v4975_v5 = vpop.f32.mrf.mxu3 }
 0x60e   : > { %v5102_v28 = vpack.c.b16 %v5092_v33, %v5091_v24  ;;  %v4976_v17 = vadd.f32 %v4975_v5, %v4927_v30  ;;  %v5269_v25 = vpop.f32.mrf.mxu0 }
 0x60f   : > { %v5270_v6 = vadd.f32 %v8951_v20, %v5269_v25 }
 0x610   : > { %5327 = vmatmul.bf16.gmra.mxu1 %v5102_v28  ;;  %v4997_v0 = vmax.f32 %v4976_v17, 0.0 }
 0x612   : > { %v5013_v35 = vpack.c.bf16 %v4997_v0, %v4997_v0 }
 0x614   : > { %v5093_v47 = vunpack.c.l.b16 %v5013_v35 }
 0x615   : > { %v4977_v60 = vpop.f32.mrf.mxu3 }
 0x616   : > { %v4978_v42 = vadd.f32 %v4977_v60, %v4929_v46  ;;  %v5271_v61 = vpop.f32.mrf.mxu0 }
 0x617   : > { %v5272_v10 = vadd.f32 %v8951_v20, %v5271_v61 }
 0x618   : > { %v4998_v7 = vmax.f32 %v4978_v42, 0.0 }
 0x61a   : > { %v5014_v37 = vpack.c.bf16 %v4998_v7, %v4998_v7 }
 0x61c   : > { %v5094_v55 = vunpack.c.l.b16 %v5014_v37 }
 0x61d   : > { %v4980_v39 = vpop.f32.mrf.mxu3 }
 0x61e   : > { %v5103_v11 = vpack.c.b16 %v5094_v55, %v5093_v47  ;;  %v4981_v32 = vadd.f32 %v4980_v39, %v4932_v18  ;;  %v5274_v12 = vpop.f32.mrf.mxu0 }
 0x61f   : > { %v5275_v5 = vadd.f32 %v8951_v20, %v5274_v12 }
 0x620   : > { %5332 = vmatmul.bf16.gmra.mxu1 %v5103_v11  ;;  %v4999_v36 = vmax.f32 %v4981_v32, 0.0 }
 0x622   : > { %v5015_v40 = vpack.c.bf16 %v4999_v36, %v4999_v36 }
 0x624   : > { %v5095_v27 = vunpack.c.l.b16 %v5015_v40 }
 0x625   : > { %v4982_v26 = vpop.f32.mrf.mxu3 }
 0x626   : > { %v4983_v19 = vadd.f32 %v4982_v26, %v4934_v59  ;;  %v5276_v24 = vpop.f32.mrf.mxu0 }
 0x627   : > { %v5277_v46 = vadd.f32 %v8951_v20, %v5276_v24 }
 0x628   : > { %v5000_v31 = vmax.f32 %v4983_v19, 0.0 }
 0x62a   : > { %v5016_v56 = vpack.c.bf16 %v5000_v31, %v5000_v31 }
 0x62c   : > { %v5096_v22 = vunpack.c.l.b16 %v5016_v56 }
 0x62e   : > { %v5104_v43 = vpack.c.b16 %v5096_v22, %v5095_v27  ;;  %v5279_v17 = vpop.f32.mrf.mxu0 }
 0x62f   : > { %v5280_v45 = vadd.f32 %v8951_v20, %v5279_v17 }
 0x630   : > { %5337 = vmatmul.bf16.gmra.mxu1 %v5104_v43 }
 0x636   : > { %v5281_v42 = vpop.f32.mrf.mxu0 }
 0x637   : > { %v5282_v34 = vadd.f32 %v8951_v20, %v5281_v42 }
 0x63d   : > { %v5303_v3 = vpop.f32.mrf.mxu1 }
 0x63e   : > { %v5304_v63 = vadd.f32 %v5303_v3, %v5255_v9  ;;  %v5284_v37 = vpop.f32.mrf.mxu0 }
 0x63f   : > { %v5285_v39 = vadd.f32 %v8951_v20, %v5284_v37 }
 0x640   : > { %5343 = vst [vmem:[%s8959_s5] sm:$0xff] %v5304_v63 }
 0x645   : > { %v5305_v15 = vpop.f32.mrf.mxu1 }
 0x646   : > { %v5306_v41 = vadd.f32 %v5305_v15, %v5257_v62  ;;  %v5286_v18 = vpop.f32.mrf.mxu0 }
 0x647   : > { %v5287_v50 = vadd.f32 %v8951_v20, %v5286_v18 }
 0x648   : > { %5344 = vst [vmem:[%s8959_s5 + $0x8] sm:$0xff] %v5306_v41 }
 0x64d   : > { %v5308_v38 = vpop.f32.mrf.mxu1 }
 0x64e   : > { %v5309_v49 = vadd.f32 %v5308_v38, %v5260_v1  ;;  %v5289_v51 = vpop.f32.mrf.mxu0 }
 0x64f   : > { %v5290_v26 = vadd.f32 %v8951_v20, %v5289_v51 }
 0x650   : > { %5345 = vst [vmem:[%s8959_s5 + $0x10] sm:$0xff] %v5309_v49 }
 0x655   : > { %v5310_v21 = vpop.f32.mrf.mxu1 }
 0x656   : > { %v5311_v4 = vadd.f32 %v5310_v21, %v5262_v8  ;;  %v5291_v31 = vpop.f32.mrf.mxu0 }
 0x657   : > { %v5292_v56 = vadd.f32 %v8951_v20, %v5291_v31 }
 0x658   : > { %5346 = vst [vmem:[%s8959_s5 + $0x18] sm:$0xff] %v5311_v4 }
 0x65d   : > { %v5313_v23 = vpop.f32.mrf.mxu1 }
 0x65e   : > { %v5314_v16 = vadd.f32 %v5313_v23, %v5265_v52 }
 0x660   : > { %5347 = vst [vmem:[%s8959_s5 + $0x20] sm:$0xff] %v5314_v16 }
 0x665   : > { %v5315_v14 = vpop.f32.mrf.mxu1 }
 0x666   : > { %v5316_v2 = vadd.f32 %v5315_v14, %v5267_v58 }
 0x668   : > { %5348 = vst [vmem:[%s8959_s5 + $0x28] sm:$0xff] %v5316_v2 }
 0x66d   : > { %v5318_v13 = vpop.f32.mrf.mxu1 }
 0x66e   : > { %v5319_v57 = vadd.f32 %v5318_v13, %v5270_v6 }
 0x670   : > { %5349 = vst [vmem:[%s8959_s5 + $0x30] sm:$0xff] %v5319_v57 }
 0x675   : > { %v5320_v33 = vpop.f32.mrf.mxu1 }
 0x676   : > { %v5321_v54 = vadd.f32 %v5320_v33, %v5272_v10 }
 0x678   : > { %5350 = vst [vmem:[%s8959_s5 + $0x38] sm:$0xff] %v5321_v54 }
 0x67d   : > { %v5323_v30 = vpop.f32.mrf.mxu1 }
 0x67e   : > { %v5324_v28 = vadd.f32 %v5323_v30, %v5275_v5 }
 0x680   : > { %5351 = vst [vmem:[%s8959_s5 + $0x40] sm:$0xff] %v5324_v28 }
 0x685   : > { %v5325_v0 = vpop.f32.mrf.mxu1 }
 0x686   : > { %v5326_v60 = vadd.f32 %v5325_v0, %v5277_v46 }
 0x688   : > { %5352 = vst [vmem:[%s8959_s5 + $0x48] sm:$0xff] %v5326_v60 }
 0x68d   : > { %v5328_v35 = vpop.f32.mrf.mxu1 }
 0x68e   : > { %v5329_v7 = vadd.f32 %v5328_v35, %v5280_v45 }
 0x690   : > { %5353 = vst [vmem:[%s8959_s5 + $0x50] sm:$0xff] %v5329_v7 }
 0x695   : > { %v5330_v47 = vpop.f32.mrf.mxu1 }
 0x696   : > { %v5331_v55 = vadd.f32 %v5330_v47, %v5282_v34 }
 0x698   : > { %5354 = vst [vmem:[%s8959_s5 + $0x58] sm:$0xff] %v5331_v55 }
 0x69d   : > { %v5333_v11 = vpop.f32.mrf.mxu1 }
 0x69e   : > { %v5334_v32 = vadd.f32 %v5333_v11, %v5285_v39 }
 0x6a0   : > { %5355 = vst [vmem:[%s8959_s5 + $0x60] sm:$0xff] %v5334_v32 }
 0x6a5   : > { %v5335_v59 = vpop.f32.mrf.mxu1 }
 0x6a6   : > { %v5336_v36 = vadd.f32 %v5335_v59, %v5287_v50 }
 0x6a8   : > { %5356 = vst [vmem:[%s8959_s5 + $0x68] sm:$0xff] %v5336_v36 }
 0x6ad   : > { %v5338_v19 = vpop.f32.mrf.mxu1 }
 0x6ae   : > { %v5339_v40 = vadd.f32 %v5338_v19, %v5290_v26 }
 0x6b0   : > { %5357 = vst [vmem:[%s8959_s5 + $0x70] sm:$0xff] %v5339_v40 }
 0x6b5   : > { %v5340_v27 = vpop.f32.mrf.mxu1 }
 0x6b6   : > { %v5341_v22 = vadd.f32 %v5340_v27, %v5292_v56 }
 0x6b8   : > { %5358 = vst [vmem:[%s8959_s5 + $0x78] sm:$0xff] %v5341_v22 }
 0x6b9 PF: > { %s31_s2 = sadd.s32 1, %s6609_s2  }
 0x6ba   : > { %p28_p4 = scmp.ge.s32.totalorder %s31_s2, 4  }
 0x6bc   :  { %30 = sbr.rel (!%p28_p4) target bundleno = 7 (0x7), region = 134 }

</bundles_post_ra>
